<compile_context>
chip_gen: v5e
topology: v5e:2x2
jax: 0.10.0
libtpu: 0.0.40
codegen_flags: <defaults>
</compile_context>

<pallas_src>
import functools

import jax
import jax.numpy as jnp
from jax.experimental import pallas as pl
from jax.experimental.pallas import tpu as pltpu


def _self_attention_kernel(x_ref, wqkv_ref, bqkv_ref, wo_ref, bo_ref, o_ref,
                           *, num_heads, mxu_dtype):
    tb, n, c = x_ref.shape
    h = num_heads
    d = c // h
    m = tb * n                               # rows fed to the MXU per grid step
    f32 = jnp.float32

    # ---- Fused QKV projection: one lane-dense (M, C) @ (C, 3C) matmul. ------
    # (softmax scale is already folded into the Q columns / bias on the host.)
    x = x_ref[...].reshape(m, c).astype(mxu_dtype)
    qkv = jnp.dot(x, wqkv_ref[...], preferred_element_type=f32) + bqkv_ref[...]

    # ---- Head split: lane slices stacked into a leading (head) batch dim. ---
    # The attention core is batched over (head, batch-row).  With N and d both
    # << 128 it stays entirely in f32: bf16 packing passes would cost more than
    # the MXU saves on these tiny matmuls.
    def heads(col0):
        parts = [qkv[:, col0 + i * d: col0 + (i + 1) * d] for i in range(h)]
        return jnp.stack(parts, axis=0).reshape(h * tb, n, d)

    q = heads(0)            # (H*TB, N, d), scale already applied via weights
    k = heads(c)
    v = heads(2 * c)

    # QK^T: contract the last dims of both operands directly (no explicit .T).
    s = jnp.einsum('bqd,bkd->bqk', q, k, preferred_element_type=f32)
    s = s - jnp.max(s, axis=-1, keepdims=True)
    p = jnp.exp(s)
    p = p * pl.reciprocal(jnp.sum(p, axis=-1, keepdims=True), approx=True)

    ctx = jnp.einsum('bqk,bkd->bqd', p, v, preferred_element_type=f32)

    # ---- Re-assemble heads into lanes: (H*TB, N, d) -> (M, C = H*d). --------
    ctx = ctx.reshape(h, m, d)
    ctx = jnp.concatenate([ctx[i] for i in range(h)], axis=-1)   # (M, C)

    # ---- Output projection: single full-depth (M, C) @ (C, C) matmul. -------
    out = jnp.dot(ctx.astype(mxu_dtype), wo_ref[...],
                  preferred_element_type=f32) + bo_ref[...]
    o_ref[...] = out.reshape(tb, n, c).astype(o_ref.dtype)


def _hw_defaults():
    """Generation-aware (min_grid_steps, max_rows_per_step, vmem_limit_bytes)."""
    vmem_cap = None
    try:
        vmem_cap = getattr(pltpu.get_tpu_info(), "vmem_capacity_bytes", None)
    except Exception:
        vmem_cap = None
    if vmem_cap is None:
        kind = ""
        try:
            kind = jax.devices()[0].device_kind.lower()
        except Exception:
            pass
        vmem_cap = 64 * 2**20 if "7" in kind else 128 * 2**20
    if vmem_cap <= 80 * 2**20:
        # v7x-like: 64 MiB VMEM per TC but 2 TCs -> keep an even, >=2-step grid.
        return 2, 1024, 48 * 2**20
    # v5e / v6e: single TensorCore, 128 MiB VMEM -> fewest, biggest steps
    # (per-step pipeline overhead is pure loss on a single core).
    return 1, 2048, 64 * 2**20


def _step_vmem_bytes(tb, n, c, h, mxu_bytes):
    """Rough per-grid-step VMEM working set: x/o blocks (double-buffered) +
    single-buffered fused weights + in-kernel intermediates."""
    m = tb * n
    d = c // h
    io = 2 * 2 * tb * n * c * 4                    # x & o blocks, double-buffered
    w = 4 * c * c * mxu_bytes + 4 * c * 4          # fused weights + f32 biases
    inter = m * 3 * c * (4 + mxu_bytes)            # qkv (f32) + x cast
    inter += 3 * h * m * d * 4                     # stacked q, k, v (f32)
    inter += 2 * h * tb * n * n * 4                # scores + probs (f32)
    inter += m * c * (4 + mxu_bytes)               # ctx (f32) + cast
    return io + w + inter


def _choose_block_batch(batch, n_cols, channels, num_heads, mxu_bytes,
                        min_steps, max_rows, vmem_budget):
    """Largest TB dividing `batch` that fits the row cap and VMEM budget while
    keeping >= min_steps (even) grid steps."""
    best = 1
    for tb in range(1, batch + 1):
        if batch % tb:
            continue
        steps = batch // tb
        if steps < min_steps and batch >= min_steps:
            continue
        if min_steps > 1 and steps % min_steps and batch % min_steps == 0:
            continue                                # even split over the TCs
        if tb * n_cols > max_rows:
            continue
        if _step_vmem_bytes(tb, n_cols, channels, num_heads, mxu_bytes) > vmem_budget:
            continue
        best = tb
    return best


def self_attention(x, params, *, num_heads, block_b=None,
                   mxu_dtype=jnp.bfloat16):
    """x: (B, num_cols, channels) f32.
    params: wq_t/wk_t/wv_t/wo_t of shape (C, C) (= W.T) and bq/bk/bv/bo of (C,)."""
    B, N, C = x.shape
    assert C % num_heads == 0
    H = num_heads
    d = C // H
    scale = float(d) ** -0.5
    f32 = jnp.float32
    mxu_bytes = jnp.dtype(mxu_dtype).itemsize

    min_steps, max_rows, vmem_limit = _hw_defaults()
    if block_b is None:
        tb = _choose_block_batch(B, N, C, H, mxu_bytes, min_steps, max_rows,
                                 int(0.7 * vmem_limit))
    else:
        tb = block_b
    assert B % tb == 0, (B, tb)

    # Host-side weight prep (traced once; zero per-step cost):
    #  * fold the softmax scale into the Q projection,
    #  * fuse Q/K/V into one (C, 3C) weight and (1, 3C) bias,
    #  * cast MXU operands to mxu_dtype (bf16 halves weight DMA on every
    #    generation); accumulation / biases / softmax stay f32.
    wq = params["wq_t"].astype(f32) * scale
    bq = params["bq"].astype(f32) * scale
    w_qkv = jnp.concatenate(
        [wq, params["wk_t"].astype(f32), params["wv_t"].astype(f32)],
        axis=1).astype(mxu_dtype)                                     # (C, 3C)
    b_qkv = jnp.concatenate(
        [bq, params["bk"].astype(f32), params["bv"].astype(f32)]
    ).reshape(1, 3 * C)                                               # (1, 3C)
    w_o = params["wo_t"].astype(f32).astype(mxu_dtype)                # (C, C)
    b_o = params["bo"].astype(f32).reshape(1, C)                      # (1, C)

    kernel = functools.partial(_self_attention_kernel,
                               num_heads=H, mxu_dtype=mxu_dtype)

    w_bytes = 4 * C * C * mxu_bytes + 4 * C * 4
    cost = pl.CostEstimate(
        flops=8 * B * N * C * C + 4 * B * H * N * N * d,
        transcendentals=B * H * N * N,
        bytes_accessed=2 * B * N * C * x.dtype.itemsize + w_bytes,
    )

    def build(single_buffer_weights):
        weight_kwargs = (dict(pipeline_mode=pl.Buffered(1))
                         if single_buffer_weights else {})

        def fixed(shape):
            # Constant index_map -> block fetched once; single-buffered when
            # supported (double-buffering a never-changing block wastes VMEM).
            nd = len(shape)
            return pl.BlockSpec(shape, lambda b, _nd=nd: (0,) * _nd,
                                **weight_kwargs)

        x_spec = pl.BlockSpec((tb, N, C), lambda b: (b, 0, 0))
        o_spec = pl.BlockSpec((tb, N, C), lambda b: (b, 0, 0))
        return pl.pallas_call(
            kernel,
            out_shape=jax.ShapeDtypeStruct((B, N, C), x.dtype),
            grid_spec=pltpu.PrefetchScalarGridSpec(
                num_scalar_prefetch=0,
                grid=(B // tb,),
                in_specs=[x_spec,
                          fixed((C, 3 * C)), fixed((1, 3 * C)),   # fused qkv
                          fixed((C, C)), fixed((1, C))],          # output proj
                out_specs=o_spec,
            ),
            compiler_params=pltpu.CompilerParams(
                dimension_semantics=("parallel",),
                vmem_limit_bytes=vmem_limit),
            cost_estimate=cost,
        )

    args = (x, w_qkv, b_qkv, w_o, b_o)
    try:
        return build(True)(*args)
    except Exception:
        # pipeline_mode=pl.Buffered(1) unsupported on this jax/backend version:
        # fall back to default double-buffered weight blocks (small VMEM cost).
        return build(False)(*args)


def _init_linear(key, in_f, out_f):
    """Deterministic PyTorch-Linear-like init: W (out, in), b (out,)."""
    kw, kb = jax.random.split(key)
    bound = 1.0 / (in_f ** 0.5)
    w = jax.random.uniform(kw, (out_f, in_f), jnp.float32, -bound, bound)
    b = jax.random.uniform(kb, (out_f,), jnp.float32, -bound, bound)
    return w, b


def _reference(x, params, num_heads):
    """Pure-JAX reference mirroring the PyTorch forward exactly."""
    B, N, C = x.shape
    d = C // num_heads
    scale = d ** (-0.5)

    def lin(t, w_t, b):
        return t @ w_t + b

    def split_heads(t):
        t = t.reshape(B, N, num_heads, d).transpose(0, 2, 1, 3)
        return t.reshape(B * num_heads, N, d)

    Q = split_heads(lin(x, params["wq_t"], params["bq"]))
    K = split_heads(lin(x, params["wk_t"], params["bk"]))
    V = split_heads(lin(x, params["wv_t"], params["bv"]))
    s = jnp.einsum('ijk,ilk->ijl', Q, K) * scale
    p = jax.nn.softmax(s, axis=-1)
    o = jnp.einsum('ijk,ikl->ijl', p, V)
    o = o.reshape(B, num_heads, N, d).transpose(0, 2, 1, 3).reshape(B, N, C)
    return lin(o, params["wo_t"], params["bo"])


if __name__ == "__main__":
    B, N, C, H = 8, 8, 32, 4     # batch, num_cols, channels, num_heads

    root = jax.random.PRNGKey(0)
    kx, kq, kk, kv, ko = jax.random.split(root, 5)
    x = jax.random.normal(kx, (B, N, C), jnp.float32)

    wq, bq = _init_linear(kq, C, C)
    wk, bk = _init_linear(kk, C, C)
    wv, bv = _init_linear(kv, C, C)
    wo, bo = _init_linear(ko, C, C)
    params = {"wq_t": wq.T, "bq": bq, "wk_t": wk.T, "bk": bk,
              "wv_t": wv.T, "bv": bv, "wo_t": wo.T, "bo": bo}

    ref = _reference(x, params, H)

    # f32 MXU operands: tight correctness check (approx softmax reciprocal only).
    out_f32 = jax.block_until_ready(
        self_attention(x, params, num_heads=H, mxu_dtype=jnp.float32))
    assert out_f32.shape == (B, N, C)
    err32 = float(jnp.max(jnp.abs(out_f32 - ref)))
    assert err32 < 2e-3, f"f32 max abs err {err32}"

    # bf16 MXU operands (default fast path on v5e/v6e/v7x); accumulation and
    # softmax stay f32, so only bf16 operand rounding is expected.
    out_bf16 = jax.block_until_ready(
        self_attention(x, params, num_heads=H, mxu_dtype=jnp.bfloat16))
    err16 = float(jnp.max(jnp.abs(out_bf16 - ref)))
    assert err16 < 5e-2, f"bf16 max abs err {err16}"

    print("KERNEL_OK")
</pallas_src>

<mosaic_0001>
module attributes {stable_mosaic.version = 11 : i64} {
  func.func @_self_attention_kernel(%arg0: i32, %arg1: memref<8x8x32xf32, #tpu.memory_space<vmem>>, %arg2: memref<32x96xf32, #tpu.memory_space<vmem>>, %arg3: memref<1x96xf32, #tpu.memory_space<vmem>>, %arg4: memref<32x32xf32, #tpu.memory_space<vmem>>, %arg5: memref<1x32xf32, #tpu.memory_space<vmem>>, %arg6: memref<8x8x32xf32, #tpu.memory_space<vmem>>) attributes {dimension_semantics = [#tpu.dimension_semantics<parallel>], iteration_bounds = array<i64: 1>, scalar_prefetch = 0 : i64, scratch_operands = 0 : i64, tpu.core_type = #tpu.core_type<tc>, window_params = [{transform_indices = @transform_0, window_bounds = array<i64: 8, 8, 32>}, {pipeline_mode = #tpu.pipeline_mode<synchronous>, transform_indices = @transform_1, window_bounds = array<i64: 32, 96>}, {pipeline_mode = #tpu.pipeline_mode<synchronous>, transform_indices = @transform_2, window_bounds = array<i64: 1, 96>}, {pipeline_mode = #tpu.pipeline_mode<synchronous>, transform_indices = @transform_3, window_bounds = array<i64: 32, 32>}, {pipeline_mode = #tpu.pipeline_mode<synchronous>, transform_indices = @transform_4, window_bounds = array<i64: 1, 32>}, {transform_indices = @transform_5, window_bounds = array<i64: 8, 8, 32>}]} {
    %c0 = arith.constant 0 : index
    %c0_0 = arith.constant 0 : index
    %c0_1 = arith.constant 0 : index
    %0 = vector.load %arg1[%c0, %c0_0, %c0_1] : memref<8x8x32xf32, #tpu.memory_space<vmem>>, vector<8x8x32xf32>
    %1 = vector.shape_cast %0 : vector<8x8x32xf32> to vector<64x32xf32>
    %c0_2 = arith.constant 0 : index
    %c0_3 = arith.constant 0 : index
    %2 = vector.load %arg2[%c0_2, %c0_3] : memref<32x96xf32, #tpu.memory_space<vmem>>, vector<32x96xf32>
    %cst = arith.constant dense<0.000000e+00> : vector<64x96xf32>
    %3 = tpu.matmul %1, %2, %cst {dimension_numbers = #tpu.dot_dimension_numbers<[1], [0], [0], [1], [0, 0, 1, 1], [], []>} : vector<64x32xf32>, vector<32x96xf32>, vector<64x96xf32> -> vector<64x96xf32>
    %c0_4 = arith.constant 0 : index
    %c0_5 = arith.constant 0 : index
    %4 = vector.load %arg3[%c0_4, %c0_5] : memref<1x96xf32, #tpu.memory_space<vmem>>, vector<1x96xf32>
    %5 = vector.broadcast %4 : vector<1x96xf32> to vector<64x96xf32>
    %6 = arith.addf %3, %5 : vector<64x96xf32>
    %7 = vector.extract_strided_slice %6 {offsets = [0, 0], sizes = [64, 8], strides = [1, 1]} : vector<64x96xf32> to vector<64x8xf32>
    %8 = vector.extract_strided_slice %6 {offsets = [0, 8], sizes = [64, 8], strides = [1, 1]} : vector<64x96xf32> to vector<64x8xf32>
    %9 = vector.extract_strided_slice %6 {offsets = [0, 16], sizes = [64, 8], strides = [1, 1]} : vector<64x96xf32> to vector<64x8xf32>
    %10 = vector.extract_strided_slice %6 {offsets = [0, 24], sizes = [64, 8], strides = [1, 1]} : vector<64x96xf32> to vector<64x8xf32>
    %11 = vector.shape_cast %7 : vector<64x8xf32> to vector<1x64x8xf32>
    %12 = vector.shape_cast %8 : vector<64x8xf32> to vector<1x64x8xf32>
    %13 = vector.shape_cast %9 : vector<64x8xf32> to vector<1x64x8xf32>
    %14 = vector.shape_cast %10 : vector<64x8xf32> to vector<1x64x8xf32>
    %15 = tpu.concatenate %11, %12, %13, %14 in 0 : vector<1x64x8xf32>, vector<1x64x8xf32>, vector<1x64x8xf32>, vector<1x64x8xf32> -> vector<4x64x8xf32>
    %16 = vector.shape_cast %15 : vector<4x64x8xf32> to vector<32x8x8xf32>
    %17 = vector.extract_strided_slice %6 {offsets = [0, 32], sizes = [64, 8], strides = [1, 1]} : vector<64x96xf32> to vector<64x8xf32>
    %18 = vector.extract_strided_slice %6 {offsets = [0, 40], sizes = [64, 8], strides = [1, 1]} : vector<64x96xf32> to vector<64x8xf32>
    %19 = vector.extract_strided_slice %6 {offsets = [0, 48], sizes = [64, 8], strides = [1, 1]} : vector<64x96xf32> to vector<64x8xf32>
    %20 = vector.extract_strided_slice %6 {offsets = [0, 56], sizes = [64, 8], strides = [1, 1]} : vector<64x96xf32> to vector<64x8xf32>
    %21 = vector.shape_cast %17 : vector<64x8xf32> to vector<1x64x8xf32>
    %22 = vector.shape_cast %18 : vector<64x8xf32> to vector<1x64x8xf32>
    %23 = vector.shape_cast %19 : vector<64x8xf32> to vector<1x64x8xf32>
    %24 = vector.shape_cast %20 : vector<64x8xf32> to vector<1x64x8xf32>
    %25 = tpu.concatenate %21, %22, %23, %24 in 0 : vector<1x64x8xf32>, vector<1x64x8xf32>, vector<1x64x8xf32>, vector<1x64x8xf32> -> vector<4x64x8xf32>
    %26 = vector.shape_cast %25 : vector<4x64x8xf32> to vector<32x8x8xf32>
    %27 = vector.extract_strided_slice %6 {offsets = [0, 64], sizes = [64, 8], strides = [1, 1]} : vector<64x96xf32> to vector<64x8xf32>
    %28 = vector.extract_strided_slice %6 {offsets = [0, 72], sizes = [64, 8], strides = [1, 1]} : vector<64x96xf32> to vector<64x8xf32>
    %29 = vector.extract_strided_slice %6 {offsets = [0, 80], sizes = [64, 8], strides = [1, 1]} : vector<64x96xf32> to vector<64x8xf32>
    %30 = vector.extract_strided_slice %6 {offsets = [0, 88], sizes = [64, 8], strides = [1, 1]} : vector<64x96xf32> to vector<64x8xf32>
    %31 = vector.shape_cast %27 : vector<64x8xf32> to vector<1x64x8xf32>
    %32 = vector.shape_cast %28 : vector<64x8xf32> to vector<1x64x8xf32>
    %33 = vector.shape_cast %29 : vector<64x8xf32> to vector<1x64x8xf32>
    %34 = vector.shape_cast %30 : vector<64x8xf32> to vector<1x64x8xf32>
    %35 = tpu.concatenate %31, %32, %33, %34 in 0 : vector<1x64x8xf32>, vector<1x64x8xf32>, vector<1x64x8xf32>, vector<1x64x8xf32> -> vector<4x64x8xf32>
    %36 = vector.shape_cast %35 : vector<4x64x8xf32> to vector<32x8x8xf32>
    "tpu.trace_start"() <{level = 10 : i32, message = "bqd,bkd->bqk"}> : () -> ()
    %cst_6 = arith.constant dense<0.000000e+00> : vector<32x8x8xf32>
    %37 = tpu.matmul %16, %26, %cst_6 {dimension_numbers = #tpu.dot_dimension_numbers<[2], [2], [1], [1], [0, 0, 0, 1, 1, 1], [0], [0]>} : vector<32x8x8xf32>, vector<32x8x8xf32>, vector<32x8x8xf32> -> vector<32x8x8xf32>
    "tpu.trace_stop"() : () -> ()
    %cst_7 = arith.constant dense<0xFF800000> : vector<32x8xf32>
    %38 = vector.multi_reduction <maximumf>, %37, %cst_7 [2] : vector<32x8x8xf32> to vector<32x8xf32>
    %39 = vector.shape_cast %38 : vector<32x8xf32> to vector<32x8x1xf32>
    %40 = vector.broadcast %39 : vector<32x8x1xf32> to vector<32x8x8xf32>
    %41 = arith.subf %37, %40 : vector<32x8x8xf32>
    %42 = math.exp %41 : vector<32x8x8xf32>
    %cst_8 = arith.constant dense<0.000000e+00> : vector<32x8xf32>
    %43 = vector.multi_reduction <add>, %42, %cst_8 [2] : vector<32x8x8xf32> to vector<32x8xf32>
    %44 = vector.shape_cast %43 : vector<32x8xf32> to vector<32x8x1xf32>
    %45 = tpu.reciprocal %44 {approx = true} : vector<32x8x1xf32> -> vector<32x8x1xf32>
    %46 = vector.broadcast %45 : vector<32x8x1xf32> to vector<32x8x8xf32>
    %47 = arith.mulf %42, %46 : vector<32x8x8xf32>
    "tpu.trace_start"() <{level = 10 : i32, message = "bqk,bkd->bqd"}> : () -> ()
    %cst_9 = arith.constant dense<0.000000e+00> : vector<32x8x8xf32>
    %48 = tpu.matmul %47, %36, %cst_9 {dimension_numbers = #tpu.dot_dimension_numbers<[2], [1], [1], [2], [0, 0, 0, 1, 1, 2], [0], [0]>} : vector<32x8x8xf32>, vector<32x8x8xf32>, vector<32x8x8xf32> -> vector<32x8x8xf32>
    "tpu.trace_stop"() : () -> ()
    %49 = vector.shape_cast %48 : vector<32x8x8xf32> to vector<4x64x8xf32>
    %50 = vector.extract_strided_slice %49 {offsets = [0, 0, 0], sizes = [1, 64, 8], strides = [1, 1, 1]} : vector<4x64x8xf32> to vector<1x64x8xf32>
    %51 = vector.shape_cast %50 : vector<1x64x8xf32> to vector<64x8xf32>
    %52 = vector.extract_strided_slice %49 {offsets = [1, 0, 0], sizes = [1, 64, 8], strides = [1, 1, 1]} : vector<4x64x8xf32> to vector<1x64x8xf32>
    %53 = vector.shape_cast %52 : vector<1x64x8xf32> to vector<64x8xf32>
    %54 = vector.extract_strided_slice %49 {offsets = [2, 0, 0], sizes = [1, 64, 8], strides = [1, 1, 1]} : vector<4x64x8xf32> to vector<1x64x8xf32>
    %55 = vector.shape_cast %54 : vector<1x64x8xf32> to vector<64x8xf32>
    %56 = vector.extract_strided_slice %49 {offsets = [3, 0, 0], sizes = [1, 64, 8], strides = [1, 1, 1]} : vector<4x64x8xf32> to vector<1x64x8xf32>
    %57 = vector.shape_cast %56 : vector<1x64x8xf32> to vector<64x8xf32>
    %58 = tpu.concatenate %51, %53, %55, %57 in 1 : vector<64x8xf32>, vector<64x8xf32>, vector<64x8xf32>, vector<64x8xf32> -> vector<64x32xf32>
    %c0_10 = arith.constant 0 : index
    %c0_11 = arith.constant 0 : index
    %59 = vector.load %arg4[%c0_10, %c0_11] : memref<32x32xf32, #tpu.memory_space<vmem>>, vector<32x32xf32>
    %cst_12 = arith.constant dense<0.000000e+00> : vector<64x32xf32>
    %60 = tpu.matmul %58, %59, %cst_12 {dimension_numbers = #tpu.dot_dimension_numbers<[1], [0], [0], [1], [0, 0, 1, 1], [], []>} : vector<64x32xf32>, vector<32x32xf32>, vector<64x32xf32> -> vector<64x32xf32>
    %c0_13 = arith.constant 0 : index
    %c0_14 = arith.constant 0 : index
    %61 = vector.load %arg5[%c0_13, %c0_14] : memref<1x32xf32, #tpu.memory_space<vmem>>, vector<1x32xf32>
    %62 = vector.broadcast %61 : vector<1x32xf32> to vector<64x32xf32>
    %63 = arith.addf %60, %62 : vector<64x32xf32>
    %64 = vector.shape_cast %63 : vector<64x32xf32> to vector<8x8x32xf32>
    %c0_15 = arith.constant 0 : index
    %c0_16 = arith.constant 0 : index
    %c0_17 = arith.constant 0 : index
    %65 = vector.load %arg6[%c0_15, %c0_16, %c0_17] : memref<8x8x32xf32, #tpu.memory_space<vmem>>, vector<8x8x32xf32>
    tpu.vector_store %arg6[%c0_15, %c0_16, %c0_17], %64 {strides = array<i32>} : memref<8x8x32xf32, #tpu.memory_space<vmem>>, vector<8x8x32xf32>,
    return
  }
  func.func @transform_0(%arg0: i32) -> (i32, i32, i32) {
    %c0_i32 = arith.constant 0 : i32
    %c0_i32_0 = arith.constant 0 : i32
    %c0_i32_1 = arith.constant 0 : i32
    return %arg0, %c0_i32, %c0_i32_0 : i32, i32, i32
  }
  func.func @transform_1(%arg0: i32) -> (i32, i32) {
    %c0_i32 = arith.constant 0 : i32
    %c0_i32_0 = arith.constant 0 : i32
    %c0_i32_1 = arith.constant 0 : i32
    return %c0_i32, %c0_i32_0 : i32, i32
  }
  func.func @transform_2(%arg0: i32) -> (i32, i32) {
    %c0_i32 = arith.constant 0 : i32
    %c0_i32_0 = arith.constant 0 : i32
    %c0_i32_1 = arith.constant 0 : i32
    return %c0_i32, %c0_i32_0 : i32, i32
  }
  func.func @transform_3(%arg0: i32) -> (i32, i32) {
    %c0_i32 = arith.constant 0 : i32
    %c0_i32_0 = arith.constant 0 : i32
    %c0_i32_1 = arith.constant 0 : i32
    return %c0_i32, %c0_i32_0 : i32, i32
  }
  func.func @transform_4(%arg0: i32) -> (i32, i32) {
    %c0_i32 = arith.constant 0 : i32
    %c0_i32_0 = arith.constant 0 : i32
    %c0_i32_1 = arith.constant 0 : i32
    return %c0_i32, %c0_i32_0 : i32, i32
  }
  func.func @transform_5(%arg0: i32) -> (i32, i32, i32) {
    %c0_i32 = arith.constant 0 : i32
    %c0_i32_0 = arith.constant 0 : i32
    %c0_i32_1 = arith.constant 0 : i32
    return %arg0, %c0_i32, %c0_i32_0 : i32, i32, i32
  }
}

module attributes {stable_mosaic.version = 11 : i64} {
  func.func @_self_attention_kernel(%arg0: i32, %arg1: memref<8x8x32xf32, #tpu.memory_space<vmem>>, %arg2: memref<32x96xf32, #tpu.memory_space<vmem>>, %arg3: memref<1x96xf32, #tpu.memory_space<vmem>>, %arg4: memref<32x32xf32, #tpu.memory_space<vmem>>, %arg5: memref<1x32xf32, #tpu.memory_space<vmem>>, %arg6: memref<8x8x32xf32, #tpu.memory_space<vmem>>) attributes {dimension_semantics = [#tpu.dimension_semantics<parallel>], iteration_bounds = array<i64: 1>, scalar_prefetch = 0 : i64, scratch_operands = 0 : i64, tpu.core_type = #tpu.core_type<tc>, window_params = [{transform_indices = @transform_0, window_bounds = array<i64: 8, 8, 32>}, {pipeline_mode = #tpu.pipeline_mode<synchronous>, transform_indices = @transform_1, window_bounds = array<i64: 32, 96>}, {pipeline_mode = #tpu.pipeline_mode<synchronous>, transform_indices = @transform_2, window_bounds = array<i64: 1, 96>}, {pipeline_mode = #tpu.pipeline_mode<synchronous>, transform_indices = @transform_3, window_bounds = array<i64: 32, 32>}, {pipeline_mode = #tpu.pipeline_mode<synchronous>, transform_indices = @transform_4, window_bounds = array<i64: 1, 32>}, {transform_indices = @transform_5, window_bounds = array<i64: 8, 8, 32>}]} {
    %c0 = arith.constant 0 : index
    %c0_0 = arith.constant 0 : index
    %c0_1 = arith.constant 0 : index
    %0 = vector.load %arg1[%c0, %c0_0, %c0_1] : memref<8x8x32xf32, #tpu.memory_space<vmem>>, vector<8x8x32xf32>
    %1 = vector.shape_cast %0 : vector<8x8x32xf32> to vector<64x32xf32>
    %c0_2 = arith.constant 0 : index
    %c0_3 = arith.constant 0 : index
    %2 = vector.load %arg2[%c0_2, %c0_3] : memref<32x96xf32, #tpu.memory_space<vmem>>, vector<32x96xf32>
    %cst = arith.constant dense<0.000000e+00> : vector<64x96xf32>
    %3 = tpu.matmul %1, %2, %cst {dimension_numbers = #tpu.dot_dimension_numbers<[1], [0], [0], [1], [0, 0, 1, 1], [], []>} : vector<64x32xf32>, vector<32x96xf32>, vector<64x96xf32> -> vector<64x96xf32>
    %c0_4 = arith.constant 0 : index
    %c0_5 = arith.constant 0 : index
    %4 = vector.load %arg3[%c0_4, %c0_5] : memref<1x96xf32, #tpu.memory_space<vmem>>, vector<1x96xf32>
    %5 = vector.broadcast %4 : vector<1x96xf32> to vector<64x96xf32>
    %6 = arith.addf %3, %5 : vector<64x96xf32>
    %7 = vector.extract_strided_slice %6 {offsets = [0, 0], sizes = [64, 8], strides = [1, 1]} : vector<64x96xf32> to vector<64x8xf32>
    %8 = vector.extract_strided_slice %6 {offsets = [0, 8], sizes = [64, 8], strides = [1, 1]} : vector<64x96xf32> to vector<64x8xf32>
    %9 = vector.extract_strided_slice %6 {offsets = [0, 16], sizes = [64, 8], strides = [1, 1]} : vector<64x96xf32> to vector<64x8xf32>
    %10 = vector.extract_strided_slice %6 {offsets = [0, 24], sizes = [64, 8], strides = [1, 1]} : vector<64x96xf32> to vector<64x8xf32>
    %11 = vector.shape_cast %7 : vector<64x8xf32> to vector<1x64x8xf32>
    %12 = vector.shape_cast %8 : vector<64x8xf32> to vector<1x64x8xf32>
    %13 = vector.shape_cast %9 : vector<64x8xf32> to vector<1x64x8xf32>
    %14 = vector.shape_cast %10 : vector<64x8xf32> to vector<1x64x8xf32>
    %15 = tpu.concatenate %11, %12, %13, %14 in 0 : vector<1x64x8xf32>, vector<1x64x8xf32>, vector<1x64x8xf32>, vector<1x64x8xf32> -> vector<4x64x8xf32>
    %16 = vector.shape_cast %15 : vector<4x64x8xf32> to vector<32x8x8xf32>
    %17 = vector.extract_strided_slice %6 {offsets = [0, 32], sizes = [64, 8], strides = [1, 1]} : vector<64x96xf32> to vector<64x8xf32>
    %18 = vector.extract_strided_slice %6 {offsets = [0, 40], sizes = [64, 8], strides = [1, 1]} : vector<64x96xf32> to vector<64x8xf32>
    %19 = vector.extract_strided_slice %6 {offsets = [0, 48], sizes = [64, 8], strides = [1, 1]} : vector<64x96xf32> to vector<64x8xf32>
    %20 = vector.extract_strided_slice %6 {offsets = [0, 56], sizes = [64, 8], strides = [1, 1]} : vector<64x96xf32> to vector<64x8xf32>
    %21 = vector.shape_cast %17 : vector<64x8xf32> to vector<1x64x8xf32>
    %22 = vector.shape_cast %18 : vector<64x8xf32> to vector<1x64x8xf32>
    %23 = vector.shape_cast %19 : vector<64x8xf32> to vector<1x64x8xf32>
    %24 = vector.shape_cast %20 : vector<64x8xf32> to vector<1x64x8xf32>
    %25 = tpu.concatenate %21, %22, %23, %24 in 0 : vector<1x64x8xf32>, vector<1x64x8xf32>, vector<1x64x8xf32>, vector<1x64x8xf32> -> vector<4x64x8xf32>
    %26 = vector.shape_cast %25 : vector<4x64x8xf32> to vector<32x8x8xf32>
    %27 = vector.extract_strided_slice %6 {offsets = [0, 64], sizes = [64, 8], strides = [1, 1]} : vector<64x96xf32> to vector<64x8xf32>
    %28 = vector.extract_strided_slice %6 {offsets = [0, 72], sizes = [64, 8], strides = [1, 1]} : vector<64x96xf32> to vector<64x8xf32>
    %29 = vector.extract_strided_slice %6 {offsets = [0, 80], sizes = [64, 8], strides = [1, 1]} : vector<64x96xf32> to vector<64x8xf32>
    %30 = vector.extract_strided_slice %6 {offsets = [0, 88], sizes = [64, 8], strides = [1, 1]} : vector<64x96xf32> to vector<64x8xf32>
    %31 = vector.shape_cast %27 : vector<64x8xf32> to vector<1x64x8xf32>
    %32 = vector.shape_cast %28 : vector<64x8xf32> to vector<1x64x8xf32>
    %33 = vector.shape_cast %29 : vector<64x8xf32> to vector<1x64x8xf32>
    %34 = vector.shape_cast %30 : vector<64x8xf32> to vector<1x64x8xf32>
    %35 = tpu.concatenate %31, %32, %33, %34 in 0 : vector<1x64x8xf32>, vector<1x64x8xf32>, vector<1x64x8xf32>, vector<1x64x8xf32> -> vector<4x64x8xf32>
    %36 = vector.shape_cast %35 : vector<4x64x8xf32> to vector<32x8x8xf32>
    "tpu.trace_start"() <{level = 10 : i32, message = "bqd,bkd->bqk"}> : () -> ()
    %cst_6 = arith.constant dense<0.000000e+00> : vector<32x8x8xf32>
    %37 = tpu.matmul %16, %26, %cst_6 {dimension_numbers = #tpu.dot_dimension_numbers<[2], [2], [1], [1], [0, 0, 0, 1, 1, 1], [0], [0]>} : vector<32x8x8xf32>, vector<32x8x8xf32>, vector<32x8x8xf32> -> vector<32x8x8xf32>
    "tpu.trace_stop"() : () -> ()
    %cst_7 = arith.constant dense<0xFF800000> : vector<32x8xf32>
    %38 = vector.multi_reduction <maximumf>, %37, %cst_7 [2] : vector<32x8x8xf32> to vector<32x8xf32>
    %39 = vector.shape_cast %38 : vector<32x8xf32> to vector<32x8x1xf32>
    %40 = vector.broadcast %39 : vector<32x8x1xf32> to vector<32x8x8xf32>
    %41 = arith.subf %37, %40 : vector<32x8x8xf32>
    %42 = math.exp %41 : vector<32x8x8xf32>
    %cst_8 = arith.constant dense<0.000000e+00> : vector<32x8xf32>
    %43 = vector.multi_reduction <add>, %42, %cst_8 [2] : vector<32x8x8xf32> to vector<32x8xf32>
    %44 = vector.shape_cast %43 : vector<32x8xf32> to vector<32x8x1xf32>
    %45 = tpu.reciprocal %44 {approx = true} : vector<32x8x1xf32> -> vector<32x8x1xf32>
    %46 = vector.broadcast %45 : vector<32x8x1xf32> to vector<32x8x8xf32>
    %47 = arith.mulf %42, %46 : vector<32x8x8xf32>
    "tpu.trace_start"() <{level = 10 : i32, message = "bqk,bkd->bqd"}> : () -> ()
    %cst_9 = arith.constant dense<0.000000e+00> : vector<32x8x8xf32>
    %48 = tpu.matmul %47, %36, %cst_9 {dimension_numbers = #tpu.dot_dimension_numbers<[2], [1], [1], [2], [0, 0, 0, 1, 1, 2], [0], [0]>} : vector<32x8x8xf32>, vector<32x8x8xf32>, vector<32x8x8xf32> -> vector<32x8x8xf32>
    "tpu.trace_stop"() : () -> ()
    %49 = vector.shape_cast %48 : vector<32x8x8xf32> to vector<4x64x8xf32>
    %50 = vector.extract_strided_slice %49 {offsets = [0, 0, 0], sizes = [1, 64, 8], strides = [1, 1, 1]} : vector<4x64x8xf32> to vector<1x64x8xf32>
    %51 = vector.shape_cast %50 : vector<1x64x8xf32> to vector<64x8xf32>
    %52 = vector.extract_strided_slice %49 {offsets = [1, 0, 0], sizes = [1, 64, 8], strides = [1, 1, 1]} : vector<4x64x8xf32> to vector<1x64x8xf32>
    %53 = vector.shape_cast %52 : vector<1x64x8xf32> to vector<64x8xf32>
    %54 = vector.extract_strided_slice %49 {offsets = [2, 0, 0], sizes = [1, 64, 8], strides = [1, 1, 1]} : vector<4x64x8xf32> to vector<1x64x8xf32>
    %55 = vector.shape_cast %54 : vector<1x64x8xf32> to vector<64x8xf32>
    %56 = vector.extract_strided_slice %49 {offsets = [3, 0, 0], sizes = [1, 64, 8], strides = [1, 1, 1]} : vector<4x64x8xf32> to vector<1x64x8xf32>
    %57 = vector.shape_cast %56 : vector<1x64x8xf32> to vector<64x8xf32>
    %58 = tpu.concatenate %51, %53, %55, %57 in 1 : vector<64x8xf32>, vector<64x8xf32>, vector<64x8xf32>, vector<64x8xf32> -> vector<64x32xf32>
    %c0_10 = arith.constant 0 : index
    %c0_11 = arith.constant 0 : index
    %59 = vector.load %arg4[%c0_10, %c0_11] : memref<32x32xf32, #tpu.memory_space<vmem>>, vector<32x32xf32>
    %cst_12 = arith.constant dense<0.000000e+00> : vector<64x32xf32>
    %60 = tpu.matmul %58, %59, %cst_12 {dimension_numbers = #tpu.dot_dimension_numbers<[1], [0], [0], [1], [0, 0, 1, 1], [], []>} : vector<64x32xf32>, vector<32x32xf32>, vector<64x32xf32> -> vector<64x32xf32>
    %c0_13 = arith.constant 0 : index
    %c0_14 = arith.constant 0 : index
    %61 = vector.load %arg5[%c0_13, %c0_14] : memref<1x32xf32, #tpu.memory_space<vmem>>, vector<1x32xf32>
    %62 = vector.broadcast %61 : vector<1x32xf32> to vector<64x32xf32>
    %63 = arith.addf %60, %62 : vector<64x32xf32>
    %64 = vector.shape_cast %63 : vector<64x32xf32> to vector<8x8x32xf32>
    %c0_15 = arith.constant 0 : index
    %c0_16 = arith.constant 0 : index
    %c0_17 = arith.constant 0 : index
    %65 = vector.load %arg6[%c0_15, %c0_16, %c0_17] : memref<8x8x32xf32, #tpu.memory_space<vmem>>, vector<8x8x32xf32>
    tpu.vector_store %arg6[%c0_15, %c0_16, %c0_17], %64 {strides = array<i32>} : memref<8x8x32xf32, #tpu.memory_space<vmem>>, vector<8x8x32xf32>,
    return
  }
  func.func @transform_0(%arg0: i32) -> (i32, i32, i32) {
    %c0_i32 = arith.constant 0 : i32
    %c0_i32_0 = arith.constant 0 : i32
    %c0_i32_1 = arith.constant 0 : i32
    return %arg0, %c0_i32, %c0_i32_0 : i32, i32, i32
  }
  func.func @transform_1(%arg0: i32) -> (i32, i32) {
    %c0_i32 = arith.constant 0 : i32
    %c0_i32_0 = arith.constant 0 : i32
    %c0_i32_1 = arith.constant 0 : i32
    return %c0_i32, %c0_i32_0 : i32, i32
  }
  func.func @transform_2(%arg0: i32) -> (i32, i32) {
    %c0_i32 = arith.constant 0 : i32
    %c0_i32_0 = arith.constant 0 : i32
    %c0_i32_1 = arith.constant 0 : i32
    return %c0_i32, %c0_i32_0 : i32, i32
  }
  func.func @transform_3(%arg0: i32) -> (i32, i32) {
    %c0_i32 = arith.constant 0 : i32
    %c0_i32_0 = arith.constant 0 : i32
    %c0_i32_1 = arith.constant 0 : i32
    return %c0_i32, %c0_i32_0 : i32, i32
  }
  func.func @transform_4(%arg0: i32) -> (i32, i32) {
    %c0_i32 = arith.constant 0 : i32
    %c0_i32_0 = arith.constant 0 : i32
    %c0_i32_1 = arith.constant 0 : i32
    return %c0_i32, %c0_i32_0 : i32, i32
  }
  func.func @transform_5(%arg0: i32) -> (i32, i32, i32) {
    %c0_i32 = arith.constant 0 : i32
    %c0_i32_0 = arith.constant 0 : i32
    %c0_i32_1 = arith.constant 0 : i32
    return %arg0, %c0_i32, %c0_i32_0 : i32, i32, i32
  }
}

</mosaic_0001>

<bundles_post_ra>
// kernel: tpu_custom_call.1
= control target key start
LH: loop header
LB: loop body
LE: loop exit
PB: predicated region body
PF: predicated region fallthrough
CT: control target
= control target key end

     0   :  { %10 = vsyncpa [#allocation3], 0  ;;  %s3761_s0 = inlined_call_operand.hbm [shape: f32[8,8,32], index: 0, kind: input, shape index: {}]   ;;  %s3762_s1 = inlined_call_operand.hbm [shape: f32[32,96], index: 1, kind: input, shape index: {}]   ;;  %s3763_s2 = inlined_call_operand.vmem [shape: f32[1,96], index: 2, kind: input, shape index: {}]   ;;  %s3764_s3 = inlined_call_operand.hbm [shape: f32[32,32], index: 3, kind: input, shape index: {}]   ;;  %s3765_s4 = inlined_call_operand.vmem [shape: f32[1,32], index: 4, kind: input, shape index: {}]   ;;  %s3766_s5 = inlined_call_operand.hbm [shape: f32[8,8,32], index: 5, kind: output, shape index: {}]  }
   0x1   :  { %11 = vsyncpa [#allocation6], 0 }
   0x2   :  { %12 = vsyncpa [#allocation4], 0  ;;  %s30_s20 = sshll.u32 %s3762_s1, 4  ;;  %s2886_s21 = smov [#allocation5]   ;;  %s31_s20 = int_to_ptr.hbm [resolvable:$true] %s30_s20 }
   0x3   :  { %s32_s22 = sshll.u32 %s2886_s21, 4  ;;  %s17_s25 = sshll.u32 %s3761_s0, 4  ;;  %s33_s22 = int_to_ptr.vmem [resolvable:$true] %s32_s22  ;;  %s18_s25 = int_to_ptr.hbm [resolvable:$true] %s17_s25 }
   0x4   :  { %s2887_s26 = smov 128   ;;  %s2888_s27 = smov 8  }
   0x5   :  { %38 = dma.hbm_to_vmem [thread:$0]  %s31_s20, 512, %s33_s22, [#allocation6], %s2887_s26, %s2887_s26, %s2888_s27  }
   0x6   :  { %s2889_s28 = smov [#allocation2]   ;;  %s45_s1 = sshll.u32 %s3764_s3, 4  ;;  %s46_s1 = int_to_ptr.hbm [resolvable:$true] %s45_s1 }
   0x7   :  { %s19_s29 = sshll.u32 %s2889_s28, 4  ;;  %s2890_s0 = smov [#allocation7]   ;;  %s20_s29 = int_to_ptr.vmem [resolvable:$true] %s19_s29 }
   0x8   :  { %25 = dma.hbm_to_vmem [thread:$0]  %s18_s25, 1024, %s20_s29, [#allocation3], %s2887_s26, %s2887_s26, %s2888_s27  }
   0x9   :  { %s47_s7 = sshll.u32 %s2890_s0, 4  ;;  %s48_s7 = int_to_ptr.vmem [resolvable:$true] %s47_s7 }
   0xa   :  { %53 = dma.hbm_to_vmem [thread:$0]  %s46_s1, 512, %s48_s7, [#allocation6], %s2887_s26, %s2887_s26, %s2888_s27  }
   0xb   :  { %2880 = dma.done.wait [#allocation3], 1024  }
   0xc   :  { %2881 = vsyncadd [#allocation3], 4294966272 }
   0xd   :  { %2882 = dma.done.wait [#allocation6], 1024  }
   0xe   :  { %2883 = vsyncadd [#allocation6], 4294966272  ;;  %v79_v0 = vld [vmem:[#allocation5 + $0x18] sm:$0xff]  ;;  %v78_v1 = vld [vmem:[#allocation5 + $0x10] sm:$0xff]  ;;  %vm84_vm0 = vcmask 261120   ;;  %s2891_s9 = smov 112  }
   0xf   :  { %121 = vmatpush.msra.mxu0 %v79_v0  ;;  %v77_v2 = vld [vmem:[#allocation5 + $0x8] sm:$0xff]  ;;  %v76_v3 = vld [vmem:[#allocation5] sm:$0xff]  ;;  %v70_v6 = vld [vmem:[#allocation2 + $0x10] sm:$0xff]  ;;  %s2892_s10 = smov 120   ;;  %s2893_s11 = smov 96   ;;  %vm208_vm1 = vcmask 64512  }
  0x10   :  { %v68_v4 = vld [vmem:[#allocation2] sm:$0xff]  ;;  %v69_v5 = vld [vmem:[#allocation2 + $0x8] sm:$0xff]  ;;  %v71_v7 = vld [vmem:[#allocation2 + $0x18] sm:$0xff]  ;;  %s2895_s12 = smov 64   ;;  %s2896_s13 = smov 16   ;;  %vm2336_vm2 = vcmask 195584  }
  0x11   :  { %122 = vmatpush.msra.mxu0 %v78_v1  ;;  %v72_v8 = vld [vmem:[#allocation2 + $0x20] sm:$0xff]  ;;  %v73_v9 = vld [vmem:[#allocation2 + $0x28] sm:$0xff]  ;;  %v74_v10 = vld [vmem:[#allocation2 + $0x30] sm:$0xff]  ;;  %s2897_s14 = smov 24   ;;  %vm2327_vm3 = vcmask 130048   ;;  %s2432_s20 = sshll.u32 %s3766_s5, 4  ;;  %s2433_s20 = int_to_ptr.hbm [resolvable:$true] %s2432_s20 }
  0x12   :  { %v75_v11 = vld [vmem:[#allocation2 + $0x38] sm:$0xff]  ;;  %v2654_v12 = vld [vmem:[%s3763_s2] ss:$0 sm:$0xff]  ;;  %s2894_s2 = smov 104  }
  0x13   :  { %123 = vmatpush.msra.mxu0 %v77_v2 }
  0x15   :  { %124 = vmatpush.msra.mxu0 %v76_v3 }
  0x16   :  { %2446 = vmatmul.msk.f32.vlgmr.msra.gmra.mxu0 %vm84_vm0, %v68_v4 }
  0x1e   :  { %2447 = vmatmul.msk.f32.gmra.mxu0 %vm84_vm0, %v69_v5 }
  0x26   :  { %2448 = vmatmul.msk.f32.gmra.mxu0 %vm84_vm0, %v70_v6 }
  0x2e   :  { %2449 = vmatmul.msk.f32.gmra.mxu0 %vm84_vm0, %v71_v7 }
  0x36   :  { %2450 = vmatmul.msk.f32.gmra.mxu0 %vm84_vm0, %v72_v8 }
  0x3e   :  { %2451 = vmatmul.msk.f32.gmra.mxu0 %vm84_vm0, %v73_v9 }
  0x46   :  { %2452 = vmatmul.msk.f32.gmra.mxu0 %vm84_vm0, %v74_v10 }
  0x4e   :  { %2453 = vmatmul.msk.f32.gmra.mxu0 %vm84_vm0, %v75_v11 }
  0x93   :  { %v126_v13 = vpop.f32.mrf.mxu0 }
  0x94   :  { %v2958_v14 = vadd.f32 %v2654_v12, %v126_v13 }
  0x96   :  { %174 = vrot.lane.b32.xlu2 %v2958_v14, %s2891_s9  ;;  %158 = vrot.lane.b32.xlu0 %v2958_v14, %s2892_s10 }
  0x9b   :  { %v129_v15 = vpop.f32.mrf.mxu0 }
  0x9c   :  { %v2964_v16 = vadd.f32 %v2654_v12, %v129_v15 }
  0x9e   :  { %160 = vrot.lane.b32.xlu1 %v2964_v16, %s2892_s10  ;;  %206 = vrot.lane.b32.xlu0 %v2958_v14, %s2893_s11 }
  0xa3   :  { %v132_v17 = vpop.f32.mrf.mxu0 }
  0xa4   :  { %v2974_v19 = vadd.f32 %v2654_v12, %v132_v17 }
  0xa6   :  { %192 = vrot.lane.b32.xlu1 %v2964_v16, %s2894_s2  ;;  %190 = vrot.lane.b32.xlu0 %v2958_v14, %s2894_s2  ;;  %v2579_v9 = vpack.i.bf16 %v2958_v14, %v2974_v19 }
  0xab   :  { %v135_v18 = vpop.f32.mrf.mxu0 }
  0xac   :  { %v2996_v24 = vadd.f32 %v2654_v12, %v135_v18 }
  0xae   :  { %259 = vrot.lane.b32.xlu1 %v2974_v19, %s2893_s11  ;;  %176 = vrot.lane.b32.xlu0 %v2964_v16, %s2891_s9  ;;  %v2584_v11 = vpack.i.bf16 %v2964_v16, %v2996_v24 }
  0xb3   :  { %v138_v20 = vpop.f32.mrf.mxu0 }
  0xb4   :  { %v2980_v21 = vadd.f32 %v2654_v12, %v138_v20 }
  0xb6   :  { %178 = vrot.lane.b32.xlu1 %v2974_v19, %s2891_s9  ;;  %311 = vrot.lane.b32.xlu2 %v2980_v21, %s2893_s11 }
  0xb7   :  { %233 = vrot.lane.b32.xlu0 %v2964_v16, %s2893_s11 }
  0xbb   :  { %v141_v22 = vpop.f32.mrf.mxu0 }
  0xbc   :  { %v2994_v23 = vadd.f32 %v2654_v12, %v141_v22 }
  0xbe   :  { %194 = vrot.lane.b32.xlu1 %v2974_v19, %s2894_s2  ;;  %182 = vrot.lane.b32.xlu2 %v2980_v21, %s2891_s9 }
  0xbf   :  { %162 = vrot.lane.b32.xlu0 %v2974_v19, %s2892_s10 }
  0xc3   :  { %v144_v25 = vpop.f32.mrf.mxu0 }
  0xc4   :  { %v3010_v26 = vadd.f32 %v2654_v12, %v144_v25 }
  0xc6   :  { %164 = vrot.lane.b32.xlu1 %v2996_v24, %s2892_s10  ;;  %168 = vrot.lane.b32.xlu2 %v2994_v23, %s2892_s10  ;;  %v2589_v58 = vpack.i.bf16 %v2980_v21, %v3010_v26 }
  0xc7   :  { %285 = vrot.lane.b32.xlu0 %v2996_v24, %s2893_s11 }
  0xcb   :  { %v147_v27 = vpop.f32.mrf.mxu0 }
  0xcc   :  { %v3022_v28 = vadd.f32 %v2654_v12, %v147_v27 }
  0xce   :  { %180 = vrot.lane.b32.xlu1 %v2996_v24, %s2891_s9  ;;  %184 = vrot.lane.b32.xlu2 %v2994_v23, %s2891_s9  ;;  %v2594_v13 = vpack.i.bf16 %v2994_v23, %v3022_v28 }
  0xcf   :  { %166 = vrot.lane.b32.xlu0 %v2980_v21, %s2892_s10 }
  0xd6   :  { %186 = vrot.lane.b32.xlu1 %v3010_v26, %s2891_s9  ;;  %170 = vrot.lane.b32.xlu2 %v3010_v26, %s2892_s10 }
  0xd7   :  { %337 = vrot.lane.b32.xlu0 %v2994_v23, %s2893_s11 }
  0xde   :  { %363 = vrot.lane.b32.xlu1 %v3010_v26, %s2893_s11  ;;  %202 = vrot.lane.b32.xlu2 %v3010_v26, %s2894_s2 }
  0xe6   :  { %172 = vrot.lane.b32.xlu1 %v3022_v28, %s2892_s10  ;;  %389 = vrot.lane.b32.xlu2 %v3022_v28, %s2893_s11 }
  0xee   :  { %196 = vrot.lane.b32.xlu1 %v2996_v24, %s2894_s2  ;;  %188 = vrot.lane.b32.xlu2 %v3022_v28, %s2891_s9 }
  0xf0   :  { %v3032_v29 = vpop.permute.xlu2 %174 }
 0x108   :  { %v3034_v30 = vpop.permute.xlu0 %158 }
 0x109   :  { %415 = vrot.lane.b32.xlu0 %v3034_v30, %s2893_s11 }
 0x110   :  { %v3038_v31 = vpop.permute.xlu1 %160  ;;  %v312_v32 = vpop.permute.xlu2 %311 }
 0x111   :  { %v207_v33 = vpop.permute.xlu0 %206  ;;  %441 = vrot.lane.b32.xlu1 %v3038_v31, %s2893_s11  ;;  %2462 = vmatpush.xpose.msk.msra.mxu2 %vm208_vm1, %v312_v32 }
 0x112   :  { %623 = vrot.lane.b32.xlu0 %v3032_v29, %s2893_s11  ;;  %2454 = vmatpush.xpose.msk.msrb.mxu0 %vm208_vm1, %v207_v33 }
 0x114   :  { %2463 = vmatmul.msk.f32.vlgmr.msra.gmra.mxu2 %vm208_vm1, %v2980_v21 }
 0x115   :  { %2455 = vmatmul.msk.f32.vlgmr.msrb.gmra.mxu0 %vm208_vm1, %v2958_v14 }
 0x118   :  { %v3050_v34 = vpop.permute.xlu1 %192  ;;  %v3052_v35 = vpop.permute.xlu2 %182 }
 0x119   :  { %v3054_v36 = vpop.permute.xlu0 %190 }
 0x120   :  { %v260_v37 = vpop.permute.xlu1 %259  ;;  %v3056_v38 = vpop.permute.xlu2 %168 }
 0x121   :  { %v3058_v39 = vpop.permute.xlu0 %176  ;;  %2458 = vmatpush.xpose.msk.msra.mxu3 %vm208_vm1, %v260_v37 }
 0x122   :  { %649 = vrot.lane.b32.xlu1 %v3058_v39, %s2893_s11 }
 0x124   :  { %2459 = vmatmul.msk.f32.vlgmr.msra.gmra.mxu3 %vm208_vm1, %v2974_v19 }
 0x128   :  { %v3065_v40 = vpop.permute.xlu1 %178  ;;  %v3067_v41 = vpop.permute.xlu2 %184 }
 0x129   :  { %v234_v42 = vpop.permute.xlu0 %233  ;;  %v2614_v3 = vpack.i.bf16 %v3032_v29, %v3065_v40 }
 0x12a   :  { %204 = vrot.lane.b32.xlu1 %v3022_v28, %s2894_s2  ;;  %2456 = vmatpush.xpose.msk.msra.mxu0 %vm208_vm1, %v234_v42 }
 0x12d   :  { %2457 = vmatmul.msk.f32.vlgmr.msra.gmra.mxu0 %vm208_vm1, %v2964_v16 }
 0x130   :  { %v3074_v43 = vpop.permute.xlu1 %194  ;;  %v3076_v44 = vpop.permute.xlu2 %170 }
 0x131   :  { %v163_v45 = vpop.permute.xlu0 %162  ;;  %v2629_v16 = vpack.i.bf16 %v3054_v36, %v3074_v43 }
 0x132   :  { %467 = vrot.lane.b32.xlu2 %v163_v45, %s2893_s11  ;;  %v2599_v60 = vpack.i.bf16 %v3034_v30, %v163_v45 }
 0x138   :  { %v3079_v46 = vpop.permute.xlu1 %164  ;;  %v3081_v47 = vpop.permute.xlu2 %202 }
 0x139   :  { %v286_v48 = vpop.permute.xlu0 %285  ;;  %493 = vrot.lane.b32.xlu0 %v3079_v46, %s2893_s11  ;;  %v2604_v14 = vpack.i.bf16 %v3038_v31, %v3079_v46 }
 0x13a   :  { %2460 = vmatpush.xpose.msk.msra.mxu1 %vm208_vm1, %v286_v48 }
 0x13d   :  { %2461 = vmatmul.msk.f32.vlgmr.msra.gmra.mxu1 %vm208_vm1, %v2996_v24 }
 0x140   :  { %v3088_v49 = vpop.permute.xlu1 %180  ;;  %v390_v50 = vpop.permute.xlu2 %389 }
 0x141   :  { %v3090_v51 = vpop.permute.xlu0 %166  ;;  %2468 = vmatpush.xpose.msk.msrb.mxu2 %vm208_vm1, %v390_v50  ;;  %198 = vrot.lane.b32.xlu0 %v2980_v21, %s2894_s2  ;;  %v2619_v5 = vpack.i.bf16 %v3058_v39, %v3088_v49 }
 0x142   :  { %519 = vrot.lane.b32.xlu2 %v3090_v51, %s2893_s11  ;;  %v2609_v17 = vpack.i.bf16 %v3090_v51, %v3076_v44 }
 0x144   :  { %2469 = vmatmul.msk.f32.vlgmr.msrb.gmra.mxu2 %vm208_vm1, %v3022_v28 }
 0x148   :  { %v3099_v52 = vpop.permute.xlu1 %186  ;;  %v3129_v56 = vpop.permute.xlu2 %188 }
 0x149   :  { %v338_v53 = vpop.permute.xlu0 %337  ;;  %727 = vrot.lane.b32.xlu0 %v3052_v35, %s2893_s11  ;;  %v2624_v18 = vpack.i.bf16 %v3052_v35, %v3099_v52  ;;  %v2644_v37 = vpack.i.bf16 %v3067_v41, %v3129_v56 }
 0x14a   :  { %545 = vrot.lane.b32.xlu2 %v3056_v38, %s2893_s11  ;;  %2464 = vmatpush.xpose.msk.msrb.mxu3 %vm208_vm1, %v338_v53 }
 0x14d   :  { %2465 = vmatmul.msk.f32.vlgmr.msrb.gmra.mxu3 %vm208_vm1, %v2994_v23 }
 0x150   :  { %v364_v54 = vpop.permute.xlu1 %363 }
 0x151   :  { %753 = vrot.lane.b32.xlu0 %v3067_v41, %s2893_s11  ;;  %2466 = vmatpush.xpose.msk.msrb.mxu1 %vm208_vm1, %v364_v54 }
 0x152   :  { %200 = vrot.lane.b32.xlu2 %v2994_v23, %s2894_s2 }
 0x154   :  { %2467 = vmatmul.msk.f32.vlgmr.msrb.gmra.mxu1 %vm208_vm1, %v3010_v26 }
 0x158   :  { %v3115_v55 = vpop.permute.xlu1 %172 }
 0x159   :  { %571 = vrot.lane.b32.xlu0 %v3076_v44, %s2893_s11  ;;  %597 = vrot.lane.b32.xlu1 %v3115_v55, %s2893_s11  ;;  %v2639_v28 = vpack.i.bf16 %v3056_v38, %v3115_v55 }
 0x15a   :  { %701 = vrot.lane.b32.xlu2 %v3088_v49, %s2893_s11 }
 0x160   :  { %v3137_v57 = vpop.permute.xlu1 %196 }
 0x161   :  { %779 = vrot.lane.b32.xlu0 %v3099_v52, %s2893_s11  ;;  %857 = vrot.lane.b32.xlu1 %v3050_v34, %s2893_s11  ;;  %v2634_v22 = vpack.i.bf16 %v3050_v34, %v3137_v57 }
 0x162   :  { %675 = vrot.lane.b32.xlu2 %v3065_v40, %s2893_s11 }
 0x169   :  { %831 = vrot.lane.b32.xlu0 %v3054_v36, %s2893_s11  ;;  %805 = vrot.lane.b32.xlu1 %v3129_v56, %s2893_s11 }
 0x16a   :  { %883 = vrot.lane.b32.xlu2 %v3074_v43, %s2893_s11 }
 0x171   :  { %909 = vrot.lane.b32.xlu1 %v3137_v57, %s2893_s11 }
 0x172   :  { %987 = vrot.lane.b32.xlu2 %v3081_v47, %s2893_s11 }
 0x179   :  { %2590 = vrot.lane.b32.xlu1 %v2589_v58, %s2895_s12 }
 0x17b   :  { %v416_v59 = vpop.permute.xlu0 %415 }
 0x17c   :  { %2470 = vmatpush.xpose.msk.msra.mxu3 %vm208_vm1, %v416_v59 }
 0x17f   :  { %2471 = vmatmul.msk.f32.vlgmr.msra.gmra.mxu3 %vm208_vm1, %v3034_v30 }
 0x181   :  { %2600 = vrot.lane.b32.xlu1 %v2599_v60, %s2895_s12 }
 0x183   :  { %v442_v61 = vpop.permute.xlu1 %441 }
 0x184   :  { %2472 = vmatpush.xpose.msk.msra.mxu1 %vm208_vm1, %v442_v61  ;;  %v624_v2 = vpop.permute.xlu0 %623 }
 0x187   :  { %2473 = vmatmul.msk.f32.vlgmr.msra.gmra.mxu1 %vm208_vm1, %v3038_v31 }
 0x18c   :  { %v468_v62 = vpop.permute.xlu2 %467 }
 0x18d   :  { %2474 = vmatpush.xpose.msk.msra.mxu2 %vm208_vm1, %v468_v62 }
 0x190   :  { %2475 = vmatmul.msk.f32.vlgmr.msra.gmra.mxu2 %vm208_vm1, %v163_v45 }
 0x194   :  { %v650_v63 = vpop.permute.xlu1 %649 }
 0x197   :  { %v3222_v23 = vpop.f32.mrf.mxu2 }
 0x19c   :  { %v3156_v0 = vpop.permute.xlu1 %204  ;;  %v520_v1 = vpop.permute.xlu2 %519 }
 0x19d   :  { %1013 = vrot.lane.b32.xlu1 %v3156_v0, %s2893_s11  ;;  %2478 = vmatpush.xpose.msk.msrb.mxu1 %vm208_vm1, %v520_v1 }
 0x1a0   :  { %2479 = vmatmul.msk.f32.vlgmr.msrb.gmra.mxu1 %vm208_vm1, %v3090_v51 }
 0x1a4   :  { %v546_v4 = vpop.permute.xlu2 %545 }
 0x1a5   :  { %2615 = vrot.lane.b32.xlu1 %v2614_v3, %s2895_s12  ;;  %2480 = vmatpush.xpose.msk.msrb.mxu2 %vm208_vm1, %v546_v4 }
 0x1a8   :  { %2481 = vmatmul.msk.f32.vlgmr.msrb.gmra.mxu2 %vm208_vm1, %v3056_v38 }
 0x1a9   :  { %2486 = vmatpush.xpose.msk.msra.mxu2 %vm208_vm1, %v624_v2 }
 0x1ab   :  { %v494_v6 = vpop.permute.xlu0 %493 }
 0x1ac   :  { %v3172_v7 = vpop.permute.xlu2 %200  ;;  %2476 = vmatpush.xpose.msk.msrb.mxu3 %vm208_vm1, %v494_v6 }
 0x1ad   :  { %2620 = vrot.lane.b32.xlu1 %v2619_v5, %s2895_s12  ;;  %961 = vrot.lane.b32.xlu2 %v3172_v7, %s2893_s11 }
 0x1af   :  { %2477 = vmatmul.msk.f32.vlgmr.msrb.gmra.mxu3 %vm208_vm1, %v3079_v46 }
 0x1b0   :  { %2487 = vmatmul.msk.f32.vlgmr.msra.gmra.mxu2 %vm208_vm1, %v3032_v29 }
 0x1b3   :  { %v3182_v8 = vpop.permute.xlu0 %198 }
 0x1b4   :  { %v702_v10 = vpop.permute.xlu2 %701  ;;  %935 = vrot.lane.b32.xlu0 %v3182_v8, %s2893_s11 }
 0x1b5   :  { %2580 = vrot.lane.b32.xlu2 %v2579_v9, %s2895_s12  ;;  %2492 = vmatpush.xpose.msk.msrb.mxu2 %vm208_vm1, %v702_v10 }
 0x1b8   :  { %2493 = vmatmul.msk.f32.vlgmr.msrb.gmra.mxu2 %vm208_vm1, %v3088_v49 }
 0x1ba   :  { %v3224_v24 = vpop.f32.mrf.mxu1 }
 0x1bb   :  { %v728_v12 = vpop.permute.xlu0 %727  ;;  %v1048_v27 = vsel %vm208_vm1, %v3224_v24, -inf }
 0x1bc   :  { %2585 = vrot.lane.b32.xlu0 %v2584_v11, %s2895_s12  ;;  %v676_v21 = vpop.permute.xlu2 %675 }
 0x1bd   :  { %2595 = vrot.lane.b32.xlu2 %v2594_v13, %s2895_s12 }
 0x1c3   :  { %v754_v15 = vpop.permute.xlu0 %753 }
 0x1c4   :  { %2605 = vrot.lane.b32.xlu0 %v2604_v14, %s2895_s12  ;;  %v884_v32 = vpop.permute.xlu2 %883 }
 0x1c5   :  { %2610 = vrot.lane.b32.xlu2 %v2609_v17, %s2895_s12 }
 0x1c7   :  { %v3239_v29 = vpop.f32.mrf.mxu2 }
 0x1c8   :  { %v1060_v33 = vsel %vm208_vm1, %v3239_v29, -inf }
 0x1cb   :  { %v598_v19 = vpop.permute.xlu1 %597  ;;  %v572_v20 = vpop.permute.xlu0 %571 }
 0x1cc   :  { %2484 = vmatpush.xpose.msk.msra.mxu1 %vm208_vm1, %v598_v19  ;;  %2630 = vrot.lane.b32.xlu0 %v2629_v16, %s2895_s12 }
 0x1cd   :  { %2625 = vrot.lane.b32.xlu2 %v2624_v18, %s2895_s12  ;;  %2482 = vmatpush.xpose.msk.msra.mxu3 %vm208_vm1, %v572_v20 }
 0x1cf   :  { %2485 = vmatmul.msk.f32.vlgmr.msra.gmra.mxu1 %vm208_vm1, %v3115_v55 }
 0x1d0   :  { %2490 = vmatpush.xpose.msk.msrb.mxu1 %vm208_vm1, %v676_v21  ;;  %2483 = vmatmul.msk.f32.vlgmr.msra.gmra.mxu3 %vm208_vm1, %v3076_v44 }
 0x1d1   :  { %2488 = vmatpush.xpose.msk.msrb.mxu3 %vm208_vm1, %v650_v63  ;;  %v3289_v50 = vpop.f32.mrf.mxu1 }
 0x1d2   :  { %v1057_v51 = vsel %vm208_vm1, %v3289_v50, -inf }
 0x1d3   :  { %v858_v25 = vpop.permute.xlu1 %857  ;;  %v780_v26 = vpop.permute.xlu0 %779 }
 0x1d4   :  { %2496 = vmatpush.xpose.msk.msra.mxu1 %vm208_vm1, %v754_v15  ;;  %2635 = vrot.lane.b32.xlu0 %v2634_v22, %s2895_s12 }
 0x1d5   :  { %2494 = vmatpush.xpose.msk.msra.mxu3 %vm208_vm1, %v728_v12  ;;  %2498 = vmatpush.xpose.msk.msra.mxu2 %vm208_vm1, %v780_v26 }
 0x1d7   :  { %1049 = vmax.xlane.f32.xlu1 %v1048_v27  ;;  %2491 = vmatmul.msk.f32.vlgmr.msrb.gmra.mxu1 %vm208_vm1, %v3065_v40 }
 0x1d8   :  { %2489 = vmatmul.msk.f32.vlgmr.msrb.gmra.mxu3 %vm208_vm1, %v3058_v39  ;;  %2499 = vmatmul.msk.f32.vlgmr.msra.gmra.mxu2 %vm208_vm1, %v3099_v52  ;;  %v3268_v39 = vpop.f32.mrf.mxu3 }
 0x1d9   :  { %2504 = vmatpush.xpose.msk.msrb.mxu2 %vm208_vm1, %v858_v25  ;;  %v1045_v44 = vsel %vm208_vm1, %v3268_v39, -inf }
 0x1db   :  { %v806_v30 = vpop.permute.xlu1 %805  ;;  %v832_v31 = vpop.permute.xlu0 %831 }
 0x1dc   :  { %2640 = vrot.lane.b32.xlu0 %v2639_v28, %s2895_s12  ;;  %2502 = vmatpush.xpose.msk.msrb.mxu1 %vm208_vm1, %v832_v31 }
 0x1dd   :  { %2500 = vmatpush.xpose.msk.msrb.mxu3 %vm208_vm1, %v806_v30 }
 0x1df   :  { %1061 = vmax.xlane.f32.xlu1 %v1060_v33  ;;  %2497 = vmatmul.msk.f32.vlgmr.msra.gmra.mxu1 %vm208_vm1, %v3067_v41 }
 0x1e0   :  { %2495 = vmatmul.msk.f32.vlgmr.msra.gmra.mxu3 %vm208_vm1, %v3052_v35  ;;  %2505 = vmatmul.msk.f32.vlgmr.msrb.gmra.mxu2 %vm208_vm1, %v3050_v34  ;;  %v988_v35 = vpop.permute.xlu2 %987  ;;  %v3264_v34 = vpop.f32.mrf.mxu0 }
 0x1e1   :  { %2506 = vmatpush.xpose.msk.msra.mxu3 %vm208_vm1, %v884_v32  ;;  %v3276_v41 = vpop.f32.mrf.mxu3  ;;  %v1039_v52 = vsel %vm208_vm1, %v3264_v34, -inf }
 0x1e2   :  { %v1054_v46 = vsel %vm208_vm1, %v3276_v41, -inf }
 0x1e3   :  { %v910_v38 = vpop.permute.xlu1 %909 }
 0x1e4   :  { %2508 = vmatpush.xpose.msk.msrb.mxu0 %vm208_vm1, %v910_v38  ;;  %2645 = vrot.lane.b32.xlu0 %v2644_v37, %s2895_s12 }
 0x1e7   :  { %2503 = vmatmul.msk.f32.vlgmr.msrb.gmra.mxu1 %vm208_vm1, %v3054_v36  ;;  %2509 = vmatmul.msk.f32.vlgmr.msrb.gmra.mxu0 %vm208_vm1, %v3137_v57  ;;  %v1051_v57 = vsel %vm208_vm1, %v3222_v23, -inf }
 0x1e8   :  { %2501 = vmatmul.msk.f32.vlgmr.msrb.gmra.mxu3 %vm208_vm1, %v3129_v56  ;;  %v3270_v40 = vpop.f32.mrf.mxu0 }
 0x1e9   :  { %2514 = vmatpush.xpose.msk.msrb.mxu3 %vm208_vm1, %v988_v35  ;;  %v1042_v36 = vsel %vm208_vm1, %v3270_v40, -inf }
 0x1eb   :  { %v2591_v42 = vpop.permute.xlu1 %2590 }
 0x1ec   :  { %v2592_v56 = vunpack.i.l.bf16 %v2591_v42  ;;  %v2593_v62 = vunpack.i.h.bf16 %v2591_v42 }
 0x1f0   :  { %2507 = vmatmul.msk.f32.vlgmr.msra.gmra.mxu3 %vm208_vm1, %v3074_v43 }
 0x1f3   :  { %v3286_v48 = vpop.permute.xlu1 %2600 }
 0x1f6   :  { %1043 = vmax.xlane.f32.xlu2 %v1042_v36 }
 0x1f8   :  { %2515 = vmatmul.msk.f32.vlgmr.msrb.gmra.mxu3 %vm208_vm1, %v3081_v47 }
 0x1fe   :  { %1046 = vmax.xlane.f32.xlu2 %v1045_v44 }
 0x202   :  { %v3280_v45 = vpop.f32.mrf.mxu3 }
 0x203   :  { %v1063_v43 = vsel %vm208_vm1, %v3280_v45, -inf }
 0x204   :  { %1064 = vmax.xlane.f32.xlu1 %v1063_v43  ;;  %v3302_v58 = vpop.f32.mrf.mxu1 }
 0x205   :  { %v1066_v59 = vsel %vm208_vm1, %v3302_v58, -inf }
 0x206   :  { %1055 = vmax.xlane.f32.xlu2 %v1054_v46 }
 0x207   :  { %v962_v49 = vpop.permute.xlu2 %961 }
 0x208   :  { %2512 = vmatpush.xpose.msk.msra.mxu2 %vm208_vm1, %v962_v49 }
 0x20b   :  { %2513 = vmatmul.msk.f32.vlgmr.msra.gmra.mxu2 %vm208_vm1, %v3172_v7 }
 0x20e   :  { %1058 = vmax.xlane.f32.xlu2 %v1057_v51  ;;  %1040 = vmax.xlane.f32.xlu0 %v1039_v52 }
 0x20f   :  { %v1014_v53 = vpop.permute.xlu1 %1013  ;;  %v2581_v54 = vpop.permute.xlu2 %2580 }
 0x210   :  { %v2582_v55 = vunpack.i.l.bf16 %v2581_v54  ;;  %2516 = vmatpush.xpose.msk.msra.mxu0 %vm208_vm1, %v1014_v53  ;;  %v2583_v60 = vunpack.i.h.bf16 %v2581_v54 }
 0x212   :  { %1464 = vmatpush.msra.mxu3 %v2582_v55 }
 0x213   :  { %2517 = vmatmul.msk.f32.vlgmr.msra.gmra.mxu0 %vm208_vm1, %v3156_v0  ;;  %v3337_v30 = vpop.f32.mrf.mxu2 }
 0x214   :  { %1568 = vmatpush.msrb.mxu3 %v2592_v56 }
 0x216   :  { %1052 = vmax.xlane.f32.xlu0 %v1051_v57 }
 0x217   :  { %v2596_v63 = vpop.permute.xlu2 %2595  ;;  %v3323_v15 = vpop.permute.xlu1 %2615 }
 0x218   :  { %v2598_v4 = vunpack.i.h.bf16 %v2596_v63  ;;  %v2597_v5 = vunpack.i.l.bf16 %v2596_v63 }
 0x21d   :  { %v3313_v10 = vpop.f32.mrf.mxu1 }
 0x21e   :  { %1067 = vmax.xlane.f32.xlu0 %v1066_v59  ;;  %v1075_v11 = vsel %vm208_vm1, %v3313_v10, -inf }
 0x21f   :  { %v3319_v13 = vpop.permute.xlu2 %2610  ;;  %v3329_v18 = vpop.permute.xlu1 %2620 }
 0x226   :  { %v936_v61 = vpop.permute.xlu0 %935 }
 0x227   :  { %2510 = vmatpush.xpose.msk.msra.mxu1 %vm208_vm1, %v936_v61  ;;  %v3325_v17 = vpop.permute.xlu2 %2625 }
 0x22a   :  { %2511 = vmatmul.msk.f32.vlgmr.msra.gmra.mxu1 %vm208_vm1, %v3182_v8 }
 0x22b   :  { %1412 = vmatpush.msrb.mxu1 %v2583_v60 }
 0x22d   :  { %1516 = vmatpush.msra.mxu1 %v2593_v62 }
 0x22e   :  { %v2586_v1 = vpop.permute.xlu0 %2585 }
 0x22f   :  { %v2588_v2 = vunpack.i.h.bf16 %v2586_v1  ;;  %v2587_v3 = vunpack.i.l.bf16 %v2586_v1 }
 0x231   :  { %1438 = vmatpush.msrb.mxu2 %v2588_v2  ;;  %1490 = vmatpush.msrb.mxu0 %v2587_v3 }
 0x232   :  { %v3309_v6 = vpop.f32.mrf.mxu3 }
 0x233   :  { %1542 = vmatpush.msra.mxu2 %v2598_v4  ;;  %1594 = vmatpush.msra.mxu0 %v2597_v5  ;;  %v1072_v9 = vsel %vm208_vm1, %v3309_v6, -inf }
 0x234   :  { %1073 = vmax.xlane.f32.xlu2 %v1072_v9 }
 0x236   :  { %v3317_v12 = vpop.permute.xlu0 %2605 }
 0x23c   :  { %1076 = vmax.xlane.f32.xlu2 %v1075_v11 }
 0x23e   :  { %v3321_v14 = vpop.permute.xlu0 %2630 }
 0x246   :  { %v3327_v16 = vpop.permute.xlu0 %2635 }
 0x24a   :  { %v1050_v25 = vpop.xlane.xlu1 %1049 }
 0x24b   :  { %v1138_v31 = vsub.f32 %v3224_v24, %v1050_v25  ;;  %v1069_v24 = vsel %vm208_vm1, %v3337_v30, -inf }
 0x24c   :  { %v3363_v53 = vpop.f32.mrf.mxu1 }
 0x24d   :  { %v1173_v37 = vmul.f32 1.442695, %v1138_v31 }
 0x24e   :  { %v3332_v22 = vpop.permute.xlu0 %2640 }
 0x254   :  { %v3376_v62 = vpop.f32.mrf.mxu1 }
 0x255   :  { %v1093_v1 = vsel %vm208_vm1, %v3376_v62, -inf }
 0x256   :  { %v3342_v38 = vpop.permute.xlu0 %2645 }
 0x264   :  { %v3378_v63 = vpop.f32.mrf.mxu0 }
 0x265   :  { %v1120_v3 = vsel %vm208_vm1, %v3378_v63, -inf }
 0x269   :  { %v1044_v19 = vpop.xlane.xlu2 %1043 }
 0x26a   :  { %v1136_v20 = vsub.f32 %v3270_v40, %v1044_v19  ;;  %v3346_v40 = vpop.f32.mrf.mxu2 }
 0x26c   :  { %v1169_v21 = vmul.f32 1.442695, %v1136_v20 }
 0x26e   :  { %2656 = vpow2.f32 %v1169_v21  ;;  %v1078_v21 = vsel %vm208_vm1, %v3346_v40, -inf }
 0x271   :  { %v1047_v26 = vpop.xlane.xlu2 %1046 }
 0x272   :  { %v1137_v27 = vsub.f32 %v3268_v39, %v1047_v26  ;;  %v3348_v39 = vpop.f32.mrf.mxu3  ;;  %v3359_v51 = vpop.f32.mrf.mxu2 }
 0x273   :  { %v1087_v20 = vsel %vm208_vm1, %v3359_v51, -inf }
 0x274   :  { %v3335_v28 = vpop.eup %2656  ;;  %v1171_v32 = vmul.f32 1.442695, %v1137_v27 }
 0x275   :  { %v1234_v33 = vsel %vm208_vm1, %v3335_v28, 0.0 }
 0x276   :  { %2658 = vpow2.f32 %v1171_v32  ;;  %1235 = vadd.xlane.f32.xlu0 %v1234_v33  ;;  %v1084_v32 = vsel %vm208_vm1, %v3363_v53, -inf  ;;  %v1081_v33 = vsel %vm208_vm1, %v3348_v39, -inf }
 0x277   :  { %2660 = vpow2.f32 %v1173_v37 }
 0x279   :  { %v1056_v5 = vpop.xlane.xlu2 %1055 }
 0x27a   :  { %v3361_v52 = vpop.f32.mrf.mxu3  ;;  %v3372_v60 = vpop.f32.mrf.mxu2  ;;  %v1140_v11 = vsub.f32 %v3276_v41, %v1056_v5 }
 0x27c   :  { %v3344_v35 = vpop.eup %2658  ;;  %v1177_v25 = vmul.f32 1.442695, %v1140_v11 }
 0x27d   :  { %v1237_v36 = vsel %vm208_vm1, %v3344_v35, 0.0  ;;  %v3354_v44 = vpop.eup %2660 }
 0x27e   :  { %1238 = vadd.xlane.f32.xlu2 %v1237_v36  ;;  %1070 = vmax.xlane.f32.xlu0 %v1069_v24  ;;  %v1240_v49 = vsel %vm208_vm1, %v3354_v44, 0.0 }
 0x281   :  { %v1041_v42 = vpop.xlane.xlu0 %1040  ;;  %v1059_v27 = vpop.xlane.xlu2 %1058 }
 0x282   :  { %v1135_v43 = vsub.f32 %v3264_v34, %v1041_v42  ;;  %v1090_v34 = vsel %vm208_vm1, %v3361_v52, -inf  ;;  %v3374_v61 = vpop.f32.mrf.mxu3  ;;  %v3388_v4 = vpop.f32.mrf.mxu2  ;;  %v1141_v31 = vsub.f32 %v3289_v50, %v1059_v27 }
 0x283   :  { %v1099_v5 = vsel %vm208_vm1, %v3374_v61, -inf }
 0x284   :  { %v1167_v46 = vmul.f32 1.442695, %v1135_v43  ;;  %v1179_v37 = vmul.f32 1.442695, %v1141_v31 }
 0x286   :  { %1241 = vadd.xlane.f32.xlu2 %v1240_v49  ;;  %2662 = vpow2.f32 %v1167_v46  ;;  %v1105_v46 = vsel %vm208_vm1, %v3388_v4, -inf }
 0x289   :  { %v1053_v54 = vpop.xlane.xlu0 %1052 }
 0x28a   :  { %v1139_v55 = vsub.f32 %v3222_v23, %v1053_v54  ;;  %v3390_v9 = vpop.f32.mrf.mxu3  ;;  %v3399_v26 = vpop.f32.mrf.mxu2 }
 0x28b   :  { %v1108_v19 = vsel %vm208_vm1, %v3390_v9, -inf  ;;  %v1114_v41 = vsel %vm208_vm1, %v3399_v26, -inf  ;;  %v3422_v54 = vpop.f32.mrf.mxu1 }
 0x28c   :  { %v1175_v56 = vmul.f32 1.442695, %v1139_v55  ;;  %v3366_v57 = vpop.eup %2662  ;;  %v1062_v55 = vpop.xlane.xlu1 %1061 }
 0x28d   :  { %v1231_v59 = vsel %vm208_vm1, %v3366_v57, 0.0 }
 0x28e   :  { %2664 = vpow2.f32 %v1175_v56  ;;  %1091 = vmax.xlane.f32.xlu2 %v1090_v34  ;;  %1232 = vadd.xlane.f32.xlu1 %v1231_v59  ;;  %v1142_v56 = vsub.f32 %v3239_v29, %v1062_v55  ;;  %v1102_v34 = vsel %vm208_vm1, %v3422_v54, -inf  ;;  %v1096_v59 = vsel %vm208_vm1, %v3372_v60, -inf }
 0x28f   :  { %2666 = vpow2.f32 %v1177_v25 }
 0x290   :  { %v3408_v36 = vpop.f32.mrf.mxu0  ;;  %2668 = vpow2.f32 %v1179_v37 }
 0x291   :  { %v1132_v50 = vsel %vm208_vm1, %v3408_v36, -inf  ;;  %v1068_v11 = vpop.xlane.xlu0 %1067 }
 0x292   :  { %v3435_v29 = vpop.f32.mrf.mxu3 }
 0x294   :  { %v3380_v23 = vpop.eup %2664 }
 0x295   :  { %v1243_v2 = vsel %vm208_vm1, %v3380_v23, 0.0  ;;  %v3410_v24 = vpop.eup %2666 }
 0x296   :  { %1094 = vmax.xlane.f32.xlu2 %v1093_v1  ;;  %1244 = vadd.xlane.f32.xlu0 %v1243_v2  ;;  %v1246_v42 = vsel %vm208_vm1, %v3410_v24, 0.0  ;;  %v3416_v43 = vpop.eup %2668  ;;  %v1181_v1 = vmul.f32 1.442695, %v1142_v56  ;;  %v3429_v2 = vpop.f32.mrf.mxu1 }
 0x297   :  { %1121 = vmax.xlane.f32.xlu1 %v1120_v3  ;;  %v1249_v49 = vsel %vm208_vm1, %v3416_v43, 0.0  ;;  %v1111_v3 = vsel %vm208_vm1, %v3429_v2, -inf }
 0x298   :  { %2670 = vpow2.f32 %v1181_v1 }
 0x29e   :  { %1109 = vmax.xlane.f32.xlu2 %v1108_v19  ;;  %1088 = vmax.xlane.f32.xlu0 %v1087_v20  ;;  %v3439_v20 = vpop.eup %2670 }
 0x29f   :  { %1079 = vmax.xlane.f32.xlu1 %v1078_v21  ;;  %v1144_v21 = vsub.f32 %v3302_v58, %v1068_v11  ;;  %v1252_v27 = vsel %vm208_vm1, %v3439_v20, 0.0  ;;  %v1117_v58 = vsel %vm208_vm1, %v3435_v29, -inf }
 0x2a1   :  { %v1185_v31 = vmul.f32 1.442695, %v1144_v21 }
 0x2a3   :  { %2672 = vpow2.f32 %v1185_v31 }
 0x2a6   :  { %1115 = vmax.xlane.f32.xlu2 %v1114_v41  ;;  %1085 = vmax.xlane.f32.xlu0 %v1084_v32  ;;  %v1065_v41 = vpop.xlane.xlu1 %1064  ;;  %v3446_v32 = vpop.f32.mrf.mxu3 }
 0x2a7   :  { %1082 = vmax.xlane.f32.xlu1 %v1081_v33  ;;  %v3437_v19 = vpop.f32.mrf.mxu1  ;;  %v1143_v33 = vsub.f32 %v3280_v45, %v1065_v41  ;;  %v1129_v37 = vsel %vm208_vm1, %v3446_v32, -inf  ;;  %v1074_v55 = vpop.xlane.xlu2 %1073 }
 0x2a8   :  { %v1123_v25 = vsel %vm208_vm1, %v3437_v19, -inf  ;;  %v1146_v31 = vsub.f32 %v3309_v6, %v1074_v55 }
 0x2ae   :  { %1133 = vmax.xlane.f32.xlu0 %v1132_v50  ;;  %v1183_v50 = vmul.f32 1.442695, %v1143_v33 }
 0x2af   :  { %1247 = vadd.xlane.f32.xlu1 %v1246_v42  ;;  %v3453_v42 = vpop.eup %2672 }
 0x2b0   :  { %2674 = vpow2.f32 %v1183_v50 }
 0x2b6   :  { %1106 = vmax.xlane.f32.xlu0 %v1105_v46  ;;  %v3455_v46 = vpop.f32.mrf.mxu2  ;;  %v3461_v56 = vpop.eup %2674 }
 0x2b7   :  { %1250 = vadd.xlane.f32.xlu1 %v1249_v49  ;;  %v1258_v49 = vsel %vm208_vm1, %v3453_v42, 0.0  ;;  %v1126_v45 = vsel %vm208_vm1, %v3455_v46, -inf }
 0x2be   :  { %1103 = vmax.xlane.f32.xlu0 %v1102_v34  ;;  %v1255_v34 = vsel %vm208_vm1, %v3461_v56, 0.0 }
 0x2bf   :  { %1097 = vmax.xlane.f32.xlu1 %v1096_v59  ;;  %v1077_v59 = vpop.xlane.xlu2 %1076 }
 0x2c6   :  { %1112 = vmax.xlane.f32.xlu0 %v1111_v3 }
 0x2c7   :  { %1100 = vmax.xlane.f32.xlu1 %v1099_v5 }
 0x2ce   :  { %1124 = vmax.xlane.f32.xlu0 %v1123_v25  ;;  %v2608_v25 = vunpack.i.h.bf16 %v3317_v12 }
 0x2cf   :  { %1253 = vadd.xlane.f32.xlu1 %v1252_v27 }
 0x2d6   :  { %1130 = vmax.xlane.f32.xlu0 %v1129_v37  ;;  %v1189_v37 = vmul.f32 1.442695, %v1146_v31 }
 0x2d7   :  { %1118 = vmax.xlane.f32.xlu1 %v1117_v58 }
 0x2de   :  { %1259 = vadd.xlane.f32.xlu0 %v1258_v49 }
 0x2df   :  { %1127 = vmax.xlane.f32.xlu1 %v1126_v45 }
 0x2e7   :  { %1256 = vadd.xlane.f32.xlu1 %v1255_v34 }
 0x2e9   :  { %v1236_v1 = vpop.xlane.xlu0 %1235 }
 0x2ea   :  { %2676 = vrcp.f32 %v1236_v1 }
 0x2f0   :  { %v2677_v3 = vpop.eup %2676 }
 0x2f1   :  { %v1360_v5 = vmul.f32 %v2677_v3, %v3335_v28  ;;  %v1239_v11 = vpop.xlane.xlu2 %1238  ;;  %v1071_v21 = vpop.xlane.xlu0 %1070  ;;  %v2602_v28 = vunpack.i.l.bf16 %v3286_v48 }
 0x2f2   :  { %2678 = vrcp.f32 %v1239_v11  ;;  %v1145_v27 = vsub.f32 %v3337_v30, %v1071_v21 }
 0x2f3   :  { %2519 = vmatmul.msk.f32.vlgmr.msrb.gmra.mxu2 %vm208_vm1, %v1360_v5 }
 0x2f4   :  { %v1187_v41 = vmul.f32 1.442695, %v1145_v27  ;;  %1646 = vmatpush.msrb.mxu2 %v2608_v25 }
 0x2f6   :  { %2680 = vpow2.f32 %v1187_v41 }
 0x2f8   :  { %v2679_v33 = vpop.eup %2678 }
 0x2f9   :  { %v1361_v58 = vmul.f32 %v2679_v33, %v3344_v35  ;;  %v1242_v50 = vpop.xlane.xlu2 %1241  ;;  %v2607_v35 = vunpack.i.l.bf16 %v3317_v12  ;;  %v1147_v12 = vsub.f32 %v3313_v10, %v1077_v59 }
 0x2fa   :  { %2682 = vrcp.f32 %v1242_v50  ;;  %v2613_v50 = vunpack.i.h.bf16 %v3319_v13 }
 0x2fb   :  { %2520 = vmatmul.msk.f32.vlgmr.msra.gmra.mxu3 %vm208_vm1, %v1361_v58  ;;  %2684 = vpow2.f32 %v1189_v37  ;;  %v1191_v33 = vmul.f32 1.442695, %v1147_v12 }
 0x2fc   :  { %v3473_v49 = vpop.eup %2680  ;;  %1672 = vmatpush.msra.mxu3 %v2602_v28 }
 0x2fd   :  { %v1261_v6 = vsel %vm208_vm1, %v3473_v49, 0.0 }
 0x2fe   :  { %1262 = vadd.xlane.f32.xlu2 %v1261_v6 }
 0x300   :  { %v2683_v30 = vpop.eup %2682 }
 0x301   :  { %v1362_v45 = vmul.f32 %v2683_v30, %v3354_v44  ;;  %v3478_v55 = vpop.eup %2684  ;;  %v1233_v34 = vpop.xlane.xlu1 %1232  ;;  %v2603_v44 = vunpack.i.h.bf16 %v3286_v48 }
 0x302   :  { %2686 = vrcp.f32 %v1233_v34  ;;  %v1264_v1 = vsel %vm208_vm1, %v3478_v55, 0.0  ;;  %v1092_v41 = vpop.xlane.xlu2 %1091 }
 0x303   :  { %2521 = vmatmul.msk.f32.vlgmr.msrb.gmra.mxu0 %vm208_vm1, %v1362_v45 }
 0x304   :  { %1698 = vmatpush.msrb.mxu0 %v2607_v35 }
 0x306   :  { %1265 = vadd.xlane.f32.xlu2 %v1264_v1  ;;  %v1152_v1 = vsub.f32 %v3361_v52, %v1092_v41 }
 0x308   :  { %v2687_v3 = vpop.eup %2686 }
 0x309   :  { %v1245_v5 = vpop.xlane.xlu0 %1244  ;;  %v1359_v11 = vmul.f32 %v2687_v3, %v3366_v57 }
 0x30a   :  { %v1122_v21 = vpop.xlane.xlu1 %1121  ;;  %2688 = vrcp.f32 %v1245_v5  ;;  %v1095_v30 = vpop.xlane.xlu2 %1094 }
 0x30b   :  { %v1162_v25 = vsub.f32 %v3378_v63, %v1122_v21  ;;  %2518 = vmatmul.msk.f32.vlgmr.msrb.gmra.mxu1 %vm208_vm1, %v1359_v11  ;;  %v1153_v5 = vsub.f32 %v3376_v62, %v1095_v30 }
 0x30c   :  { %1620 = vmatpush.msrb.mxu1 %v2603_v44 }
 0x30d   :  { %v1221_v27 = vmul.f32 1.442695, %v1162_v25 }
 0x30f   :  { %2690 = vpow2.f32 %v1221_v27 }
 0x310   :  { %v2689_v31 = vpop.eup %2688  ;;  %2692 = vpow2.f32 %v1191_v33 }
 0x311   :  { %v1363_v37 = vmul.f32 %v2689_v31, %v3380_v23  ;;  %v1089_v58 = vpop.xlane.xlu0 %1088 }
 0x312   :  { %v1080_v57 = vpop.xlane.xlu1 %1079  ;;  %v1151_v59 = vsub.f32 %v3359_v51, %v1089_v58 }
 0x313   :  { %v1148_v48 = vsub.f32 %v3346_v40, %v1080_v57  ;;  %2522 = vmatmul.msk.f32.vlgmr.msra.gmra.mxu1 %vm208_vm1, %v1363_v37 }
 0x314   :  { %1724 = vmatpush.msra.mxu1 %v2613_v50  ;;  %v1199_v23 = vmul.f32 1.442695, %v1151_v59 }
 0x315   :  { %v3493_v63 = vpop.eup %2690  ;;  %v1193_v10 = vmul.f32 1.442695, %v1148_v48 }
 0x316   :  { %v1312_v28 = vsel %vm208_vm1, %v3493_v63, 0.0  ;;  %v3499_v35 = vpop.eup %2692 }
 0x317   :  { %2694 = vpow2.f32 %v1193_v10  ;;  %1313 = vadd.xlane.f32.xlu0 %v1312_v28  ;;  %v1267_v44 = vsel %vm208_vm1, %v3499_v35, 0.0  ;;  %v2643_v28 = vunpack.i.h.bf16 %v3332_v22 }
 0x318   :  { %2696 = vpow2.f32 %v1199_v23 }
 0x319   :  { %v1086_v6 = vpop.xlane.xlu0 %1085 }
 0x31a   :  { %v1083_v45 = vpop.xlane.xlu1 %1082  ;;  %v1150_v40 = vsub.f32 %v3363_v53, %v1086_v6  ;;  %v1201_v53 = vmul.f32 1.442695, %v1152_v1 }
 0x31b   :  { %v1149_v34 = vsub.f32 %v3348_v39, %v1083_v45  ;;  %v1203_v39 = vmul.f32 1.442695, %v1153_v5 }
 0x31c   :  { %v1197_v3 = vmul.f32 1.442695, %v1150_v40 }
 0x31d   :  { %v3503_v51 = vpop.eup %2694  ;;  %v1195_v11 = vmul.f32 1.442695, %v1149_v34  ;;  %v2612_v34 = vunpack.i.l.bf16 %v3319_v13 }
 0x31e   :  { %v1270_v21 = vsel %vm208_vm1, %v3503_v51, 0.0  ;;  %v3512_v12 = vpop.eup %2696 }
 0x31f   :  { %2698 = vpow2.f32 %v1195_v11  ;;  %1271 = vadd.xlane.f32.xlu1 %v1270_v21  ;;  %1268 = vadd.xlane.f32.xlu0 %v1267_v44  ;;  %v1279_v41 = vsel %vm208_vm1, %v3512_v12, 0.0  ;;  %v1110_v44 = vpop.xlane.xlu2 %1109 }
 0x320   :  { %2700 = vpow2.f32 %v1197_v3 }
 0x321   :  { %v3510_v52 = vpop.xlane.xlu0 %1133 }
 0x322   :  { %v1248_v25 = vpop.xlane.xlu1 %1247 }
 0x323   :  { %2702 = vrcp.f32 %v1248_v25 }
 0x324   :  { %2704 = vpow2.f32 %v1201_v53 }
 0x325   :  { %v3514_v62 = vpop.eup %2698  ;;  %2706 = vpow2.f32 %v1203_v39 }
 0x326   :  { %v3516_v27 = vpop.eup %2700  ;;  %v1273_v31 = vsel %vm208_vm1, %v3514_v62, 0.0 }
 0x327   :  { %1274 = vadd.xlane.f32.xlu0 %v1273_v31  ;;  %1280 = vadd.xlane.f32.xlu1 %v1279_v41  ;;  %v1276_v33 = vsel %vm208_vm1, %v3516_v27, 0.0 }
 0x328   :  { %1277 = vadd.xlane.f32.xlu2 %v1276_v33 }
 0x329   :  { %v2703_v37 = vpop.eup %2702  ;;  %v1107_v58 = vpop.xlane.xlu0 %1106 }
 0x32a   :  { %v3524_v57 = vpop.eup %2704  ;;  %v1364_v50 = vmul.f32 %v2703_v37, %v3410_v24  ;;  %v1251_v48 = vpop.xlane.xlu1 %1250  ;;  %v1157_v10 = vsub.f32 %v3388_v4, %v1107_v58 }
 0x32b   :  { %v3528_v59 = vpop.eup %2706  ;;  %2708 = vrcp.f32 %v1251_v48  ;;  %v1282_v30 = vsel %vm208_vm1, %v3524_v57, 0.0 }
 0x32c   :  { %v1211_v23 = vmul.f32 1.442695, %v1157_v10  ;;  %2523 = vmatmul.msk.f32.vlgmr.msra.gmra.mxu2 %vm208_vm1, %v1364_v50  ;;  %v1285_v6 = vsel %vm208_vm1, %v3528_v59, 0.0  ;;  %v1116_v50 = vpop.xlane.xlu2 %1115 }
 0x32d   :  { %1750 = vmatpush.msra.mxu2 %v2643_v28 }
 0x32e   :  { %2710 = vpow2.f32 %v1211_v23 }
 0x32f   :  { %1286 = vadd.xlane.f32.xlu0 %v1285_v6  ;;  %1283 = vadd.xlane.f32.xlu1 %v1282_v30 }
 0x331   :  { %v2709_v24 = vpop.eup %2708  ;;  %v1104_v4 = vpop.xlane.xlu0 %1103 }
 0x332   :  { %v1365_v45 = vmul.f32 %v2709_v24, %v3416_v43  ;;  %v1098_v40 = vpop.xlane.xlu1 %1097  ;;  %v1156_v11 = vsub.f32 %v3422_v54, %v1104_v4 }
 0x333   :  { %v1154_v1 = vsub.f32 %v3372_v60, %v1098_v40  ;;  %v1158_v60 = vsub.f32 %v3390_v9, %v1110_v44  ;;  %v1160_v9 = vsub.f32 %v3399_v26, %v1116_v50  ;;  %v2642_v26 = vunpack.i.l.bf16 %v3332_v22 }
 0x334   :  { %v3539_v3 = vpop.eup %2710  ;;  %2524 = vmatmul.msk.f32.vlgmr.msrb.gmra.mxu3 %vm208_vm1, %v1365_v45  ;;  %v1209_v43 = vmul.f32 1.442695, %v1156_v11 }
 0x335   :  { %v1205_v5 = vmul.f32 1.442695, %v1154_v1  ;;  %1776 = vmatpush.msrb.mxu3 %v2612_v34  ;;  %v1297_v21 = vsel %vm208_vm1, %v3539_v3, 0.0  ;;  %v1213_v33 = vmul.f32 1.442695, %v1158_v60 }
 0x336   :  { %v1217_v6 = vmul.f32 1.442695, %v1160_v9 }
 0x337   :  { %2712 = vpow2.f32 %v1205_v5  ;;  %1298 = vadd.xlane.f32.xlu1 %v1297_v21 }
 0x338   :  { %2714 = vpow2.f32 %v1209_v43 }
 0x339   :  { %v1113_v53 = vpop.xlane.xlu0 %1112 }
 0x33a   :  { %v1101_v39 = vpop.xlane.xlu1 %1100  ;;  %v1159_v54 = vsub.f32 %v3429_v2, %v1113_v53 }
 0x33b   :  { %v1155_v13 = vsub.f32 %v3374_v61, %v1101_v39 }
 0x33c   :  { %v1215_v37 = vmul.f32 1.442695, %v1159_v54  ;;  %v2623_v54 = vunpack.i.h.bf16 %v3329_v18 }
 0x33d   :  { %v3547_v25 = vpop.eup %2712  ;;  %v1207_v31 = vmul.f32 1.442695, %v1155_v13 }
 0x33e   :  { %v1288_v41 = vsel %vm208_vm1, %v3547_v25, 0.0  ;;  %v3552_v10 = vpop.eup %2714 }
 0x33f   :  { %2716 = vpow2.f32 %v1207_v31  ;;  %1289 = vadd.xlane.f32.xlu2 %v1288_v41  ;;  %v1294_v28 = vsel %vm208_vm1, %v3552_v10, 0.0 }
 0x341   :  { %v1125_v58 = vpop.xlane.xlu0 %1124 }
 0x342   :  { %v1254_v48 = vpop.xlane.xlu1 %1253  ;;  %v1163_v1 = vsub.f32 %v3437_v19, %v1125_v58 }
 0x343   :  { %2718 = vrcp.f32 %v1254_v48 }
 0x344   :  { %2720 = vpow2.f32 %v1213_v33  ;;  %v1223_v21 = vmul.f32 1.442695, %v1163_v1 }
 0x345   :  { %v3554_v61 = vpop.eup %2716  ;;  %2722 = vpow2.f32 %v1215_v37 }
 0x346   :  { %v1291_v2 = vsel %vm208_vm1, %v3554_v61, 0.0  ;;  %2724 = vpow2.f32 %v1217_v6 }
 0x347   :  { %1292 = vadd.xlane.f32.xlu0 %v1291_v2  ;;  %1295 = vadd.xlane.f32.xlu2 %v1294_v28  ;;  %v2618_v2 = vunpack.i.h.bf16 %v3323_v15 }
 0x349   :  { %v2719_v23 = vpop.eup %2718  ;;  %v1131_v30 = vpop.xlane.xlu0 %1130 }
 0x34a   :  { %v3561_v24 = vpop.eup %2720  ;;  %v1366_v4 = vmul.f32 %v2719_v23, %v3439_v20  ;;  %v1119_v45 = vpop.xlane.xlu1 %1118  ;;  %v1165_v19 = vsub.f32 %v3446_v32, %v1131_v30 }
 0x34b   :  { %v3564_v40 = vpop.eup %2722  ;;  %v1161_v34 = vsub.f32 %v3435_v29, %v1119_v45  ;;  %v1300_v11 = vsel %vm208_vm1, %v3561_v24, 0.0 }
 0x34c   :  { %2525 = vmatmul.msk.f32.vlgmr.msra.gmra.mxu0 %vm208_vm1, %v1366_v4  ;;  %v1303_v20 = vsel %vm208_vm1, %v3564_v40, 0.0  ;;  %v3574_v29 = vpop.eup %2724  ;;  %v1227_v60 = vmul.f32 1.442695, %v1165_v19  ;;  %v2617_v4 = vunpack.i.l.bf16 %v3323_v15 }
 0x34d   :  { %v1219_v5 = vmul.f32 1.442695, %v1161_v34  ;;  %1802 = vmatpush.msra.mxu0 %v2642_v26  ;;  %v1306_v39 = vsel %vm208_vm1, %v3574_v29, 0.0  ;;  %v2622_v26 = vunpack.i.l.bf16 %v3329_v18 }
 0x34f   :  { %2726 = vpow2.f32 %v1219_v5  ;;  %1301 = vadd.xlane.f32.xlu2 %v1300_v11  ;;  %1304 = vadd.xlane.f32.xlu0 %v1303_v20 }
 0x351   :  { %v1260_v22 = vpop.xlane.xlu0 %1259 }
 0x352   :  { %v1128_v44 = vpop.xlane.xlu1 %1127  ;;  %2728 = vrcp.f32 %v1260_v22  ;;  %v2648_v22 = vunpack.i.h.bf16 %v3342_v38 }
 0x353   :  { %2730 = vpow2.f32 %v1223_v21  ;;  %v1164_v32 = vsub.f32 %v3455_v46, %v1128_v44  ;;  %v1166_v46 = vsub.f32 %v3408_v36, %v3510_v52  ;;  %v2628_v44 = vunpack.i.h.bf16 %v3325_v17 }
 0x355   :  { %v3576_v43 = vpop.eup %2726  ;;  %v1225_v50 = vmul.f32 1.442695, %v1164_v32  ;;  %v2633_v32 = vunpack.i.h.bf16 %v3321_v14 }
 0x356   :  { %v1309_v53 = vsel %vm208_vm1, %v3576_v43, 0.0 }
 0x357   :  { %1310 = vadd.xlane.f32.xlu1 %v1309_v53  ;;  %1307 = vadd.xlane.f32.xlu2 %v1306_v39 }
 0x358   :  { %v2729_v13 = vpop.eup %2728 }
 0x359   :  { %v1368_v31 = vmul.f32 %v2729_v13, %v3453_v42  ;;  %v3585_v33 = vpop.eup %2730  ;;  %v2649_v42 = vpack.i.bf16 %v3182_v8, %v3081_v47  ;;  %v1229_v47 = vmul.f32 1.442695, %v1166_v46 }
 0x35a   :  { %v1257_v41 = vpop.xlane.xlu1 %1256  ;;  %v1315_v37 = vsel %vm208_vm1, %v3585_v33, 0.0 }
 0x35b   :  { %2732 = vrcp.f32 %v1257_v41  ;;  %2527 = vmatmul.msk.f32.vlgmr.msrb.gmra.mxu2 %vm208_vm1, %v1368_v31  ;;  %v2647_v31 = vunpack.i.l.bf16 %v3342_v38  ;;  %v2627_v41 = vunpack.i.l.bf16 %v3325_v17 }
 0x35c   :  { %1854 = vmatpush.msrb.mxu2 %v2623_v54  ;;  %2734 = vpow2.f32 %v1227_v60 }
 0x35d   :  { %2736 = vpow2.f32 %v1225_v50 }
 0x35e   :  { %2738 = vpow2.f32 %v1229_v47 }
 0x35f   :  { %1316 = vadd.xlane.f32.xlu1 %v1315_v37 }
 0x361   :  { %v2733_v58 = vpop.eup %2732 }
 0x362   :  { %v1367_v48 = vmul.f32 %v2733_v58, %v3461_v56  ;;  %v3594_v9 = vpop.eup %2734  ;;  %v2632_v58 = vunpack.i.l.bf16 %v3321_v14 }
 0x363   :  { %2650 = vrot.lane.b32.xlu0 %v2649_v42, %s2895_s12  ;;  %v1321_v28 = vsel %vm208_vm1, %v3594_v9, 0.0  ;;  %v3603_v8 = vpop.eup %2736 }
 0x364   :  { %2526 = vmatmul.msk.f32.vlgmr.msrb.gmra.mxu1 %vm208_vm1, %v1367_v48  ;;  %v1318_v56 = vsel %vm208_vm1, %v3603_v8, 0.0  ;;  %v3611_v52 = vpop.eup %2738 }
 0x365   :  { %1828 = vmatpush.msrb.mxu1 %v2618_v2  ;;  %v1324_v23 = vsel %vm208_vm1, %v3611_v52, 0.0 }
 0x367   :  { %1322 = vadd.xlane.f32.xlu1 %v1321_v28  ;;  %v2637_v28 = vunpack.i.l.bf16 %v3327_v16 }
 0x36b   :  { %2197 = vrot.lane.b32.xlu0 %v3156_v0, %s2895_s12 }
 0x36f   :  { %2145 = vrot.lane.b32.xlu2 %v3172_v7, %s2895_s12  ;;  %1319 = vadd.xlane.f32.xlu1 %v1318_v56 }
 0x371   :  { %v1263_v36 = vpop.xlane.xlu2 %1262 }
 0x372   :  { %2740 = vrcp.f32 %v1263_v36 }
 0x377   :  { %1325 = vadd.xlane.f32.xlu1 %v1324_v23 }
 0x378   :  { %v2741_v6 = vpop.eup %2740 }
 0x379   :  { %v1369_v30 = vmul.f32 %v2741_v6, %v3473_v49  ;;  %v1266_v0 = vpop.xlane.xlu2 %1265 }
 0x37a   :  { %2742 = vrcp.f32 %v1266_v0 }
 0x37b   :  { %2528 = vmatmul.msk.f32.vlgmr.msra.gmra.mxu3 %vm208_vm1, %v1369_v30 }
 0x37c   :  { %1880 = vmatpush.msra.mxu3 %v2617_v4 }
 0x380   :  { %v2743_v7 = vpop.eup %2742 }
 0x381   :  { %v1370_v45 = vmul.f32 %v2743_v7, %v3478_v55 }
 0x383   :  { %2529 = vmatmul.msk.f32.vlgmr.msrb.gmra.mxu0 %vm208_vm1, %v1370_v45 }
 0x384   :  { %1906 = vmatpush.msrb.mxu0 %v2622_v26 }
 0x388   :  { %v3658_v4 = vpop.f32.mrf.mxu1 }
 0x38a   :  { %v3621_v34 = vpop.xlane.xlu0 %1313 }
 0x392   :  { %v1272_v1 = vpop.xlane.xlu1 %1271  ;;  %v1269_v5 = vpop.xlane.xlu0 %1268 }
 0x393   :  { %2744 = vrcp.f32 %v1272_v1 }
 0x394   :  { %2746 = vrcp.f32 %v1269_v5 }
 0x399   :  { %v2745_v49 = vpop.eup %2744 }
 0x39a   :  { %v2747_v15 = vpop.eup %2746  ;;  %v1372_v11 = vmul.f32 %v2745_v49, %v3503_v51  ;;  %v1281_v20 = vpop.xlane.xlu1 %1280 }
 0x39b   :  { %v1275_v21 = vpop.xlane.xlu0 %1274  ;;  %v1371_v55 = vmul.f32 %v2747_v15, %v3499_v35  ;;  %2748 = vrcp.f32 %v1281_v20  ;;  %v1278_v18 = vpop.xlane.xlu2 %1277 }
 0x39c   :  { %2750 = vrcp.f32 %v1278_v18  ;;  %2531 = vmatmul.msk.f32.vlgmr.msra.gmra.mxu2 %vm208_vm1, %v1372_v11  ;;  %v3666_v11 = vpop.f32.mrf.mxu2 }
 0x39d   :  { %2752 = vrcp.f32 %v1275_v21  ;;  %2530 = vmatmul.msk.f32.vlgmr.msra.gmra.mxu1 %vm208_vm1, %v1371_v55  ;;  %1958 = vmatpush.msra.mxu2 %v2648_v22 }
 0x39e   :  { %1932 = vmatpush.msra.mxu1 %v2628_v44 }
 0x3a1   :  { %v2749_v19 = vpop.eup %2748 }
 0x3a2   :  { %v2751_v51 = vpop.eup %2750  ;;  %v1375_v53 = vmul.f32 %v2749_v19, %v3512_v12  ;;  %v1284_v39 = vpop.xlane.xlu1 %1283 }
 0x3a3   :  { %v1287_v13 = vpop.xlane.xlu0 %1286  ;;  %v2753_v60 = vpop.eup %2752  ;;  %v1374_v35 = vmul.f32 %v2751_v51, %v3516_v27  ;;  %2754 = vrcp.f32 %v1284_v39 }
 0x3a4   :  { %v1373_v54 = vmul.f32 %v2753_v60, %v3514_v62  ;;  %2756 = vrcp.f32 %v1287_v13  ;;  %v2638_v62 = vunpack.i.h.bf16 %v3327_v16  ;;  %v3680_v13 = vpop.f32.mrf.mxu0 }
 0x3a5   :  { %2533 = vmatmul.msk.f32.vlgmr.msra.gmra.mxu0 %vm208_vm1, %v1374_v35  ;;  %2534 = vmatmul.msk.f32.vlgmr.msrb.gmra.mxu1 %vm208_vm1, %v1375_v53 }
 0x3a6   :  { %2532 = vmatmul.msk.f32.vlgmr.msrb.gmra.mxu3 %vm208_vm1, %v1373_v54  ;;  %2010 = vmatpush.msra.mxu0 %v2647_v31  ;;  %v3687_v54 = vpop.f32.mrf.mxu3 }
 0x3a7   :  { %1984 = vmatpush.msrb.mxu3 %v2627_v41  ;;  %2036 = vmatpush.msrb.mxu1 %v2633_v32 }
 0x3a9   :  { %v2755_v12 = vpop.eup %2754 }
 0x3aa   :  { %v2757_v27 = vpop.eup %2756  ;;  %v1376_v38 = vmul.f32 %v2755_v12, %v3524_v57  ;;  %v1299_v37 = vpop.xlane.xlu1 %1298 }
 0x3ab   :  { %v1377_v17 = vmul.f32 %v2757_v27, %v3528_v59  ;;  %2758 = vrcp.f32 %v1299_v37 }
 0x3ac   :  { %2535 = vmatmul.msk.f32.vlgmr.msrb.gmra.mxu2 %vm208_vm1, %v1376_v38 }
 0x3ad   :  { %2062 = vmatpush.msrb.mxu2 %v2638_v62 }
 0x3ae   :  { %2536 = vmatmul.msk.f32.vlgmr.msra.gmra.mxu3 %vm208_vm1, %v1377_v17 }
 0x3af   :  { %2088 = vmatpush.msra.mxu3 %v2632_v58  ;;  %v3672_v55 = vpop.f32.mrf.mxu2 }
 0x3b1   :  { %v2759_v42 = vpop.eup %2758 }
 0x3b2   :  { %v1381_v50 = vmul.f32 %v2759_v42, %v3539_v3  ;;  %v1290_v48 = vpop.xlane.xlu2 %1289 }
 0x3b3   :  { %2760 = vrcp.f32 %v1290_v48 }
 0x3b6   :  { %2540 = vmatmul.msk.f32.vlgmr.msrb.gmra.mxu3 %vm208_vm1, %v1381_v50 }
 0x3b9   :  { %v2761_v57 = vpop.eup %2760 }
 0x3ba   :  { %v1378_v2 = vmul.f32 %v2761_v57, %v3547_v25  ;;  %v1296_v59 = vpop.xlane.xlu2 %1295  ;;  %v1293_v46 = vpop.xlane.xlu0 %1292 }
 0x3bb   :  { %2762 = vrcp.f32 %v1296_v59 }
 0x3bc   :  { %2764 = vrcp.f32 %v1293_v46  ;;  %2537 = vmatmul.msk.f32.vlgmr.msrb.gmra.mxu0 %vm208_vm1, %v1378_v2 }
 0x3bd   :  { %2114 = vmatpush.msrb.mxu0 %v2637_v28 }
 0x3c1   :  { %v2763_v14 = vpop.eup %2762 }
 0x3c2   :  { %v2765_v47 = vpop.eup %2764  ;;  %v1380_v3 = vmul.f32 %v2763_v14, %v3552_v10  ;;  %v1302_v56 = vpop.xlane.xlu2 %1301 }
 0x3c3   :  { %v1305_v36 = vpop.xlane.xlu0 %1304  ;;  %v1379_v23 = vmul.f32 %v2765_v47, %v3554_v61  ;;  %2766 = vrcp.f32 %v1302_v56  ;;  %v2348_v56 = vld [vmem:[#allocation7 + $0x18] sm:$0xff] }
 0x3c4   :  { %2768 = vrcp.f32 %v1305_v36  ;;  %2539 = vmatmul.msk.f32.vlgmr.msra.gmra.mxu2 %vm208_vm1, %v1380_v3  ;;  %v2347_v36 = vld [vmem:[#allocation7 + $0x10] sm:$0xff] }
 0x3c5   :  { %2538 = vmatmul.msk.f32.vlgmr.msra.gmra.mxu1 %vm208_vm1, %v1379_v23  ;;  %2770 = vrcp.f32 %v3621_v34  ;;  %v2346_v23 = vld [vmem:[#allocation7 + $0x8] sm:$0xff] }
 0x3c9   :  { %v2767_v16 = vpop.eup %2766  ;;  %v3684_v35 = vpop.f32.mrf.mxu0 }
 0x3ca   :  { %v2769_v25 = vpop.eup %2768  ;;  %v1382_v6 = vmul.f32 %v2767_v16, %v3561_v24  ;;  %v1311_v30 = vpop.xlane.xlu1 %1310  ;;  %v2345_v16 = vld [vmem:[#allocation7] sm:$0xff] }
 0x3cb   :  { %v1308_v0 = vpop.xlane.xlu2 %1307  ;;  %v1383_v10 = vmul.f32 %v2769_v25, %v3564_v40  ;;  %2772 = vrcp.f32 %v1311_v30  ;;  %v2771_v61 = vpop.eup %2770 }
 0x3cc   :  { %2774 = vrcp.f32 %v1308_v0  ;;  %2541 = vmatmul.msk.f32.vlgmr.msra.gmra.mxu0 %vm208_vm1, %v1382_v6  ;;  %v1386_v26 = vmul.f32 %v2771_v61, %v3493_v63 }
 0x3cd   :  { %2542 = vmatmul.msk.f32.vlgmr.msrb.gmra.mxu1 %vm208_vm1, %v1383_v10 }
 0x3d1   :  { %v2773_v7 = vpop.eup %2772 }
 0x3d2   :  { %v2775_v45 = vpop.eup %2774  ;;  %v1385_v34 = vmul.f32 %v2773_v7, %v3576_v43  ;;  %v1317_v1 = vpop.xlane.xlu1 %1316 }
 0x3d3   :  { %v2146_v24 = vpop.permute.xlu2 %2145  ;;  %v1384_v5 = vmul.f32 %v2775_v45, %v3574_v29  ;;  %2776 = vrcp.f32 %v1317_v1  ;;  %v3668_v43 = vpop.f32.mrf.mxu1 }
 0x3d4   :  { %2166 = vmatpush.msra.mxu2 %v2146_v24  ;;  %2544 = vmatmul.msk.f32.vlgmr.msra.gmra.mxu3 %vm208_vm1, %v1385_v34 }
 0x3d5   :  { %2545 = vmatmul.msk.f32.vlgmr.msrb.gmra.mxu0 %vm208_vm1, %v1386_v26  ;;  %2543 = vmatmul.msk.f32.vlgmr.msrb.gmra.mxu2 %vm208_vm1, %v1384_v5  ;;  %v2651_v40 = vpop.permute.xlu0 %2650 }
 0x3d6   :  { %v2653_v49 = vunpack.i.h.bf16 %v2651_v40  ;;  %v2652_v15 = vunpack.i.l.bf16 %v2651_v40  ;;  %2558 = vmatpush.msrb.mxu2 %v2348_v56 }
 0x3d8   :  { %2140 = vmatpush.msra.mxu1 %v2653_v49  ;;  %2192 = vmatpush.msrb.mxu3 %v2652_v15 }
 0x3d9   :  { %v2777_v63 = vpop.eup %2776  ;;  %2560 = vmatpush.msrb.mxu2 %v2347_v36 }
 0x3da   :  { %v1387_v29 = vmul.f32 %v2777_v63, %v3585_v33  ;;  %v1323_v20 = vpop.xlane.xlu1 %1322  ;;  %2389 = vmatpush.msrb.mxu1 %v2348_v56  ;;  %2559 = vmatpush.msra.mxu3 %v2348_v56 }
 0x3db   :  { %2778 = vrcp.f32 %v1323_v20  ;;  %2562 = vmatpush.msrb.mxu2 %v2346_v23 }
 0x3dc   :  { %2546 = vmatmul.msk.f32.vlgmr.msra.gmra.mxu1 %vm208_vm1, %v1387_v29  ;;  %2561 = vmatpush.msra.mxu3 %v2347_v36 }
 0x3dd   :  { %v2198_v21 = vpop.permute.xlu0 %2197  ;;  %2390 = vmatpush.msrb.mxu1 %v2347_v36  ;;  %2564 = vmatpush.msrb.mxu2 %v2345_v16 }
 0x3de   :  { %2218 = vmatpush.msra.mxu0 %v2198_v21  ;;  %v1648_v33 = vpop.f32.mrf.mxu2  ;;  %2563 = vmatpush.msra.mxu3 %v2346_v23 }
 0x3df   :  { %2391 = vmatpush.msrb.mxu1 %v2346_v23 }
 0x3e0   :  { %2565 = vmatpush.msra.mxu3 %v2345_v16 }
 0x3e1   :  { %v2779_v22 = vpop.eup %2778  ;;  %v1622_v18 = vpop.f32.mrf.mxu1  ;;  %2392 = vmatpush.msrb.mxu1 %v2345_v16 }
 0x3e2   :  { %v1389_v44 = vmul.f32 %v2779_v22, %v3594_v9  ;;  %2231 = vrot.lane.b32.xlu2 %v1622_v18, %s2888_s27  ;;  %v1320_v19 = vpop.xlane.xlu1 %1319 }
 0x3e3   :  { %2780 = vrcp.f32 %v1320_v19 }
 0x3e4   :  { %2548 = vmatmul.msk.f32.vlgmr.msrb.gmra.mxu3 %vm208_vm1, %v1389_v44 }
 0x3e9   :  { %v2781_v51 = vpop.eup %2780 }
 0x3ea   :  { %v1388_v53 = vmul.f32 %v2781_v51, %v3603_v8  ;;  %v1326_v39 = vpop.xlane.xlu1 %1325  ;;  %2233 = vrot.lane.b32.xlu2 %v1648_v33, %s2888_s27  ;;  %v3689_v8 = vpop.f32.mrf.mxu3 }
 0x3eb   :  { %2782 = vrcp.f32 %v1326_v39 }
 0x3ec   :  { %2547 = vmatmul.msk.f32.vlgmr.msra.gmra.mxu2 %vm208_vm1, %v1388_v53 }
 0x3f1   :  { %v2783_v60 = vpop.eup %2782 }
 0x3f2   :  { %v1390_v9 = vmul.f32 %v2783_v60, %v3611_v52 }
 0x3f4   :  { %2549 = vmatmul.msk.f32.vlgmr.msra.gmra.mxu0 %vm208_vm1, %v1390_v9 }
 0x3fe   :  { %v1674_v32 = vpop.f32.mrf.mxu3 }
 0x400   :  { %v1700_v31 = vpop.f32.mrf.mxu0 }
 0x401   :  { %2237 = vrot.lane.b32.xlu1 %v1700_v31, %s2888_s27 }
 0x41a   :  { %v1726_v41 = vpop.f32.mrf.mxu1 }
 0x41b   :  { %2239 = vrot.lane.b32.xlu1 %v1726_v41, %s2888_s27 }
 0x41f   :  { %v1752_v12 = vpop.f32.mrf.mxu2 }
 0x422   :  { %v1804_v27 = vpop.f32.mrf.mxu0  ;;  %v1830_v38 = vpop.f32.mrf.mxu1 }
 0x423   :  { %2263 = vrot.lane.b32.xlu0 %v1830_v38, %s2896_s13  ;;  %2241 = vrot.lane.b32.xlu1 %v1752_v12, %s2888_s27 }
 0x424   :  { %2245 = vrot.lane.b32.xlu2 %v1804_v27, %s2888_s27 }
 0x429   :  { %v1778_v52 = vpop.f32.mrf.mxu3 }
 0x42c   :  { %2243 = vrot.lane.b32.xlu2 %v1778_v52, %s2888_s27 }
 0x42f   :  { %v1856_v58 = vpop.f32.mrf.mxu2 }
 0x431   :  { %v1882_v37 = vpop.f32.mrf.mxu3 }
 0x439   :  { %v1986_v62 = vpop.f32.mrf.mxu3  ;;  %v1908_v17 = vpop.f32.mrf.mxu0 }
 0x43a   :  { %2275 = vrot.lane.b32.xlu2 %v1986_v62, %s2896_s13  ;;  %2269 = vrot.lane.b32.xlu0 %v1908_v17, %s2896_s13 }
 0x43c   :  { %v2232_v0 = vpop.permute.xlu2 %2231 }
 0x43d   :  { %v2319_v45 = vsel %vm208_vm1, %v3658_v4, %v2232_v0 }
 0x442   :  { %v1934_v42 = vpop.f32.mrf.mxu1  ;;  %2265 = vrot.lane.b32.xlu0 %v1856_v58, %s2896_s13 }
 0x443   :  { %2271 = vrot.lane.b32.xlu1 %v1934_v42, %s2896_s13  ;;  %v2655_v42 = vld [vmem:[%s3765_s4] ss:$0 sm:$0xff]  ;;  %s2898_s4 = smov [#allocation8]  }
 0x444   :  { %v2234_v7 = vpop.permute.xlu2 %2233  ;;  %s2430_s17 = sshll.u32 %s2898_s4, 4  ;;  %s2431_s17 = int_to_ptr.vmem [resolvable:$true] %s2430_s17 }
 0x445   :  { %v2320_v29 = vsel %vm208_vm1, %v3666_v11, %v2234_v7 }
 0x447   :  { %v1960_v48 = vpop.f32.mrf.mxu2 }
 0x449   :  { %v2012_v50 = vpop.f32.mrf.mxu0 }
 0x44a   :  { %v2038_v57 = vpop.f32.mrf.mxu1  ;;  %2277 = vrot.lane.b32.xlu2 %v2012_v50, %s2896_s13 }
 0x44b   :  { %2273 = vrot.lane.b32.xlu1 %v1960_v48, %s2896_s13  ;;  %2295 = vrot.lane.b32.xlu0 %v2038_v57, %s2897_s14 }
 0x452   :  { %v2116_v2 = vpop.f32.mrf.mxu0  ;;  %2235 = vrot.lane.b32.xlu2 %v1674_v32, %s2888_s27 }
 0x453   :  { %2301 = vrot.lane.b32.xlu0 %v2116_v2, %s2897_s14 }
 0x457   :  { %v2090_v46 = vpop.f32.mrf.mxu3 }
 0x458   :  { %v2064_v59 = vpop.f32.mrf.mxu2 }
 0x459   :  { %v2142_v28 = vpop.f32.mrf.mxu1 }
 0x45b   :  { %2297 = vrot.lane.b32.xlu0 %v2064_v59, %s2897_s14 }
 0x463   :  { %2303 = vrot.lane.b32.xlu0 %v2142_v28, %s2897_s14 }
 0x467   :  { %v2194_v14 = vpop.f32.mrf.mxu3 }
 0x468   :  { %2307 = vrot.lane.b32.xlu1 %v2194_v14, %s2897_s14 }
 0x46f   :  { %v2168_v47 = vpop.f32.mrf.mxu2 }
 0x470   :  { %2305 = vrot.lane.b32.xlu0 %v2168_v47, %s2897_s14 }
 0x471   :  { %v2220_v3 = vpop.f32.mrf.mxu0 }
 0x472   :  { %2309 = vrot.lane.b32.xlu1 %v2220_v3, %s2897_s14 }
 0x473   :  { %v2238_v30 = vpop.permute.xlu1 %2237 }
 0x474   :  { %v2322_v40 = vsel %vm208_vm1, %v3680_v13, %v2238_v30 }
 0x478   :  { %2267 = vrot.lane.b32.xlu0 %v1882_v37, %s2896_s13 }
 0x47a   :  { %2299 = vrot.lane.b32.xlu1 %v2090_v46, %s2897_s14 }
 0x47e   :  { %v2246_v5 = vpop.permute.xlu2 %2245 }
 0x47f   :  { %v2326_v12 = vsel %vm208_vm1, %v3684_v35, %v2246_v5 }
 0x486   :  { %v2244_v20 = vpop.permute.xlu2 %2243 }
 0x487   :  { %v2325_v11 = vsel %vm208_vm1, %v3689_v8, %v2244_v20 }
 0x48d   :  { %v2240_v61 = vpop.permute.xlu1 %2239 }
 0x48e   :  { %v2323_v19 = vsel %vm208_vm1, %v3668_v43, %v2240_v61 }
 0x494   :  { %v2276_v51 = vpop.permute.xlu2 %2275 }
 0x495   :  { %v2264_v25 = vpop.permute.xlu0 %2263  ;;  %v2242_v1 = vpop.permute.xlu1 %2241  ;;  %v2334_v13 = vsel %vm2327_vm3, %v2325_v11, %v2276_v51 }
 0x496   :  { %v2328_v26 = vsel %vm2327_vm3, %v2319_v45, %v2264_v25  ;;  %v2324_v43 = vsel %vm208_vm1, %v3672_v55, %v2242_v1 }
 0x4a4   :  { %v2278_v31 = vpop.permute.xlu2 %2277 }
 0x4a5   :  { %v2335_v8 = vsel %vm2327_vm3, %v2326_v12, %v2278_v31 }
 0x4ac   :  { %v2270_v6 = vpop.permute.xlu0 %2269  ;;  %v2236_v37 = vpop.permute.xlu2 %2235 }
 0x4ad   :  { %v2331_v49 = vsel %vm2327_vm3, %v2322_v40, %v2270_v6  ;;  %v2321_v55 = vsel %vm208_vm1, %v3687_v54, %v2236_v37 }
 0x4b4   :  { %v2266_v10 = vpop.permute.xlu0 %2265 }
 0x4b5   :  { %v2272_v4 = vpop.permute.xlu1 %2271  ;;  %v2329_v21 = vsel %vm2327_vm3, %v2320_v29, %v2266_v10 }
 0x4b6   :  { %v2332_v33 = vsel %vm2327_vm3, %v2323_v19, %v2272_v4 }
 0x4bd   :  { %v2296_v34 = vpop.permute.xlu0 %2295  ;;  %v2274_v44 = vpop.permute.xlu1 %2273 }
 0x4be   :  { %v2337_v24 = vsel %vm2336_vm2, %v2328_v26, %v2296_v34  ;;  %v2333_v41 = vsel %vm2327_vm3, %v2324_v43, %v2274_v44 }
 0x4bf   :  { %2550 = vmatmul.msk.f32.vlgmr.msrb.gmra.mxu1 %vm84_vm0, %v2337_v24 }
 0x4c5   :  { %v2302_v15 = vpop.permute.xlu0 %2301 }
 0x4c6   :  { %v2340_v63 = vsel %vm2336_vm2, %v2331_v49, %v2302_v15 }
 0x4c7   :  { %2553 = vmatmul.msk.f32.vlgmr.msrb.gmra.mxu2 %vm84_vm0, %v2340_v63 }
 0x4cd   :  { %v2298_v22 = vpop.permute.xlu0 %2297 }
 0x4ce   :  { %v2338_v18 = vsel %vm2336_vm2, %v2329_v21, %v2298_v22 }
 0x4cf   :  { %2551 = vmatmul.msk.f32.gmra.mxu1 %vm84_vm0, %v2338_v18 }
 0x4d5   :  { %v2304_v53 = vpop.permute.xlu0 %2303 }
 0x4d6   :  { %v2341_v39 = vsel %vm2336_vm2, %v2332_v33, %v2304_v53 }
 0x4d7   :  { %2554 = vmatmul.msk.f32.gmra.mxu2 %vm84_vm0, %v2341_v39 }
 0x4da   :  { %v2308_v60 = vpop.permute.xlu1 %2307 }
 0x4db   :  { %v2343_v9 = vsel %vm2336_vm2, %v2334_v13, %v2308_v60 }
 0x4dc   :  { %2556 = vmatmul.msk.f32.vlgmr.msra.gmra.mxu3 %vm84_vm0, %v2343_v9 }
 0x4e2   :  { %v2306_v32 = vpop.permute.xlu0 %2305 }
 0x4e3   :  { %v2342_v27 = vsel %vm2336_vm2, %v2333_v41, %v2306_v32 }
 0x4e4   :  { %2555 = vmatmul.msk.f32.gmra.mxu2 %vm84_vm0, %v2342_v27  ;;  %v2310_v38 = vpop.permute.xlu1 %2309 }
 0x4e5   :  { %v2344_v52 = vsel %vm2336_vm2, %v2335_v8, %v2310_v38 }
 0x4e6   :  { %2557 = vmatmul.msk.f32.gmra.mxu3 %vm84_vm0, %v2344_v52 }
 0x4ea   :  { %v2268_v62 = vpop.permute.xlu0 %2267 }
 0x4eb   :  { %v2330_v17 = vsel %vm2327_vm3, %v2321_v55, %v2268_v62 }
 0x4ec   :  { %v2300_v58 = vpop.permute.xlu1 %2299 }
 0x4ed   :  { %v2339_v35 = vsel %vm2336_vm2, %v2330_v17, %v2300_v58 }
 0x4ee   :  { %2552 = vmatmul.msk.f32.gmra.mxu1 %vm84_vm0, %v2339_v35 }
 0x53c   :  { %v2394_v50 = vpop.f32.mrf.mxu1 }
 0x53d   :  { %v2395_v48 = vadd.f32 %v2655_v42, %v2394_v50 }
 0x53f   :  { %2418 = vst.msk [vmem:[#allocation8] sm:$0xff] %vm84_vm0, %v2395_v48 }
 0x54a   :  { %v2403_v57 = vpop.f32.mrf.mxu2 }
 0x54b   :  { %v2404_v2 = vadd.f32 %v2655_v42, %v2403_v57 }
 0x54c   :  { %v2397_v59 = vpop.f32.mrf.mxu1 }
 0x54d   :  { %2421 = vst.msk [vmem:[#allocation8 + $0x18] sm:$0xff] %vm84_vm0, %v2404_v2  ;;  %v2398_v54 = vadd.f32 %v2655_v42, %v2397_v59 }
 0x54f   :  { %2419 = vst.msk [vmem:[#allocation8 + $0x8] sm:$0xff] %vm84_vm0, %v2398_v54 }
 0x55a   :  { %v2406_v46 = vpop.f32.mrf.mxu2 }
 0x55b   :  { %v2407_v28 = vadd.f32 %v2655_v42, %v2406_v46 }
 0x55d   :  { %2422 = vst.msk [vmem:[#allocation8 + $0x20] sm:$0xff] %vm84_vm0, %v2407_v28 }
 0x55f   :  { %v2412_v14 = vpop.f32.mrf.mxu3 }
 0x560   :  { %v2413_v47 = vadd.f32 %v2655_v42, %v2412_v14 }
 0x562   :  { %2424 = vst.msk [vmem:[#allocation8 + $0x30] sm:$0xff] %vm84_vm0, %v2413_v47 }
 0x567   :  { %v2409_v3 = vpop.f32.mrf.mxu2 }
 0x568   :  { %v2410_v56 = vadd.f32 %v2655_v42, %v2409_v3 }
 0x569   :  { %v2415_v36 = vpop.f32.mrf.mxu3 }
 0x56a   :  { %2423 = vst.msk [vmem:[#allocation8 + $0x28] sm:$0xff] %vm84_vm0, %v2410_v56  ;;  %v2416_v23 = vadd.f32 %v2655_v42, %v2415_v36 }
 0x56b   :  { %v2400_v16 = vpop.f32.mrf.mxu1 }
 0x56c   :  { %2425 = vst.msk [vmem:[#allocation8 + $0x38] sm:$0xff] %vm84_vm0, %v2416_v23  ;;  %v2401_v25 = vadd.f32 %v2655_v42, %v2400_v16 }
 0x56e   :  { %2420 = vst.msk [vmem:[#allocation8 + $0x10] sm:$0xff] %vm84_vm0, %v2401_v25 }
 0x56f   :  { %2438 = dma.vmem_to_hbm [thread:$0]  %s2431_s17, 1024, %s2433_s20, [#allocation4], %s2887_s26, %s2887_s26, %s2888_s27  }
 0x570   :  { %2884 = dma.done.wait [#allocation4], 1024  }
 0x571   :  { %2885 = vsyncadd [#allocation4], 4294966272 }
 0x572   :  { %2443 = vsyncpa [#allocation3], 1 }
 0x573   :  { %2444 = vsyncpa [#allocation6], 1 }
 0x574   :  { %2445 = vsyncpa [#allocation4], 1 }

// kernel: tpu_custom_call.1
= control target key start
LH: loop header
LB: loop body
LE: loop exit
PB: predicated region body
PF: predicated region fallthrough
CT: control target
= control target key end

     0   :  { %10 = vsyncpa [#allocation3], 0  ;;  %s3761_s0 = inlined_call_operand.hbm [shape: f32[8,8,32], index: 0, kind: input, shape index: {}]   ;;  %s3762_s1 = inlined_call_operand.hbm [shape: f32[32,96], index: 1, kind: input, shape index: {}]   ;;  %s3763_s2 = inlined_call_operand.vmem [shape: f32[1,96], index: 2, kind: input, shape index: {}]   ;;  %s3764_s3 = inlined_call_operand.hbm [shape: f32[32,32], index: 3, kind: input, shape index: {}]   ;;  %s3765_s4 = inlined_call_operand.vmem [shape: f32[1,32], index: 4, kind: input, shape index: {}]   ;;  %s3766_s5 = inlined_call_operand.hbm [shape: f32[8,8,32], index: 5, kind: output, shape index: {}]  }
   0x1   :  { %11 = vsyncpa [#allocation6], 0 }
   0x2   :  { %12 = vsyncpa [#allocation4], 0  ;;  %s30_s20 = sshll.u32 %s3762_s1, 4  ;;  %s2886_s21 = smov [#allocation5]   ;;  %s31_s20 = int_to_ptr.hbm [resolvable:$true] %s30_s20 }
   0x3   :  { %s32_s22 = sshll.u32 %s2886_s21, 4  ;;  %s17_s25 = sshll.u32 %s3761_s0, 4  ;;  %s33_s22 = int_to_ptr.vmem [resolvable:$true] %s32_s22  ;;  %s18_s25 = int_to_ptr.hbm [resolvable:$true] %s17_s25 }
   0x4   :  { %s2887_s26 = smov 128   ;;  %s2888_s27 = smov 8  }
   0x5   :  { %38 = dma.hbm_to_vmem [thread:$0]  %s31_s20, 512, %s33_s22, [#allocation6], %s2887_s26, %s2887_s26, %s2888_s27  }
   0x6   :  { %s2889_s28 = smov [#allocation2]   ;;  %s45_s1 = sshll.u32 %s3764_s3, 4  ;;  %s46_s1 = int_to_ptr.hbm [resolvable:$true] %s45_s1 }
   0x7   :  { %s19_s29 = sshll.u32 %s2889_s28, 4  ;;  %s2890_s0 = smov [#allocation7]   ;;  %s20_s29 = int_to_ptr.vmem [resolvable:$true] %s19_s29 }
   0x8   :  { %25 = dma.hbm_to_vmem [thread:$0]  %s18_s25, 1024, %s20_s29, [#allocation3], %s2887_s26, %s2887_s26, %s2888_s27  }
   0x9   :  { %s47_s7 = sshll.u32 %s2890_s0, 4  ;;  %s48_s7 = int_to_ptr.vmem [resolvable:$true] %s47_s7 }
   0xa   :  { %53 = dma.hbm_to_vmem [thread:$0]  %s46_s1, 512, %s48_s7, [#allocation6], %s2887_s26, %s2887_s26, %s2888_s27  }
   0xb   :  { %2880 = dma.done.wait [#allocation3], 1024  }
   0xc   :  { %2881 = vsyncadd [#allocation3], 4294966272 }
   0xd   :  { %2882 = dma.done.wait [#allocation6], 1024  }
   0xe   :  { %2883 = vsyncadd [#allocation6], 4294966272  ;;  %v79_v0 = vld [vmem:[#allocation5 + $0x18] sm:$0xff]  ;;  %v78_v1 = vld [vmem:[#allocation5 + $0x10] sm:$0xff]  ;;  %vm84_vm0 = vcmask 261120   ;;  %s2891_s9 = smov 112  }
   0xf   :  { %121 = vmatpush.msra.mxu0 %v79_v0  ;;  %v77_v2 = vld [vmem:[#allocation5 + $0x8] sm:$0xff]  ;;  %v76_v3 = vld [vmem:[#allocation5] sm:$0xff]  ;;  %v70_v6 = vld [vmem:[#allocation2 + $0x10] sm:$0xff]  ;;  %s2892_s10 = smov 120   ;;  %s2893_s11 = smov 96   ;;  %vm208_vm1 = vcmask 64512  }
  0x10   :  { %v68_v4 = vld [vmem:[#allocation2] sm:$0xff]  ;;  %v69_v5 = vld [vmem:[#allocation2 + $0x8] sm:$0xff]  ;;  %v71_v7 = vld [vmem:[#allocation2 + $0x18] sm:$0xff]  ;;  %s2895_s12 = smov 64   ;;  %s2896_s13 = smov 16   ;;  %vm2336_vm2 = vcmask 195584  }
  0x11   :  { %122 = vmatpush.msra.mxu0 %v78_v1  ;;  %v72_v8 = vld [vmem:[#allocation2 + $0x20] sm:$0xff]  ;;  %v73_v9 = vld [vmem:[#allocation2 + $0x28] sm:$0xff]  ;;  %v74_v10 = vld [vmem:[#allocation2 + $0x30] sm:$0xff]  ;;  %s2897_s14 = smov 24   ;;  %vm2327_vm3 = vcmask 130048   ;;  %s2432_s20 = sshll.u32 %s3766_s5, 4  ;;  %s2433_s20 = int_to_ptr.hbm [resolvable:$true] %s2432_s20 }
  0x12   :  { %v75_v11 = vld [vmem:[#allocation2 + $0x38] sm:$0xff]  ;;  %v2654_v12 = vld [vmem:[%s3763_s2] ss:$0 sm:$0xff]  ;;  %s2894_s2 = smov 104  }
  0x13   :  { %123 = vmatpush.msra.mxu0 %v77_v2 }
  0x15   :  { %124 = vmatpush.msra.mxu0 %v76_v3 }
  0x16   :  { %2446 = vmatmul.msk.f32.vlgmr.msra.gmra.mxu0 %vm84_vm0, %v68_v4 }
  0x1e   :  { %2447 = vmatmul.msk.f32.gmra.mxu0 %vm84_vm0, %v69_v5 }
  0x26   :  { %2448 = vmatmul.msk.f32.gmra.mxu0 %vm84_vm0, %v70_v6 }
  0x2e   :  { %2449 = vmatmul.msk.f32.gmra.mxu0 %vm84_vm0, %v71_v7 }
  0x36   :  { %2450 = vmatmul.msk.f32.gmra.mxu0 %vm84_vm0, %v72_v8 }
  0x3e   :  { %2451 = vmatmul.msk.f32.gmra.mxu0 %vm84_vm0, %v73_v9 }
  0x46   :  { %2452 = vmatmul.msk.f32.gmra.mxu0 %vm84_vm0, %v74_v10 }
  0x4e   :  { %2453 = vmatmul.msk.f32.gmra.mxu0 %vm84_vm0, %v75_v11 }
  0x93   :  { %v126_v13 = vpop.f32.mrf.mxu0 }
  0x94   :  { %v2958_v14 = vadd.f32 %v2654_v12, %v126_v13 }
  0x96   :  { %174 = vrot.lane.b32.xlu2 %v2958_v14, %s2891_s9  ;;  %158 = vrot.lane.b32.xlu0 %v2958_v14, %s2892_s10 }
  0x9b   :  { %v129_v15 = vpop.f32.mrf.mxu0 }
  0x9c   :  { %v2964_v16 = vadd.f32 %v2654_v12, %v129_v15 }
  0x9e   :  { %160 = vrot.lane.b32.xlu1 %v2964_v16, %s2892_s10  ;;  %206 = vrot.lane.b32.xlu0 %v2958_v14, %s2893_s11 }
  0xa3   :  { %v132_v17 = vpop.f32.mrf.mxu0 }
  0xa4   :  { %v2974_v19 = vadd.f32 %v2654_v12, %v132_v17 }
  0xa6   :  { %192 = vrot.lane.b32.xlu1 %v2964_v16, %s2894_s2  ;;  %190 = vrot.lane.b32.xlu0 %v2958_v14, %s2894_s2  ;;  %v2579_v9 = vpack.i.bf16 %v2958_v14, %v2974_v19 }
  0xab   :  { %v135_v18 = vpop.f32.mrf.mxu0 }
  0xac   :  { %v2996_v24 = vadd.f32 %v2654_v12, %v135_v18 }
  0xae   :  { %259 = vrot.lane.b32.xlu1 %v2974_v19, %s2893_s11  ;;  %176 = vrot.lane.b32.xlu0 %v2964_v16, %s2891_s9  ;;  %v2584_v11 = vpack.i.bf16 %v2964_v16, %v2996_v24 }
  0xb3   :  { %v138_v20 = vpop.f32.mrf.mxu0 }
  0xb4   :  { %v2980_v21 = vadd.f32 %v2654_v12, %v138_v20 }
  0xb6   :  { %178 = vrot.lane.b32.xlu1 %v2974_v19, %s2891_s9  ;;  %311 = vrot.lane.b32.xlu2 %v2980_v21, %s2893_s11 }
  0xb7   :  { %233 = vrot.lane.b32.xlu0 %v2964_v16, %s2893_s11 }
  0xbb   :  { %v141_v22 = vpop.f32.mrf.mxu0 }
  0xbc   :  { %v2994_v23 = vadd.f32 %v2654_v12, %v141_v22 }
  0xbe   :  { %194 = vrot.lane.b32.xlu1 %v2974_v19, %s2894_s2  ;;  %182 = vrot.lane.b32.xlu2 %v2980_v21, %s2891_s9 }
  0xbf   :  { %162 = vrot.lane.b32.xlu0 %v2974_v19, %s2892_s10 }
  0xc3   :  { %v144_v25 = vpop.f32.mrf.mxu0 }
  0xc4   :  { %v3010_v26 = vadd.f32 %v2654_v12, %v144_v25 }
  0xc6   :  { %164 = vrot.lane.b32.xlu1 %v2996_v24, %s2892_s10  ;;  %168 = vrot.lane.b32.xlu2 %v2994_v23, %s2892_s10  ;;  %v2589_v58 = vpack.i.bf16 %v2980_v21, %v3010_v26 }
  0xc7   :  { %285 = vrot.lane.b32.xlu0 %v2996_v24, %s2893_s11 }
  0xcb   :  { %v147_v27 = vpop.f32.mrf.mxu0 }
  0xcc   :  { %v3022_v28 = vadd.f32 %v2654_v12, %v147_v27 }
  0xce   :  { %180 = vrot.lane.b32.xlu1 %v2996_v24, %s2891_s9  ;;  %184 = vrot.lane.b32.xlu2 %v2994_v23, %s2891_s9  ;;  %v2594_v13 = vpack.i.bf16 %v2994_v23, %v3022_v28 }
  0xcf   :  { %166 = vrot.lane.b32.xlu0 %v2980_v21, %s2892_s10 }
  0xd6   :  { %186 = vrot.lane.b32.xlu1 %v3010_v26, %s2891_s9  ;;  %170 = vrot.lane.b32.xlu2 %v3010_v26, %s2892_s10 }
  0xd7   :  { %337 = vrot.lane.b32.xlu0 %v2994_v23, %s2893_s11 }
  0xde   :  { %363 = vrot.lane.b32.xlu1 %v3010_v26, %s2893_s11  ;;  %202 = vrot.lane.b32.xlu2 %v3010_v26, %s2894_s2 }
  0xe6   :  { %172 = vrot.lane.b32.xlu1 %v3022_v28, %s2892_s10  ;;  %389 = vrot.lane.b32.xlu2 %v3022_v28, %s2893_s11 }
  0xee   :  { %196 = vrot.lane.b32.xlu1 %v2996_v24, %s2894_s2  ;;  %188 = vrot.lane.b32.xlu2 %v3022_v28, %s2891_s9 }
  0xf0   :  { %v3032_v29 = vpop.permute.xlu2 %174 }
 0x108   :  { %v3034_v30 = vpop.permute.xlu0 %158 }
 0x109   :  { %415 = vrot.lane.b32.xlu0 %v3034_v30, %s2893_s11 }
 0x110   :  { %v3038_v31 = vpop.permute.xlu1 %160  ;;  %v312_v32 = vpop.permute.xlu2 %311 }
 0x111   :  { %v207_v33 = vpop.permute.xlu0 %206  ;;  %441 = vrot.lane.b32.xlu1 %v3038_v31, %s2893_s11  ;;  %2462 = vmatpush.xpose.msk.msra.mxu2 %vm208_vm1, %v312_v32 }
 0x112   :  { %623 = vrot.lane.b32.xlu0 %v3032_v29, %s2893_s11  ;;  %2454 = vmatpush.xpose.msk.msrb.mxu0 %vm208_vm1, %v207_v33 }
 0x114   :  { %2463 = vmatmul.msk.f32.vlgmr.msra.gmra.mxu2 %vm208_vm1, %v2980_v21 }
 0x115   :  { %2455 = vmatmul.msk.f32.vlgmr.msrb.gmra.mxu0 %vm208_vm1, %v2958_v14 }
 0x118   :  { %v3050_v34 = vpop.permute.xlu1 %192  ;;  %v3052_v35 = vpop.permute.xlu2 %182 }
 0x119   :  { %v3054_v36 = vpop.permute.xlu0 %190 }
 0x120   :  { %v260_v37 = vpop.permute.xlu1 %259  ;;  %v3056_v38 = vpop.permute.xlu2 %168 }
 0x121   :  { %v3058_v39 = vpop.permute.xlu0 %176  ;;  %2458 = vmatpush.xpose.msk.msra.mxu3 %vm208_vm1, %v260_v37 }
 0x122   :  { %649 = vrot.lane.b32.xlu1 %v3058_v39, %s2893_s11 }
 0x124   :  { %2459 = vmatmul.msk.f32.vlgmr.msra.gmra.mxu3 %vm208_vm1, %v2974_v19 }
 0x128   :  { %v3065_v40 = vpop.permute.xlu1 %178  ;;  %v3067_v41 = vpop.permute.xlu2 %184 }
 0x129   :  { %v234_v42 = vpop.permute.xlu0 %233  ;;  %v2614_v3 = vpack.i.bf16 %v3032_v29, %v3065_v40 }
 0x12a   :  { %204 = vrot.lane.b32.xlu1 %v3022_v28, %s2894_s2  ;;  %2456 = vmatpush.xpose.msk.msra.mxu0 %vm208_vm1, %v234_v42 }
 0x12d   :  { %2457 = vmatmul.msk.f32.vlgmr.msra.gmra.mxu0 %vm208_vm1, %v2964_v16 }
 0x130   :  { %v3074_v43 = vpop.permute.xlu1 %194  ;;  %v3076_v44 = vpop.permute.xlu2 %170 }
 0x131   :  { %v163_v45 = vpop.permute.xlu0 %162  ;;  %v2629_v16 = vpack.i.bf16 %v3054_v36, %v3074_v43 }
 0x132   :  { %467 = vrot.lane.b32.xlu2 %v163_v45, %s2893_s11  ;;  %v2599_v60 = vpack.i.bf16 %v3034_v30, %v163_v45 }
 0x138   :  { %v3079_v46 = vpop.permute.xlu1 %164  ;;  %v3081_v47 = vpop.permute.xlu2 %202 }
 0x139   :  { %v286_v48 = vpop.permute.xlu0 %285  ;;  %493 = vrot.lane.b32.xlu0 %v3079_v46, %s2893_s11  ;;  %v2604_v14 = vpack.i.bf16 %v3038_v31, %v3079_v46 }
 0x13a   :  { %2460 = vmatpush.xpose.msk.msra.mxu1 %vm208_vm1, %v286_v48 }
 0x13d   :  { %2461 = vmatmul.msk.f32.vlgmr.msra.gmra.mxu1 %vm208_vm1, %v2996_v24 }
 0x140   :  { %v3088_v49 = vpop.permute.xlu1 %180  ;;  %v390_v50 = vpop.permute.xlu2 %389 }
 0x141   :  { %v3090_v51 = vpop.permute.xlu0 %166  ;;  %2468 = vmatpush.xpose.msk.msrb.mxu2 %vm208_vm1, %v390_v50  ;;  %198 = vrot.lane.b32.xlu0 %v2980_v21, %s2894_s2  ;;  %v2619_v5 = vpack.i.bf16 %v3058_v39, %v3088_v49 }
 0x142   :  { %519 = vrot.lane.b32.xlu2 %v3090_v51, %s2893_s11  ;;  %v2609_v17 = vpack.i.bf16 %v3090_v51, %v3076_v44 }
 0x144   :  { %2469 = vmatmul.msk.f32.vlgmr.msrb.gmra.mxu2 %vm208_vm1, %v3022_v28 }
 0x148   :  { %v3099_v52 = vpop.permute.xlu1 %186  ;;  %v3129_v56 = vpop.permute.xlu2 %188 }
 0x149   :  { %v338_v53 = vpop.permute.xlu0 %337  ;;  %727 = vrot.lane.b32.xlu0 %v3052_v35, %s2893_s11  ;;  %v2624_v18 = vpack.i.bf16 %v3052_v35, %v3099_v52  ;;  %v2644_v37 = vpack.i.bf16 %v3067_v41, %v3129_v56 }
 0x14a   :  { %545 = vrot.lane.b32.xlu2 %v3056_v38, %s2893_s11  ;;  %2464 = vmatpush.xpose.msk.msrb.mxu3 %vm208_vm1, %v338_v53 }
 0x14d   :  { %2465 = vmatmul.msk.f32.vlgmr.msrb.gmra.mxu3 %vm208_vm1, %v2994_v23 }
 0x150   :  { %v364_v54 = vpop.permute.xlu1 %363 }
 0x151   :  { %753 = vrot.lane.b32.xlu0 %v3067_v41, %s2893_s11  ;;  %2466 = vmatpush.xpose.msk.msrb.mxu1 %vm208_vm1, %v364_v54 }
 0x152   :  { %200 = vrot.lane.b32.xlu2 %v2994_v23, %s2894_s2 }
 0x154   :  { %2467 = vmatmul.msk.f32.vlgmr.msrb.gmra.mxu1 %vm208_vm1, %v3010_v26 }
 0x158   :  { %v3115_v55 = vpop.permute.xlu1 %172 }
 0x159   :  { %571 = vrot.lane.b32.xlu0 %v3076_v44, %s2893_s11  ;;  %597 = vrot.lane.b32.xlu1 %v3115_v55, %s2893_s11  ;;  %v2639_v28 = vpack.i.bf16 %v3056_v38, %v3115_v55 }
 0x15a   :  { %701 = vrot.lane.b32.xlu2 %v3088_v49, %s2893_s11 }
 0x160   :  { %v3137_v57 = vpop.permute.xlu1 %196 }
 0x161   :  { %779 = vrot.lane.b32.xlu0 %v3099_v52, %s2893_s11  ;;  %857 = vrot.lane.b32.xlu1 %v3050_v34, %s2893_s11  ;;  %v2634_v22 = vpack.i.bf16 %v3050_v34, %v3137_v57 }
 0x162   :  { %675 = vrot.lane.b32.xlu2 %v3065_v40, %s2893_s11 }
 0x169   :  { %831 = vrot.lane.b32.xlu0 %v3054_v36, %s2893_s11  ;;  %805 = vrot.lane.b32.xlu1 %v3129_v56, %s2893_s11 }
 0x16a   :  { %883 = vrot.lane.b32.xlu2 %v3074_v43, %s2893_s11 }
 0x171   :  { %909 = vrot.lane.b32.xlu1 %v3137_v57, %s2893_s11 }
 0x172   :  { %987 = vrot.lane.b32.xlu2 %v3081_v47, %s2893_s11 }
 0x179   :  { %2590 = vrot.lane.b32.xlu1 %v2589_v58, %s2895_s12 }
 0x17b   :  { %v416_v59 = vpop.permute.xlu0 %415 }
 0x17c   :  { %2470 = vmatpush.xpose.msk.msra.mxu3 %vm208_vm1, %v416_v59 }
 0x17f   :  { %2471 = vmatmul.msk.f32.vlgmr.msra.gmra.mxu3 %vm208_vm1, %v3034_v30 }
 0x181   :  { %2600 = vrot.lane.b32.xlu1 %v2599_v60, %s2895_s12 }
 0x183   :  { %v442_v61 = vpop.permute.xlu1 %441 }
 0x184   :  { %2472 = vmatpush.xpose.msk.msra.mxu1 %vm208_vm1, %v442_v61  ;;  %v624_v2 = vpop.permute.xlu0 %623 }
 0x187   :  { %2473 = vmatmul.msk.f32.vlgmr.msra.gmra.mxu1 %vm208_vm1, %v3038_v31 }
 0x18c   :  { %v468_v62 = vpop.permute.xlu2 %467 }
 0x18d   :  { %2474 = vmatpush.xpose.msk.msra.mxu2 %vm208_vm1, %v468_v62 }
 0x190   :  { %2475 = vmatmul.msk.f32.vlgmr.msra.gmra.mxu2 %vm208_vm1, %v163_v45 }
 0x194   :  { %v650_v63 = vpop.permute.xlu1 %649 }
 0x197   :  { %v3222_v23 = vpop.f32.mrf.mxu2 }
 0x19c   :  { %v3156_v0 = vpop.permute.xlu1 %204  ;;  %v520_v1 = vpop.permute.xlu2 %519 }
 0x19d   :  { %1013 = vrot.lane.b32.xlu1 %v3156_v0, %s2893_s11  ;;  %2478 = vmatpush.xpose.msk.msrb.mxu1 %vm208_vm1, %v520_v1 }
 0x1a0   :  { %2479 = vmatmul.msk.f32.vlgmr.msrb.gmra.mxu1 %vm208_vm1, %v3090_v51 }
 0x1a4   :  { %v546_v4 = vpop.permute.xlu2 %545 }
 0x1a5   :  { %2615 = vrot.lane.b32.xlu1 %v2614_v3, %s2895_s12  ;;  %2480 = vmatpush.xpose.msk.msrb.mxu2 %vm208_vm1, %v546_v4 }
 0x1a8   :  { %2481 = vmatmul.msk.f32.vlgmr.msrb.gmra.mxu2 %vm208_vm1, %v3056_v38 }
 0x1a9   :  { %2486 = vmatpush.xpose.msk.msra.mxu2 %vm208_vm1, %v624_v2 }
 0x1ab   :  { %v494_v6 = vpop.permute.xlu0 %493 }
 0x1ac   :  { %v3172_v7 = vpop.permute.xlu2 %200  ;;  %2476 = vmatpush.xpose.msk.msrb.mxu3 %vm208_vm1, %v494_v6 }
 0x1ad   :  { %2620 = vrot.lane.b32.xlu1 %v2619_v5, %s2895_s12  ;;  %961 = vrot.lane.b32.xlu2 %v3172_v7, %s2893_s11 }
 0x1af   :  { %2477 = vmatmul.msk.f32.vlgmr.msrb.gmra.mxu3 %vm208_vm1, %v3079_v46 }
 0x1b0   :  { %2487 = vmatmul.msk.f32.vlgmr.msra.gmra.mxu2 %vm208_vm1, %v3032_v29 }
 0x1b3   :  { %v3182_v8 = vpop.permute.xlu0 %198 }
 0x1b4   :  { %v702_v10 = vpop.permute.xlu2 %701  ;;  %935 = vrot.lane.b32.xlu0 %v3182_v8, %s2893_s11 }
 0x1b5   :  { %2580 = vrot.lane.b32.xlu2 %v2579_v9, %s2895_s12  ;;  %2492 = vmatpush.xpose.msk.msrb.mxu2 %vm208_vm1, %v702_v10 }
 0x1b8   :  { %2493 = vmatmul.msk.f32.vlgmr.msrb.gmra.mxu2 %vm208_vm1, %v3088_v49 }
 0x1ba   :  { %v3224_v24 = vpop.f32.mrf.mxu1 }
 0x1bb   :  { %v728_v12 = vpop.permute.xlu0 %727  ;;  %v1048_v27 = vsel %vm208_vm1, %v3224_v24, -inf }
 0x1bc   :  { %2585 = vrot.lane.b32.xlu0 %v2584_v11, %s2895_s12  ;;  %v676_v21 = vpop.permute.xlu2 %675 }
 0x1bd   :  { %2595 = vrot.lane.b32.xlu2 %v2594_v13, %s2895_s12 }
 0x1c3   :  { %v754_v15 = vpop.permute.xlu0 %753 }
 0x1c4   :  { %2605 = vrot.lane.b32.xlu0 %v2604_v14, %s2895_s12  ;;  %v884_v32 = vpop.permute.xlu2 %883 }
 0x1c5   :  { %2610 = vrot.lane.b32.xlu2 %v2609_v17, %s2895_s12 }
 0x1c7   :  { %v3239_v29 = vpop.f32.mrf.mxu2 }
 0x1c8   :  { %v1060_v33 = vsel %vm208_vm1, %v3239_v29, -inf }
 0x1cb   :  { %v598_v19 = vpop.permute.xlu1 %597  ;;  %v572_v20 = vpop.permute.xlu0 %571 }
 0x1cc   :  { %2484 = vmatpush.xpose.msk.msra.mxu1 %vm208_vm1, %v598_v19  ;;  %2630 = vrot.lane.b32.xlu0 %v2629_v16, %s2895_s12 }
 0x1cd   :  { %2625 = vrot.lane.b32.xlu2 %v2624_v18, %s2895_s12  ;;  %2482 = vmatpush.xpose.msk.msra.mxu3 %vm208_vm1, %v572_v20 }
 0x1cf   :  { %2485 = vmatmul.msk.f32.vlgmr.msra.gmra.mxu1 %vm208_vm1, %v3115_v55 }
 0x1d0   :  { %2490 = vmatpush.xpose.msk.msrb.mxu1 %vm208_vm1, %v676_v21  ;;  %2483 = vmatmul.msk.f32.vlgmr.msra.gmra.mxu3 %vm208_vm1, %v3076_v44 }
 0x1d1   :  { %2488 = vmatpush.xpose.msk.msrb.mxu3 %vm208_vm1, %v650_v63  ;;  %v3289_v50 = vpop.f32.mrf.mxu1 }
 0x1d2   :  { %v1057_v51 = vsel %vm208_vm1, %v3289_v50, -inf }
 0x1d3   :  { %v858_v25 = vpop.permute.xlu1 %857  ;;  %v780_v26 = vpop.permute.xlu0 %779 }
 0x1d4   :  { %2496 = vmatpush.xpose.msk.msra.mxu1 %vm208_vm1, %v754_v15  ;;  %2635 = vrot.lane.b32.xlu0 %v2634_v22, %s2895_s12 }
 0x1d5   :  { %2494 = vmatpush.xpose.msk.msra.mxu3 %vm208_vm1, %v728_v12  ;;  %2498 = vmatpush.xpose.msk.msra.mxu2 %vm208_vm1, %v780_v26 }
 0x1d7   :  { %1049 = vmax.xlane.f32.xlu1 %v1048_v27  ;;  %2491 = vmatmul.msk.f32.vlgmr.msrb.gmra.mxu1 %vm208_vm1, %v3065_v40 }
 0x1d8   :  { %2489 = vmatmul.msk.f32.vlgmr.msrb.gmra.mxu3 %vm208_vm1, %v3058_v39  ;;  %2499 = vmatmul.msk.f32.vlgmr.msra.gmra.mxu2 %vm208_vm1, %v3099_v52  ;;  %v3268_v39 = vpop.f32.mrf.mxu3 }
 0x1d9   :  { %2504 = vmatpush.xpose.msk.msrb.mxu2 %vm208_vm1, %v858_v25  ;;  %v1045_v44 = vsel %vm208_vm1, %v3268_v39, -inf }
 0x1db   :  { %v806_v30 = vpop.permute.xlu1 %805  ;;  %v832_v31 = vpop.permute.xlu0 %831 }
 0x1dc   :  { %2640 = vrot.lane.b32.xlu0 %v2639_v28, %s2895_s12  ;;  %2502 = vmatpush.xpose.msk.msrb.mxu1 %vm208_vm1, %v832_v31 }
 0x1dd   :  { %2500 = vmatpush.xpose.msk.msrb.mxu3 %vm208_vm1, %v806_v30 }
 0x1df   :  { %1061 = vmax.xlane.f32.xlu1 %v1060_v33  ;;  %2497 = vmatmul.msk.f32.vlgmr.msra.gmra.mxu1 %vm208_vm1, %v3067_v41 }
 0x1e0   :  { %2495 = vmatmul.msk.f32.vlgmr.msra.gmra.mxu3 %vm208_vm1, %v3052_v35  ;;  %2505 = vmatmul.msk.f32.vlgmr.msrb.gmra.mxu2 %vm208_vm1, %v3050_v34  ;;  %v988_v35 = vpop.permute.xlu2 %987  ;;  %v3264_v34 = vpop.f32.mrf.mxu0 }
 0x1e1   :  { %2506 = vmatpush.xpose.msk.msra.mxu3 %vm208_vm1, %v884_v32  ;;  %v3276_v41 = vpop.f32.mrf.mxu3  ;;  %v1039_v52 = vsel %vm208_vm1, %v3264_v34, -inf }
 0x1e2   :  { %v1054_v46 = vsel %vm208_vm1, %v3276_v41, -inf }
 0x1e3   :  { %v910_v38 = vpop.permute.xlu1 %909 }
 0x1e4   :  { %2508 = vmatpush.xpose.msk.msrb.mxu0 %vm208_vm1, %v910_v38  ;;  %2645 = vrot.lane.b32.xlu0 %v2644_v37, %s2895_s12 }
 0x1e7   :  { %2503 = vmatmul.msk.f32.vlgmr.msrb.gmra.mxu1 %vm208_vm1, %v3054_v36  ;;  %2509 = vmatmul.msk.f32.vlgmr.msrb.gmra.mxu0 %vm208_vm1, %v3137_v57  ;;  %v1051_v57 = vsel %vm208_vm1, %v3222_v23, -inf }
 0x1e8   :  { %2501 = vmatmul.msk.f32.vlgmr.msrb.gmra.mxu3 %vm208_vm1, %v3129_v56  ;;  %v3270_v40 = vpop.f32.mrf.mxu0 }
 0x1e9   :  { %2514 = vmatpush.xpose.msk.msrb.mxu3 %vm208_vm1, %v988_v35  ;;  %v1042_v36 = vsel %vm208_vm1, %v3270_v40, -inf }
 0x1eb   :  { %v2591_v42 = vpop.permute.xlu1 %2590 }
 0x1ec   :  { %v2592_v56 = vunpack.i.l.bf16 %v2591_v42  ;;  %v2593_v62 = vunpack.i.h.bf16 %v2591_v42 }
 0x1f0   :  { %2507 = vmatmul.msk.f32.vlgmr.msra.gmra.mxu3 %vm208_vm1, %v3074_v43 }
 0x1f3   :  { %v3286_v48 = vpop.permute.xlu1 %2600 }
 0x1f6   :  { %1043 = vmax.xlane.f32.xlu2 %v1042_v36 }
 0x1f8   :  { %2515 = vmatmul.msk.f32.vlgmr.msrb.gmra.mxu3 %vm208_vm1, %v3081_v47 }
 0x1fe   :  { %1046 = vmax.xlane.f32.xlu2 %v1045_v44 }
 0x202   :  { %v3280_v45 = vpop.f32.mrf.mxu3 }
 0x203   :  { %v1063_v43 = vsel %vm208_vm1, %v3280_v45, -inf }
 0x204   :  { %1064 = vmax.xlane.f32.xlu1 %v1063_v43  ;;  %v3302_v58 = vpop.f32.mrf.mxu1 }
 0x205   :  { %v1066_v59 = vsel %vm208_vm1, %v3302_v58, -inf }
 0x206   :  { %1055 = vmax.xlane.f32.xlu2 %v1054_v46 }
 0x207   :  { %v962_v49 = vpop.permute.xlu2 %961 }
 0x208   :  { %2512 = vmatpush.xpose.msk.msra.mxu2 %vm208_vm1, %v962_v49 }
 0x20b   :  { %2513 = vmatmul.msk.f32.vlgmr.msra.gmra.mxu2 %vm208_vm1, %v3172_v7 }
 0x20e   :  { %1058 = vmax.xlane.f32.xlu2 %v1057_v51  ;;  %1040 = vmax.xlane.f32.xlu0 %v1039_v52 }
 0x20f   :  { %v1014_v53 = vpop.permute.xlu1 %1013  ;;  %v2581_v54 = vpop.permute.xlu2 %2580 }
 0x210   :  { %v2582_v55 = vunpack.i.l.bf16 %v2581_v54  ;;  %2516 = vmatpush.xpose.msk.msra.mxu0 %vm208_vm1, %v1014_v53  ;;  %v2583_v60 = vunpack.i.h.bf16 %v2581_v54 }
 0x212   :  { %1464 = vmatpush.msra.mxu3 %v2582_v55 }
 0x213   :  { %2517 = vmatmul.msk.f32.vlgmr.msra.gmra.mxu0 %vm208_vm1, %v3156_v0  ;;  %v3337_v30 = vpop.f32.mrf.mxu2 }
 0x214   :  { %1568 = vmatpush.msrb.mxu3 %v2592_v56 }
 0x216   :  { %1052 = vmax.xlane.f32.xlu0 %v1051_v57 }
 0x217   :  { %v2596_v63 = vpop.permute.xlu2 %2595  ;;  %v3323_v15 = vpop.permute.xlu1 %2615 }
 0x218   :  { %v2598_v4 = vunpack.i.h.bf16 %v2596_v63  ;;  %v2597_v5 = vunpack.i.l.bf16 %v2596_v63 }
 0x21d   :  { %v3313_v10 = vpop.f32.mrf.mxu1 }
 0x21e   :  { %1067 = vmax.xlane.f32.xlu0 %v1066_v59  ;;  %v1075_v11 = vsel %vm208_vm1, %v3313_v10, -inf }
 0x21f   :  { %v3319_v13 = vpop.permute.xlu2 %2610  ;;  %v3329_v18 = vpop.permute.xlu1 %2620 }
 0x226   :  { %v936_v61 = vpop.permute.xlu0 %935 }
 0x227   :  { %2510 = vmatpush.xpose.msk.msra.mxu1 %vm208_vm1, %v936_v61  ;;  %v3325_v17 = vpop.permute.xlu2 %2625 }
 0x22a   :  { %2511 = vmatmul.msk.f32.vlgmr.msra.gmra.mxu1 %vm208_vm1, %v3182_v8 }
 0x22b   :  { %1412 = vmatpush.msrb.mxu1 %v2583_v60 }
 0x22d   :  { %1516 = vmatpush.msra.mxu1 %v2593_v62 }
 0x22e   :  { %v2586_v1 = vpop.permute.xlu0 %2585 }
 0x22f   :  { %v2588_v2 = vunpack.i.h.bf16 %v2586_v1  ;;  %v2587_v3 = vunpack.i.l.bf16 %v2586_v1 }
 0x231   :  { %1438 = vmatpush.msrb.mxu2 %v2588_v2  ;;  %1490 = vmatpush.msrb.mxu0 %v2587_v3 }
 0x232   :  { %v3309_v6 = vpop.f32.mrf.mxu3 }
 0x233   :  { %1542 = vmatpush.msra.mxu2 %v2598_v4  ;;  %1594 = vmatpush.msra.mxu0 %v2597_v5  ;;  %v1072_v9 = vsel %vm208_vm1, %v3309_v6, -inf }
 0x234   :  { %1073 = vmax.xlane.f32.xlu2 %v1072_v9 }
 0x236   :  { %v3317_v12 = vpop.permute.xlu0 %2605 }
 0x23c   :  { %1076 = vmax.xlane.f32.xlu2 %v1075_v11 }
 0x23e   :  { %v3321_v14 = vpop.permute.xlu0 %2630 }
 0x246   :  { %v3327_v16 = vpop.permute.xlu0 %2635 }
 0x24a   :  { %v1050_v25 = vpop.xlane.xlu1 %1049 }
 0x24b   :  { %v1138_v31 = vsub.f32 %v3224_v24, %v1050_v25  ;;  %v1069_v24 = vsel %vm208_vm1, %v3337_v30, -inf }
 0x24c   :  { %v3363_v53 = vpop.f32.mrf.mxu1 }
 0x24d   :  { %v1173_v37 = vmul.f32 1.442695, %v1138_v31 }
 0x24e   :  { %v3332_v22 = vpop.permute.xlu0 %2640 }
 0x254   :  { %v3376_v62 = vpop.f32.mrf.mxu1 }
 0x255   :  { %v1093_v1 = vsel %vm208_vm1, %v3376_v62, -inf }
 0x256   :  { %v3342_v38 = vpop.permute.xlu0 %2645 }
 0x264   :  { %v3378_v63 = vpop.f32.mrf.mxu0 }
 0x265   :  { %v1120_v3 = vsel %vm208_vm1, %v3378_v63, -inf }
 0x269   :  { %v1044_v19 = vpop.xlane.xlu2 %1043 }
 0x26a   :  { %v1136_v20 = vsub.f32 %v3270_v40, %v1044_v19  ;;  %v3346_v40 = vpop.f32.mrf.mxu2 }
 0x26c   :  { %v1169_v21 = vmul.f32 1.442695, %v1136_v20 }
 0x26e   :  { %2656 = vpow2.f32 %v1169_v21  ;;  %v1078_v21 = vsel %vm208_vm1, %v3346_v40, -inf }
 0x271   :  { %v1047_v26 = vpop.xlane.xlu2 %1046 }
 0x272   :  { %v1137_v27 = vsub.f32 %v3268_v39, %v1047_v26  ;;  %v3348_v39 = vpop.f32.mrf.mxu3  ;;  %v3359_v51 = vpop.f32.mrf.mxu2 }
 0x273   :  { %v1087_v20 = vsel %vm208_vm1, %v3359_v51, -inf }
 0x274   :  { %v3335_v28 = vpop.eup %2656  ;;  %v1171_v32 = vmul.f32 1.442695, %v1137_v27 }
 0x275   :  { %v1234_v33 = vsel %vm208_vm1, %v3335_v28, 0.0 }
 0x276   :  { %2658 = vpow2.f32 %v1171_v32  ;;  %1235 = vadd.xlane.f32.xlu0 %v1234_v33  ;;  %v1084_v32 = vsel %vm208_vm1, %v3363_v53, -inf  ;;  %v1081_v33 = vsel %vm208_vm1, %v3348_v39, -inf }
 0x277   :  { %2660 = vpow2.f32 %v1173_v37 }
 0x279   :  { %v1056_v5 = vpop.xlane.xlu2 %1055 }
 0x27a   :  { %v3361_v52 = vpop.f32.mrf.mxu3  ;;  %v3372_v60 = vpop.f32.mrf.mxu2  ;;  %v1140_v11 = vsub.f32 %v3276_v41, %v1056_v5 }
 0x27c   :  { %v3344_v35 = vpop.eup %2658  ;;  %v1177_v25 = vmul.f32 1.442695, %v1140_v11 }
 0x27d   :  { %v1237_v36 = vsel %vm208_vm1, %v3344_v35, 0.0  ;;  %v3354_v44 = vpop.eup %2660 }
 0x27e   :  { %1238 = vadd.xlane.f32.xlu2 %v1237_v36  ;;  %1070 = vmax.xlane.f32.xlu0 %v1069_v24  ;;  %v1240_v49 = vsel %vm208_vm1, %v3354_v44, 0.0 }
 0x281   :  { %v1041_v42 = vpop.xlane.xlu0 %1040  ;;  %v1059_v27 = vpop.xlane.xlu2 %1058 }
 0x282   :  { %v1135_v43 = vsub.f32 %v3264_v34, %v1041_v42  ;;  %v1090_v34 = vsel %vm208_vm1, %v3361_v52, -inf  ;;  %v3374_v61 = vpop.f32.mrf.mxu3  ;;  %v3388_v4 = vpop.f32.mrf.mxu2  ;;  %v1141_v31 = vsub.f32 %v3289_v50, %v1059_v27 }
 0x283   :  { %v1099_v5 = vsel %vm208_vm1, %v3374_v61, -inf }
 0x284   :  { %v1167_v46 = vmul.f32 1.442695, %v1135_v43  ;;  %v1179_v37 = vmul.f32 1.442695, %v1141_v31 }
 0x286   :  { %1241 = vadd.xlane.f32.xlu2 %v1240_v49  ;;  %2662 = vpow2.f32 %v1167_v46  ;;  %v1105_v46 = vsel %vm208_vm1, %v3388_v4, -inf }
 0x289   :  { %v1053_v54 = vpop.xlane.xlu0 %1052 }
 0x28a   :  { %v1139_v55 = vsub.f32 %v3222_v23, %v1053_v54  ;;  %v3390_v9 = vpop.f32.mrf.mxu3  ;;  %v3399_v26 = vpop.f32.mrf.mxu2 }
 0x28b   :  { %v1108_v19 = vsel %vm208_vm1, %v3390_v9, -inf  ;;  %v1114_v41 = vsel %vm208_vm1, %v3399_v26, -inf  ;;  %v3422_v54 = vpop.f32.mrf.mxu1 }
 0x28c   :  { %v1175_v56 = vmul.f32 1.442695, %v1139_v55  ;;  %v3366_v57 = vpop.eup %2662  ;;  %v1062_v55 = vpop.xlane.xlu1 %1061 }
 0x28d   :  { %v1231_v59 = vsel %vm208_vm1, %v3366_v57, 0.0 }
 0x28e   :  { %2664 = vpow2.f32 %v1175_v56  ;;  %1091 = vmax.xlane.f32.xlu2 %v1090_v34  ;;  %1232 = vadd.xlane.f32.xlu1 %v1231_v59  ;;  %v1142_v56 = vsub.f32 %v3239_v29, %v1062_v55  ;;  %v1102_v34 = vsel %vm208_vm1, %v3422_v54, -inf  ;;  %v1096_v59 = vsel %vm208_vm1, %v3372_v60, -inf }
 0x28f   :  { %2666 = vpow2.f32 %v1177_v25 }
 0x290   :  { %v3408_v36 = vpop.f32.mrf.mxu0  ;;  %2668 = vpow2.f32 %v1179_v37 }
 0x291   :  { %v1132_v50 = vsel %vm208_vm1, %v3408_v36, -inf  ;;  %v1068_v11 = vpop.xlane.xlu0 %1067 }
 0x292   :  { %v3435_v29 = vpop.f32.mrf.mxu3 }
 0x294   :  { %v3380_v23 = vpop.eup %2664 }
 0x295   :  { %v1243_v2 = vsel %vm208_vm1, %v3380_v23, 0.0  ;;  %v3410_v24 = vpop.eup %2666 }
 0x296   :  { %1094 = vmax.xlane.f32.xlu2 %v1093_v1  ;;  %1244 = vadd.xlane.f32.xlu0 %v1243_v2  ;;  %v1246_v42 = vsel %vm208_vm1, %v3410_v24, 0.0  ;;  %v3416_v43 = vpop.eup %2668  ;;  %v1181_v1 = vmul.f32 1.442695, %v1142_v56  ;;  %v3429_v2 = vpop.f32.mrf.mxu1 }
 0x297   :  { %1121 = vmax.xlane.f32.xlu1 %v1120_v3  ;;  %v1249_v49 = vsel %vm208_vm1, %v3416_v43, 0.0  ;;  %v1111_v3 = vsel %vm208_vm1, %v3429_v2, -inf }
 0x298   :  { %2670 = vpow2.f32 %v1181_v1 }
 0x29e   :  { %1109 = vmax.xlane.f32.xlu2 %v1108_v19  ;;  %1088 = vmax.xlane.f32.xlu0 %v1087_v20  ;;  %v3439_v20 = vpop.eup %2670 }
 0x29f   :  { %1079 = vmax.xlane.f32.xlu1 %v1078_v21  ;;  %v1144_v21 = vsub.f32 %v3302_v58, %v1068_v11  ;;  %v1252_v27 = vsel %vm208_vm1, %v3439_v20, 0.0  ;;  %v1117_v58 = vsel %vm208_vm1, %v3435_v29, -inf }
 0x2a1   :  { %v1185_v31 = vmul.f32 1.442695, %v1144_v21 }
 0x2a3   :  { %2672 = vpow2.f32 %v1185_v31 }
 0x2a6   :  { %1115 = vmax.xlane.f32.xlu2 %v1114_v41  ;;  %1085 = vmax.xlane.f32.xlu0 %v1084_v32  ;;  %v1065_v41 = vpop.xlane.xlu1 %1064  ;;  %v3446_v32 = vpop.f32.mrf.mxu3 }
 0x2a7   :  { %1082 = vmax.xlane.f32.xlu1 %v1081_v33  ;;  %v3437_v19 = vpop.f32.mrf.mxu1  ;;  %v1143_v33 = vsub.f32 %v3280_v45, %v1065_v41  ;;  %v1129_v37 = vsel %vm208_vm1, %v3446_v32, -inf  ;;  %v1074_v55 = vpop.xlane.xlu2 %1073 }
 0x2a8   :  { %v1123_v25 = vsel %vm208_vm1, %v3437_v19, -inf  ;;  %v1146_v31 = vsub.f32 %v3309_v6, %v1074_v55 }
 0x2ae   :  { %1133 = vmax.xlane.f32.xlu0 %v1132_v50  ;;  %v1183_v50 = vmul.f32 1.442695, %v1143_v33 }
 0x2af   :  { %1247 = vadd.xlane.f32.xlu1 %v1246_v42  ;;  %v3453_v42 = vpop.eup %2672 }
 0x2b0   :  { %2674 = vpow2.f32 %v1183_v50 }
 0x2b6   :  { %1106 = vmax.xlane.f32.xlu0 %v1105_v46  ;;  %v3455_v46 = vpop.f32.mrf.mxu2  ;;  %v3461_v56 = vpop.eup %2674 }
 0x2b7   :  { %1250 = vadd.xlane.f32.xlu1 %v1249_v49  ;;  %v1258_v49 = vsel %vm208_vm1, %v3453_v42, 0.0  ;;  %v1126_v45 = vsel %vm208_vm1, %v3455_v46, -inf }
 0x2be   :  { %1103 = vmax.xlane.f32.xlu0 %v1102_v34  ;;  %v1255_v34 = vsel %vm208_vm1, %v3461_v56, 0.0 }
 0x2bf   :  { %1097 = vmax.xlane.f32.xlu1 %v1096_v59  ;;  %v1077_v59 = vpop.xlane.xlu2 %1076 }
 0x2c6   :  { %1112 = vmax.xlane.f32.xlu0 %v1111_v3 }
 0x2c7   :  { %1100 = vmax.xlane.f32.xlu1 %v1099_v5 }
 0x2ce   :  { %1124 = vmax.xlane.f32.xlu0 %v1123_v25  ;;  %v2608_v25 = vunpack.i.h.bf16 %v3317_v12 }
 0x2cf   :  { %1253 = vadd.xlane.f32.xlu1 %v1252_v27 }
 0x2d6   :  { %1130 = vmax.xlane.f32.xlu0 %v1129_v37  ;;  %v1189_v37 = vmul.f32 1.442695, %v1146_v31 }
 0x2d7   :  { %1118 = vmax.xlane.f32.xlu1 %v1117_v58 }
 0x2de   :  { %1259 = vadd.xlane.f32.xlu0 %v1258_v49 }
 0x2df   :  { %1127 = vmax.xlane.f32.xlu1 %v1126_v45 }
 0x2e7   :  { %1256 = vadd.xlane.f32.xlu1 %v1255_v34 }
 0x2e9   :  { %v1236_v1 = vpop.xlane.xlu0 %1235 }
 0x2ea   :  { %2676 = vrcp.f32 %v1236_v1 }
 0x2f0   :  { %v2677_v3 = vpop.eup %2676 }
 0x2f1   :  { %v1360_v5 = vmul.f32 %v2677_v3, %v3335_v28  ;;  %v1239_v11 = vpop.xlane.xlu2 %1238  ;;  %v1071_v21 = vpop.xlane.xlu0 %1070  ;;  %v2602_v28 = vunpack.i.l.bf16 %v3286_v48 }
 0x2f2   :  { %2678 = vrcp.f32 %v1239_v11  ;;  %v1145_v27 = vsub.f32 %v3337_v30, %v1071_v21 }
 0x2f3   :  { %2519 = vmatmul.msk.f32.vlgmr.msrb.gmra.mxu2 %vm208_vm1, %v1360_v5 }
 0x2f4   :  { %v1187_v41 = vmul.f32 1.442695, %v1145_v27  ;;  %1646 = vmatpush.msrb.mxu2 %v2608_v25 }
 0x2f6   :  { %2680 = vpow2.f32 %v1187_v41 }
 0x2f8   :  { %v2679_v33 = vpop.eup %2678 }
 0x2f9   :  { %v1361_v58 = vmul.f32 %v2679_v33, %v3344_v35  ;;  %v1242_v50 = vpop.xlane.xlu2 %1241  ;;  %v2607_v35 = vunpack.i.l.bf16 %v3317_v12  ;;  %v1147_v12 = vsub.f32 %v3313_v10, %v1077_v59 }
 0x2fa   :  { %2682 = vrcp.f32 %v1242_v50  ;;  %v2613_v50 = vunpack.i.h.bf16 %v3319_v13 }
 0x2fb   :  { %2520 = vmatmul.msk.f32.vlgmr.msra.gmra.mxu3 %vm208_vm1, %v1361_v58  ;;  %2684 = vpow2.f32 %v1189_v37  ;;  %v1191_v33 = vmul.f32 1.442695, %v1147_v12 }
 0x2fc   :  { %v3473_v49 = vpop.eup %2680  ;;  %1672 = vmatpush.msra.mxu3 %v2602_v28 }
 0x2fd   :  { %v1261_v6 = vsel %vm208_vm1, %v3473_v49, 0.0 }
 0x2fe   :  { %1262 = vadd.xlane.f32.xlu2 %v1261_v6 }
 0x300   :  { %v2683_v30 = vpop.eup %2682 }
 0x301   :  { %v1362_v45 = vmul.f32 %v2683_v30, %v3354_v44  ;;  %v3478_v55 = vpop.eup %2684  ;;  %v1233_v34 = vpop.xlane.xlu1 %1232  ;;  %v2603_v44 = vunpack.i.h.bf16 %v3286_v48 }
 0x302   :  { %2686 = vrcp.f32 %v1233_v34  ;;  %v1264_v1 = vsel %vm208_vm1, %v3478_v55, 0.0  ;;  %v1092_v41 = vpop.xlane.xlu2 %1091 }
 0x303   :  { %2521 = vmatmul.msk.f32.vlgmr.msrb.gmra.mxu0 %vm208_vm1, %v1362_v45 }
 0x304   :  { %1698 = vmatpush.msrb.mxu0 %v2607_v35 }
 0x306   :  { %1265 = vadd.xlane.f32.xlu2 %v1264_v1  ;;  %v1152_v1 = vsub.f32 %v3361_v52, %v1092_v41 }
 0x308   :  { %v2687_v3 = vpop.eup %2686 }
 0x309   :  { %v1245_v5 = vpop.xlane.xlu0 %1244  ;;  %v1359_v11 = vmul.f32 %v2687_v3, %v3366_v57 }
 0x30a   :  { %v1122_v21 = vpop.xlane.xlu1 %1121  ;;  %2688 = vrcp.f32 %v1245_v5  ;;  %v1095_v30 = vpop.xlane.xlu2 %1094 }
 0x30b   :  { %v1162_v25 = vsub.f32 %v3378_v63, %v1122_v21  ;;  %2518 = vmatmul.msk.f32.vlgmr.msrb.gmra.mxu1 %vm208_vm1, %v1359_v11  ;;  %v1153_v5 = vsub.f32 %v3376_v62, %v1095_v30 }
 0x30c   :  { %1620 = vmatpush.msrb.mxu1 %v2603_v44 }
 0x30d   :  { %v1221_v27 = vmul.f32 1.442695, %v1162_v25 }
 0x30f   :  { %2690 = vpow2.f32 %v1221_v27 }
 0x310   :  { %v2689_v31 = vpop.eup %2688  ;;  %2692 = vpow2.f32 %v1191_v33 }
 0x311   :  { %v1363_v37 = vmul.f32 %v2689_v31, %v3380_v23  ;;  %v1089_v58 = vpop.xlane.xlu0 %1088 }
 0x312   :  { %v1080_v57 = vpop.xlane.xlu1 %1079  ;;  %v1151_v59 = vsub.f32 %v3359_v51, %v1089_v58 }
 0x313   :  { %v1148_v48 = vsub.f32 %v3346_v40, %v1080_v57  ;;  %2522 = vmatmul.msk.f32.vlgmr.msra.gmra.mxu1 %vm208_vm1, %v1363_v37 }
 0x314   :  { %1724 = vmatpush.msra.mxu1 %v2613_v50  ;;  %v1199_v23 = vmul.f32 1.442695, %v1151_v59 }
 0x315   :  { %v3493_v63 = vpop.eup %2690  ;;  %v1193_v10 = vmul.f32 1.442695, %v1148_v48 }
 0x316   :  { %v1312_v28 = vsel %vm208_vm1, %v3493_v63, 0.0  ;;  %v3499_v35 = vpop.eup %2692 }
 0x317   :  { %2694 = vpow2.f32 %v1193_v10  ;;  %1313 = vadd.xlane.f32.xlu0 %v1312_v28  ;;  %v1267_v44 = vsel %vm208_vm1, %v3499_v35, 0.0  ;;  %v2643_v28 = vunpack.i.h.bf16 %v3332_v22 }
 0x318   :  { %2696 = vpow2.f32 %v1199_v23 }
 0x319   :  { %v1086_v6 = vpop.xlane.xlu0 %1085 }
 0x31a   :  { %v1083_v45 = vpop.xlane.xlu1 %1082  ;;  %v1150_v40 = vsub.f32 %v3363_v53, %v1086_v6  ;;  %v1201_v53 = vmul.f32 1.442695, %v1152_v1 }
 0x31b   :  { %v1149_v34 = vsub.f32 %v3348_v39, %v1083_v45  ;;  %v1203_v39 = vmul.f32 1.442695, %v1153_v5 }
 0x31c   :  { %v1197_v3 = vmul.f32 1.442695, %v1150_v40 }
 0x31d   :  { %v3503_v51 = vpop.eup %2694  ;;  %v1195_v11 = vmul.f32 1.442695, %v1149_v34  ;;  %v2612_v34 = vunpack.i.l.bf16 %v3319_v13 }
 0x31e   :  { %v1270_v21 = vsel %vm208_vm1, %v3503_v51, 0.0  ;;  %v3512_v12 = vpop.eup %2696 }
 0x31f   :  { %2698 = vpow2.f32 %v1195_v11  ;;  %1271 = vadd.xlane.f32.xlu1 %v1270_v21  ;;  %1268 = vadd.xlane.f32.xlu0 %v1267_v44  ;;  %v1279_v41 = vsel %vm208_vm1, %v3512_v12, 0.0  ;;  %v1110_v44 = vpop.xlane.xlu2 %1109 }
 0x320   :  { %2700 = vpow2.f32 %v1197_v3 }
 0x321   :  { %v3510_v52 = vpop.xlane.xlu0 %1133 }
 0x322   :  { %v1248_v25 = vpop.xlane.xlu1 %1247 }
 0x323   :  { %2702 = vrcp.f32 %v1248_v25 }
 0x324   :  { %2704 = vpow2.f32 %v1201_v53 }
 0x325   :  { %v3514_v62 = vpop.eup %2698  ;;  %2706 = vpow2.f32 %v1203_v39 }
 0x326   :  { %v3516_v27 = vpop.eup %2700  ;;  %v1273_v31 = vsel %vm208_vm1, %v3514_v62, 0.0 }
 0x327   :  { %1274 = vadd.xlane.f32.xlu0 %v1273_v31  ;;  %1280 = vadd.xlane.f32.xlu1 %v1279_v41  ;;  %v1276_v33 = vsel %vm208_vm1, %v3516_v27, 0.0 }
 0x328   :  { %1277 = vadd.xlane.f32.xlu2 %v1276_v33 }
 0x329   :  { %v2703_v37 = vpop.eup %2702  ;;  %v1107_v58 = vpop.xlane.xlu0 %1106 }
 0x32a   :  { %v3524_v57 = vpop.eup %2704  ;;  %v1364_v50 = vmul.f32 %v2703_v37, %v3410_v24  ;;  %v1251_v48 = vpop.xlane.xlu1 %1250  ;;  %v1157_v10 = vsub.f32 %v3388_v4, %v1107_v58 }
 0x32b   :  { %v3528_v59 = vpop.eup %2706  ;;  %2708 = vrcp.f32 %v1251_v48  ;;  %v1282_v30 = vsel %vm208_vm1, %v3524_v57, 0.0 }
 0x32c   :  { %v1211_v23 = vmul.f32 1.442695, %v1157_v10  ;;  %2523 = vmatmul.msk.f32.vlgmr.msra.gmra.mxu2 %vm208_vm1, %v1364_v50  ;;  %v1285_v6 = vsel %vm208_vm1, %v3528_v59, 0.0  ;;  %v1116_v50 = vpop.xlane.xlu2 %1115 }
 0x32d   :  { %1750 = vmatpush.msra.mxu2 %v2643_v28 }
 0x32e   :  { %2710 = vpow2.f32 %v1211_v23 }
 0x32f   :  { %1286 = vadd.xlane.f32.xlu0 %v1285_v6  ;;  %1283 = vadd.xlane.f32.xlu1 %v1282_v30 }
 0x331   :  { %v2709_v24 = vpop.eup %2708  ;;  %v1104_v4 = vpop.xlane.xlu0 %1103 }
 0x332   :  { %v1365_v45 = vmul.f32 %v2709_v24, %v3416_v43  ;;  %v1098_v40 = vpop.xlane.xlu1 %1097  ;;  %v1156_v11 = vsub.f32 %v3422_v54, %v1104_v4 }
 0x333   :  { %v1154_v1 = vsub.f32 %v3372_v60, %v1098_v40  ;;  %v1158_v60 = vsub.f32 %v3390_v9, %v1110_v44  ;;  %v1160_v9 = vsub.f32 %v3399_v26, %v1116_v50  ;;  %v2642_v26 = vunpack.i.l.bf16 %v3332_v22 }
 0x334   :  { %v3539_v3 = vpop.eup %2710  ;;  %2524 = vmatmul.msk.f32.vlgmr.msrb.gmra.mxu3 %vm208_vm1, %v1365_v45  ;;  %v1209_v43 = vmul.f32 1.442695, %v1156_v11 }
 0x335   :  { %v1205_v5 = vmul.f32 1.442695, %v1154_v1  ;;  %1776 = vmatpush.msrb.mxu3 %v2612_v34  ;;  %v1297_v21 = vsel %vm208_vm1, %v3539_v3, 0.0  ;;  %v1213_v33 = vmul.f32 1.442695, %v1158_v60 }
 0x336   :  { %v1217_v6 = vmul.f32 1.442695, %v1160_v9 }
 0x337   :  { %2712 = vpow2.f32 %v1205_v5  ;;  %1298 = vadd.xlane.f32.xlu1 %v1297_v21 }
 0x338   :  { %2714 = vpow2.f32 %v1209_v43 }
 0x339   :  { %v1113_v53 = vpop.xlane.xlu0 %1112 }
 0x33a   :  { %v1101_v39 = vpop.xlane.xlu1 %1100  ;;  %v1159_v54 = vsub.f32 %v3429_v2, %v1113_v53 }
 0x33b   :  { %v1155_v13 = vsub.f32 %v3374_v61, %v1101_v39 }
 0x33c   :  { %v1215_v37 = vmul.f32 1.442695, %v1159_v54  ;;  %v2623_v54 = vunpack.i.h.bf16 %v3329_v18 }
 0x33d   :  { %v3547_v25 = vpop.eup %2712  ;;  %v1207_v31 = vmul.f32 1.442695, %v1155_v13 }
 0x33e   :  { %v1288_v41 = vsel %vm208_vm1, %v3547_v25, 0.0  ;;  %v3552_v10 = vpop.eup %2714 }
 0x33f   :  { %2716 = vpow2.f32 %v1207_v31  ;;  %1289 = vadd.xlane.f32.xlu2 %v1288_v41  ;;  %v1294_v28 = vsel %vm208_vm1, %v3552_v10, 0.0 }
 0x341   :  { %v1125_v58 = vpop.xlane.xlu0 %1124 }
 0x342   :  { %v1254_v48 = vpop.xlane.xlu1 %1253  ;;  %v1163_v1 = vsub.f32 %v3437_v19, %v1125_v58 }
 0x343   :  { %2718 = vrcp.f32 %v1254_v48 }
 0x344   :  { %2720 = vpow2.f32 %v1213_v33  ;;  %v1223_v21 = vmul.f32 1.442695, %v1163_v1 }
 0x345   :  { %v3554_v61 = vpop.eup %2716  ;;  %2722 = vpow2.f32 %v1215_v37 }
 0x346   :  { %v1291_v2 = vsel %vm208_vm1, %v3554_v61, 0.0  ;;  %2724 = vpow2.f32 %v1217_v6 }
 0x347   :  { %1292 = vadd.xlane.f32.xlu0 %v1291_v2  ;;  %1295 = vadd.xlane.f32.xlu2 %v1294_v28  ;;  %v2618_v2 = vunpack.i.h.bf16 %v3323_v15 }
 0x349   :  { %v2719_v23 = vpop.eup %2718  ;;  %v1131_v30 = vpop.xlane.xlu0 %1130 }
 0x34a   :  { %v3561_v24 = vpop.eup %2720  ;;  %v1366_v4 = vmul.f32 %v2719_v23, %v3439_v20  ;;  %v1119_v45 = vpop.xlane.xlu1 %1118  ;;  %v1165_v19 = vsub.f32 %v3446_v32, %v1131_v30 }
 0x34b   :  { %v3564_v40 = vpop.eup %2722  ;;  %v1161_v34 = vsub.f32 %v3435_v29, %v1119_v45  ;;  %v1300_v11 = vsel %vm208_vm1, %v3561_v24, 0.0 }
 0x34c   :  { %2525 = vmatmul.msk.f32.vlgmr.msra.gmra.mxu0 %vm208_vm1, %v1366_v4  ;;  %v1303_v20 = vsel %vm208_vm1, %v3564_v40, 0.0  ;;  %v3574_v29 = vpop.eup %2724  ;;  %v1227_v60 = vmul.f32 1.442695, %v1165_v19  ;;  %v2617_v4 = vunpack.i.l.bf16 %v3323_v15 }
 0x34d   :  { %v1219_v5 = vmul.f32 1.442695, %v1161_v34  ;;  %1802 = vmatpush.msra.mxu0 %v2642_v26  ;;  %v1306_v39 = vsel %vm208_vm1, %v3574_v29, 0.0  ;;  %v2622_v26 = vunpack.i.l.bf16 %v3329_v18 }
 0x34f   :  { %2726 = vpow2.f32 %v1219_v5  ;;  %1301 = vadd.xlane.f32.xlu2 %v1300_v11  ;;  %1304 = vadd.xlane.f32.xlu0 %v1303_v20 }
 0x351   :  { %v1260_v22 = vpop.xlane.xlu0 %1259 }
 0x352   :  { %v1128_v44 = vpop.xlane.xlu1 %1127  ;;  %2728 = vrcp.f32 %v1260_v22  ;;  %v2648_v22 = vunpack.i.h.bf16 %v3342_v38 }
 0x353   :  { %2730 = vpow2.f32 %v1223_v21  ;;  %v1164_v32 = vsub.f32 %v3455_v46, %v1128_v44  ;;  %v1166_v46 = vsub.f32 %v3408_v36, %v3510_v52  ;;  %v2628_v44 = vunpack.i.h.bf16 %v3325_v17 }
 0x355   :  { %v3576_v43 = vpop.eup %2726  ;;  %v1225_v50 = vmul.f32 1.442695, %v1164_v32  ;;  %v2633_v32 = vunpack.i.h.bf16 %v3321_v14 }
 0x356   :  { %v1309_v53 = vsel %vm208_vm1, %v3576_v43, 0.0 }
 0x357   :  { %1310 = vadd.xlane.f32.xlu1 %v1309_v53  ;;  %1307 = vadd.xlane.f32.xlu2 %v1306_v39 }
 0x358   :  { %v2729_v13 = vpop.eup %2728 }
 0x359   :  { %v1368_v31 = vmul.f32 %v2729_v13, %v3453_v42  ;;  %v3585_v33 = vpop.eup %2730  ;;  %v2649_v42 = vpack.i.bf16 %v3182_v8, %v3081_v47  ;;  %v1229_v47 = vmul.f32 1.442695, %v1166_v46 }
 0x35a   :  { %v1257_v41 = vpop.xlane.xlu1 %1256  ;;  %v1315_v37 = vsel %vm208_vm1, %v3585_v33, 0.0 }
 0x35b   :  { %2732 = vrcp.f32 %v1257_v41  ;;  %2527 = vmatmul.msk.f32.vlgmr.msrb.gmra.mxu2 %vm208_vm1, %v1368_v31  ;;  %v2647_v31 = vunpack.i.l.bf16 %v3342_v38  ;;  %v2627_v41 = vunpack.i.l.bf16 %v3325_v17 }
 0x35c   :  { %1854 = vmatpush.msrb.mxu2 %v2623_v54  ;;  %2734 = vpow2.f32 %v1227_v60 }
 0x35d   :  { %2736 = vpow2.f32 %v1225_v50 }
 0x35e   :  { %2738 = vpow2.f32 %v1229_v47 }
 0x35f   :  { %1316 = vadd.xlane.f32.xlu1 %v1315_v37 }
 0x361   :  { %v2733_v58 = vpop.eup %2732 }
 0x362   :  { %v1367_v48 = vmul.f32 %v2733_v58, %v3461_v56  ;;  %v3594_v9 = vpop.eup %2734  ;;  %v2632_v58 = vunpack.i.l.bf16 %v3321_v14 }
 0x363   :  { %2650 = vrot.lane.b32.xlu0 %v2649_v42, %s2895_s12  ;;  %v1321_v28 = vsel %vm208_vm1, %v3594_v9, 0.0  ;;  %v3603_v8 = vpop.eup %2736 }
 0x364   :  { %2526 = vmatmul.msk.f32.vlgmr.msrb.gmra.mxu1 %vm208_vm1, %v1367_v48  ;;  %v1318_v56 = vsel %vm208_vm1, %v3603_v8, 0.0  ;;  %v3611_v52 = vpop.eup %2738 }
 0x365   :  { %1828 = vmatpush.msrb.mxu1 %v2618_v2  ;;  %v1324_v23 = vsel %vm208_vm1, %v3611_v52, 0.0 }
 0x367   :  { %1322 = vadd.xlane.f32.xlu1 %v1321_v28  ;;  %v2637_v28 = vunpack.i.l.bf16 %v3327_v16 }
 0x36b   :  { %2197 = vrot.lane.b32.xlu0 %v3156_v0, %s2895_s12 }
 0x36f   :  { %2145 = vrot.lane.b32.xlu2 %v3172_v7, %s2895_s12  ;;  %1319 = vadd.xlane.f32.xlu1 %v1318_v56 }
 0x371   :  { %v1263_v36 = vpop.xlane.xlu2 %1262 }
 0x372   :  { %2740 = vrcp.f32 %v1263_v36 }
 0x377   :  { %1325 = vadd.xlane.f32.xlu1 %v1324_v23 }
 0x378   :  { %v2741_v6 = vpop.eup %2740 }
 0x379   :  { %v1369_v30 = vmul.f32 %v2741_v6, %v3473_v49  ;;  %v1266_v0 = vpop.xlane.xlu2 %1265 }
 0x37a   :  { %2742 = vrcp.f32 %v1266_v0 }
 0x37b   :  { %2528 = vmatmul.msk.f32.vlgmr.msra.gmra.mxu3 %vm208_vm1, %v1369_v30 }
 0x37c   :  { %1880 = vmatpush.msra.mxu3 %v2617_v4 }
 0x380   :  { %v2743_v7 = vpop.eup %2742 }
 0x381   :  { %v1370_v45 = vmul.f32 %v2743_v7, %v3478_v55 }
 0x383   :  { %2529 = vmatmul.msk.f32.vlgmr.msrb.gmra.mxu0 %vm208_vm1, %v1370_v45 }
 0x384   :  { %1906 = vmatpush.msrb.mxu0 %v2622_v26 }
 0x388   :  { %v3658_v4 = vpop.f32.mrf.mxu1 }
 0x38a   :  { %v3621_v34 = vpop.xlane.xlu0 %1313 }
 0x392   :  { %v1272_v1 = vpop.xlane.xlu1 %1271  ;;  %v1269_v5 = vpop.xlane.xlu0 %1268 }
 0x393   :  { %2744 = vrcp.f32 %v1272_v1 }
 0x394   :  { %2746 = vrcp.f32 %v1269_v5 }
 0x399   :  { %v2745_v49 = vpop.eup %2744 }
 0x39a   :  { %v2747_v15 = vpop.eup %2746  ;;  %v1372_v11 = vmul.f32 %v2745_v49, %v3503_v51  ;;  %v1281_v20 = vpop.xlane.xlu1 %1280 }
 0x39b   :  { %v1275_v21 = vpop.xlane.xlu0 %1274  ;;  %v1371_v55 = vmul.f32 %v2747_v15, %v3499_v35  ;;  %2748 = vrcp.f32 %v1281_v20  ;;  %v1278_v18 = vpop.xlane.xlu2 %1277 }
 0x39c   :  { %2750 = vrcp.f32 %v1278_v18  ;;  %2531 = vmatmul.msk.f32.vlgmr.msra.gmra.mxu2 %vm208_vm1, %v1372_v11  ;;  %v3666_v11 = vpop.f32.mrf.mxu2 }
 0x39d   :  { %2752 = vrcp.f32 %v1275_v21  ;;  %2530 = vmatmul.msk.f32.vlgmr.msra.gmra.mxu1 %vm208_vm1, %v1371_v55  ;;  %1958 = vmatpush.msra.mxu2 %v2648_v22 }
 0x39e   :  { %1932 = vmatpush.msra.mxu1 %v2628_v44 }
 0x3a1   :  { %v2749_v19 = vpop.eup %2748 }
 0x3a2   :  { %v2751_v51 = vpop.eup %2750  ;;  %v1375_v53 = vmul.f32 %v2749_v19, %v3512_v12  ;;  %v1284_v39 = vpop.xlane.xlu1 %1283 }
 0x3a3   :  { %v1287_v13 = vpop.xlane.xlu0 %1286  ;;  %v2753_v60 = vpop.eup %2752  ;;  %v1374_v35 = vmul.f32 %v2751_v51, %v3516_v27  ;;  %2754 = vrcp.f32 %v1284_v39 }
 0x3a4   :  { %v1373_v54 = vmul.f32 %v2753_v60, %v3514_v62  ;;  %2756 = vrcp.f32 %v1287_v13  ;;  %v2638_v62 = vunpack.i.h.bf16 %v3327_v16  ;;  %v3680_v13 = vpop.f32.mrf.mxu0 }
 0x3a5   :  { %2533 = vmatmul.msk.f32.vlgmr.msra.gmra.mxu0 %vm208_vm1, %v1374_v35  ;;  %2534 = vmatmul.msk.f32.vlgmr.msrb.gmra.mxu1 %vm208_vm1, %v1375_v53 }
 0x3a6   :  { %2532 = vmatmul.msk.f32.vlgmr.msrb.gmra.mxu3 %vm208_vm1, %v1373_v54  ;;  %2010 = vmatpush.msra.mxu0 %v2647_v31  ;;  %v3687_v54 = vpop.f32.mrf.mxu3 }
 0x3a7   :  { %1984 = vmatpush.msrb.mxu3 %v2627_v41  ;;  %2036 = vmatpush.msrb.mxu1 %v2633_v32 }
 0x3a9   :  { %v2755_v12 = vpop.eup %2754 }
 0x3aa   :  { %v2757_v27 = vpop.eup %2756  ;;  %v1376_v38 = vmul.f32 %v2755_v12, %v3524_v57  ;;  %v1299_v37 = vpop.xlane.xlu1 %1298 }
 0x3ab   :  { %v1377_v17 = vmul.f32 %v2757_v27, %v3528_v59  ;;  %2758 = vrcp.f32 %v1299_v37 }
 0x3ac   :  { %2535 = vmatmul.msk.f32.vlgmr.msrb.gmra.mxu2 %vm208_vm1, %v1376_v38 }
 0x3ad   :  { %2062 = vmatpush.msrb.mxu2 %v2638_v62 }
 0x3ae   :  { %2536 = vmatmul.msk.f32.vlgmr.msra.gmra.mxu3 %vm208_vm1, %v1377_v17 }
 0x3af   :  { %2088 = vmatpush.msra.mxu3 %v2632_v58  ;;  %v3672_v55 = vpop.f32.mrf.mxu2 }
 0x3b1   :  { %v2759_v42 = vpop.eup %2758 }
 0x3b2   :  { %v1381_v50 = vmul.f32 %v2759_v42, %v3539_v3  ;;  %v1290_v48 = vpop.xlane.xlu2 %1289 }
 0x3b3   :  { %2760 = vrcp.f32 %v1290_v48 }
 0x3b6   :  { %2540 = vmatmul.msk.f32.vlgmr.msrb.gmra.mxu3 %vm208_vm1, %v1381_v50 }
 0x3b9   :  { %v2761_v57 = vpop.eup %2760 }
 0x3ba   :  { %v1378_v2 = vmul.f32 %v2761_v57, %v3547_v25  ;;  %v1296_v59 = vpop.xlane.xlu2 %1295  ;;  %v1293_v46 = vpop.xlane.xlu0 %1292 }
 0x3bb   :  { %2762 = vrcp.f32 %v1296_v59 }
 0x3bc   :  { %2764 = vrcp.f32 %v1293_v46  ;;  %2537 = vmatmul.msk.f32.vlgmr.msrb.gmra.mxu0 %vm208_vm1, %v1378_v2 }
 0x3bd   :  { %2114 = vmatpush.msrb.mxu0 %v2637_v28 }
 0x3c1   :  { %v2763_v14 = vpop.eup %2762 }
 0x3c2   :  { %v2765_v47 = vpop.eup %2764  ;;  %v1380_v3 = vmul.f32 %v2763_v14, %v3552_v10  ;;  %v1302_v56 = vpop.xlane.xlu2 %1301 }
 0x3c3   :  { %v1305_v36 = vpop.xlane.xlu0 %1304  ;;  %v1379_v23 = vmul.f32 %v2765_v47, %v3554_v61  ;;  %2766 = vrcp.f32 %v1302_v56  ;;  %v2348_v56 = vld [vmem:[#allocation7 + $0x18] sm:$0xff] }
 0x3c4   :  { %2768 = vrcp.f32 %v1305_v36  ;;  %2539 = vmatmul.msk.f32.vlgmr.msra.gmra.mxu2 %vm208_vm1, %v1380_v3  ;;  %v2347_v36 = vld [vmem:[#allocation7 + $0x10] sm:$0xff] }
 0x3c5   :  { %2538 = vmatmul.msk.f32.vlgmr.msra.gmra.mxu1 %vm208_vm1, %v1379_v23  ;;  %2770 = vrcp.f32 %v3621_v34  ;;  %v2346_v23 = vld [vmem:[#allocation7 + $0x8] sm:$0xff] }
 0x3c9   :  { %v2767_v16 = vpop.eup %2766  ;;  %v3684_v35 = vpop.f32.mrf.mxu0 }
 0x3ca   :  { %v2769_v25 = vpop.eup %2768  ;;  %v1382_v6 = vmul.f32 %v2767_v16, %v3561_v24  ;;  %v1311_v30 = vpop.xlane.xlu1 %1310  ;;  %v2345_v16 = vld [vmem:[#allocation7] sm:$0xff] }
 0x3cb   :  { %v1308_v0 = vpop.xlane.xlu2 %1307  ;;  %v1383_v10 = vmul.f32 %v2769_v25, %v3564_v40  ;;  %2772 = vrcp.f32 %v1311_v30  ;;  %v2771_v61 = vpop.eup %2770 }
 0x3cc   :  { %2774 = vrcp.f32 %v1308_v0  ;;  %2541 = vmatmul.msk.f32.vlgmr.msra.gmra.mxu0 %vm208_vm1, %v1382_v6  ;;  %v1386_v26 = vmul.f32 %v2771_v61, %v3493_v63 }
 0x3cd   :  { %2542 = vmatmul.msk.f32.vlgmr.msrb.gmra.mxu1 %vm208_vm1, %v1383_v10 }
 0x3d1   :  { %v2773_v7 = vpop.eup %2772 }
 0x3d2   :  { %v2775_v45 = vpop.eup %2774  ;;  %v1385_v34 = vmul.f32 %v2773_v7, %v3576_v43  ;;  %v1317_v1 = vpop.xlane.xlu1 %1316 }
 0x3d3   :  { %v2146_v24 = vpop.permute.xlu2 %2145  ;;  %v1384_v5 = vmul.f32 %v2775_v45, %v3574_v29  ;;  %2776 = vrcp.f32 %v1317_v1  ;;  %v3668_v43 = vpop.f32.mrf.mxu1 }
 0x3d4   :  { %2166 = vmatpush.msra.mxu2 %v2146_v24  ;;  %2544 = vmatmul.msk.f32.vlgmr.msra.gmra.mxu3 %vm208_vm1, %v1385_v34 }
 0x3d5   :  { %2545 = vmatmul.msk.f32.vlgmr.msrb.gmra.mxu0 %vm208_vm1, %v1386_v26  ;;  %2543 = vmatmul.msk.f32.vlgmr.msrb.gmra.mxu2 %vm208_vm1, %v1384_v5  ;;  %v2651_v40 = vpop.permute.xlu0 %2650 }
 0x3d6   :  { %v2653_v49 = vunpack.i.h.bf16 %v2651_v40  ;;  %v2652_v15 = vunpack.i.l.bf16 %v2651_v40  ;;  %2558 = vmatpush.msrb.mxu2 %v2348_v56 }
 0x3d8   :  { %2140 = vmatpush.msra.mxu1 %v2653_v49  ;;  %2192 = vmatpush.msrb.mxu3 %v2652_v15 }
 0x3d9   :  { %v2777_v63 = vpop.eup %2776  ;;  %2560 = vmatpush.msrb.mxu2 %v2347_v36 }
 0x3da   :  { %v1387_v29 = vmul.f32 %v2777_v63, %v3585_v33  ;;  %v1323_v20 = vpop.xlane.xlu1 %1322  ;;  %2389 = vmatpush.msrb.mxu1 %v2348_v56  ;;  %2559 = vmatpush.msra.mxu3 %v2348_v56 }
 0x3db   :  { %2778 = vrcp.f32 %v1323_v20  ;;  %2562 = vmatpush.msrb.mxu2 %v2346_v23 }
 0x3dc   :  { %2546 = vmatmul.msk.f32.vlgmr.msra.gmra.mxu1 %vm208_vm1, %v1387_v29  ;;  %2561 = vmatpush.msra.mxu3 %v2347_v36 }
 0x3dd   :  { %v2198_v21 = vpop.permute.xlu0 %2197  ;;  %2390 = vmatpush.msrb.mxu1 %v2347_v36  ;;  %2564 = vmatpush.msrb.mxu2 %v2345_v16 }
 0x3de   :  { %2218 = vmatpush.msra.mxu0 %v2198_v21  ;;  %v1648_v33 = vpop.f32.mrf.mxu2  ;;  %2563 = vmatpush.msra.mxu3 %v2346_v23 }
 0x3df   :  { %2391 = vmatpush.msrb.mxu1 %v2346_v23 }
 0x3e0   :  { %2565 = vmatpush.msra.mxu3 %v2345_v16 }
 0x3e1   :  { %v2779_v22 = vpop.eup %2778  ;;  %v1622_v18 = vpop.f32.mrf.mxu1  ;;  %2392 = vmatpush.msrb.mxu1 %v2345_v16 }
 0x3e2   :  { %v1389_v44 = vmul.f32 %v2779_v22, %v3594_v9  ;;  %2231 = vrot.lane.b32.xlu2 %v1622_v18, %s2888_s27  ;;  %v1320_v19 = vpop.xlane.xlu1 %1319 }
 0x3e3   :  { %2780 = vrcp.f32 %v1320_v19 }
 0x3e4   :  { %2548 = vmatmul.msk.f32.vlgmr.msrb.gmra.mxu3 %vm208_vm1, %v1389_v44 }
 0x3e9   :  { %v2781_v51 = vpop.eup %2780 }
 0x3ea   :  { %v1388_v53 = vmul.f32 %v2781_v51, %v3603_v8  ;;  %v1326_v39 = vpop.xlane.xlu1 %1325  ;;  %2233 = vrot.lane.b32.xlu2 %v1648_v33, %s2888_s27  ;;  %v3689_v8 = vpop.f32.mrf.mxu3 }
 0x3eb   :  { %2782 = vrcp.f32 %v1326_v39 }
 0x3ec   :  { %2547 = vmatmul.msk.f32.vlgmr.msra.gmra.mxu2 %vm208_vm1, %v1388_v53 }
 0x3f1   :  { %v2783_v60 = vpop.eup %2782 }
 0x3f2   :  { %v1390_v9 = vmul.f32 %v2783_v60, %v3611_v52 }
 0x3f4   :  { %2549 = vmatmul.msk.f32.vlgmr.msra.gmra.mxu0 %vm208_vm1, %v1390_v9 }
 0x3fe   :  { %v1674_v32 = vpop.f32.mrf.mxu3 }
 0x400   :  { %v1700_v31 = vpop.f32.mrf.mxu0 }
 0x401   :  { %2237 = vrot.lane.b32.xlu1 %v1700_v31, %s2888_s27 }
 0x41a   :  { %v1726_v41 = vpop.f32.mrf.mxu1 }
 0x41b   :  { %2239 = vrot.lane.b32.xlu1 %v1726_v41, %s2888_s27 }
 0x41f   :  { %v1752_v12 = vpop.f32.mrf.mxu2 }
 0x422   :  { %v1804_v27 = vpop.f32.mrf.mxu0  ;;  %v1830_v38 = vpop.f32.mrf.mxu1 }
 0x423   :  { %2263 = vrot.lane.b32.xlu0 %v1830_v38, %s2896_s13  ;;  %2241 = vrot.lane.b32.xlu1 %v1752_v12, %s2888_s27 }
 0x424   :  { %2245 = vrot.lane.b32.xlu2 %v1804_v27, %s2888_s27 }
 0x429   :  { %v1778_v52 = vpop.f32.mrf.mxu3 }
 0x42c   :  { %2243 = vrot.lane.b32.xlu2 %v1778_v52, %s2888_s27 }
 0x42f   :  { %v1856_v58 = vpop.f32.mrf.mxu2 }
 0x431   :  { %v1882_v37 = vpop.f32.mrf.mxu3 }
 0x439   :  { %v1986_v62 = vpop.f32.mrf.mxu3  ;;  %v1908_v17 = vpop.f32.mrf.mxu0 }
 0x43a   :  { %2275 = vrot.lane.b32.xlu2 %v1986_v62, %s2896_s13  ;;  %2269 = vrot.lane.b32.xlu0 %v1908_v17, %s2896_s13 }
 0x43c   :  { %v2232_v0 = vpop.permute.xlu2 %2231 }
 0x43d   :  { %v2319_v45 = vsel %vm208_vm1, %v3658_v4, %v2232_v0 }
 0x442   :  { %v1934_v42 = vpop.f32.mrf.mxu1  ;;  %2265 = vrot.lane.b32.xlu0 %v1856_v58, %s2896_s13 }
 0x443   :  { %2271 = vrot.lane.b32.xlu1 %v1934_v42, %s2896_s13  ;;  %v2655_v42 = vld [vmem:[%s3765_s4] ss:$0 sm:$0xff]  ;;  %s2898_s4 = smov [#allocation8]  }
 0x444   :  { %v2234_v7 = vpop.permute.xlu2 %2233  ;;  %s2430_s17 = sshll.u32 %s2898_s4, 4  ;;  %s2431_s17 = int_to_ptr.vmem [resolvable:$true] %s2430_s17 }
 0x445   :  { %v2320_v29 = vsel %vm208_vm1, %v3666_v11, %v2234_v7 }
 0x447   :  { %v1960_v48 = vpop.f32.mrf.mxu2 }
 0x449   :  { %v2012_v50 = vpop.f32.mrf.mxu0 }
 0x44a   :  { %v2038_v57 = vpop.f32.mrf.mxu1  ;;  %2277 = vrot.lane.b32.xlu2 %v2012_v50, %s2896_s13 }
 0x44b   :  { %2273 = vrot.lane.b32.xlu1 %v1960_v48, %s2896_s13  ;;  %2295 = vrot.lane.b32.xlu0 %v2038_v57, %s2897_s14 }
 0x452   :  { %v2116_v2 = vpop.f32.mrf.mxu0  ;;  %2235 = vrot.lane.b32.xlu2 %v1674_v32, %s2888_s27 }
 0x453   :  { %2301 = vrot.lane.b32.xlu0 %v2116_v2, %s2897_s14 }
 0x457   :  { %v2090_v46 = vpop.f32.mrf.mxu3 }
 0x458   :  { %v2064_v59 = vpop.f32.mrf.mxu2 }
 0x459   :  { %v2142_v28 = vpop.f32.mrf.mxu1 }
 0x45b   :  { %2297 = vrot.lane.b32.xlu0 %v2064_v59, %s2897_s14 }
 0x463   :  { %2303 = vrot.lane.b32.xlu0 %v2142_v28, %s2897_s14 }
 0x467   :  { %v2194_v14 = vpop.f32.mrf.mxu3 }
 0x468   :  { %2307 = vrot.lane.b32.xlu1 %v2194_v14, %s2897_s14 }
 0x46f   :  { %v2168_v47 = vpop.f32.mrf.mxu2 }
 0x470   :  { %2305 = vrot.lane.b32.xlu0 %v2168_v47, %s2897_s14 }
 0x471   :  { %v2220_v3 = vpop.f32.mrf.mxu0 }
 0x472   :  { %2309 = vrot.lane.b32.xlu1 %v2220_v3, %s2897_s14 }
 0x473   :  { %v2238_v30 = vpop.permute.xlu1 %2237 }
 0x474   :  { %v2322_v40 = vsel %vm208_vm1, %v3680_v13, %v2238_v30 }
 0x478   :  { %2267 = vrot.lane.b32.xlu0 %v1882_v37, %s2896_s13 }
 0x47a   :  { %2299 = vrot.lane.b32.xlu1 %v2090_v46, %s2897_s14 }
 0x47e   :  { %v2246_v5 = vpop.permute.xlu2 %2245 }
 0x47f   :  { %v2326_v12 = vsel %vm208_vm1, %v3684_v35, %v2246_v5 }
 0x486   :  { %v2244_v20 = vpop.permute.xlu2 %2243 }
 0x487   :  { %v2325_v11 = vsel %vm208_vm1, %v3689_v8, %v2244_v20 }
 0x48d   :  { %v2240_v61 = vpop.permute.xlu1 %2239 }
 0x48e   :  { %v2323_v19 = vsel %vm208_vm1, %v3668_v43, %v2240_v61 }
 0x494   :  { %v2276_v51 = vpop.permute.xlu2 %2275 }
 0x495   :  { %v2264_v25 = vpop.permute.xlu0 %2263  ;;  %v2242_v1 = vpop.permute.xlu1 %2241  ;;  %v2334_v13 = vsel %vm2327_vm3, %v2325_v11, %v2276_v51 }
 0x496   :  { %v2328_v26 = vsel %vm2327_vm3, %v2319_v45, %v2264_v25  ;;  %v2324_v43 = vsel %vm208_vm1, %v3672_v55, %v2242_v1 }
 0x4a4   :  { %v2278_v31 = vpop.permute.xlu2 %2277 }
 0x4a5   :  { %v2335_v8 = vsel %vm2327_vm3, %v2326_v12, %v2278_v31 }
 0x4ac   :  { %v2270_v6 = vpop.permute.xlu0 %2269  ;;  %v2236_v37 = vpop.permute.xlu2 %2235 }
 0x4ad   :  { %v2331_v49 = vsel %vm2327_vm3, %v2322_v40, %v2270_v6  ;;  %v2321_v55 = vsel %vm208_vm1, %v3687_v54, %v2236_v37 }
 0x4b4   :  { %v2266_v10 = vpop.permute.xlu0 %2265 }
 0x4b5   :  { %v2272_v4 = vpop.permute.xlu1 %2271  ;;  %v2329_v21 = vsel %vm2327_vm3, %v2320_v29, %v2266_v10 }
 0x4b6   :  { %v2332_v33 = vsel %vm2327_vm3, %v2323_v19, %v2272_v4 }
 0x4bd   :  { %v2296_v34 = vpop.permute.xlu0 %2295  ;;  %v2274_v44 = vpop.permute.xlu1 %2273 }
 0x4be   :  { %v2337_v24 = vsel %vm2336_vm2, %v2328_v26, %v2296_v34  ;;  %v2333_v41 = vsel %vm2327_vm3, %v2324_v43, %v2274_v44 }
 0x4bf   :  { %2550 = vmatmul.msk.f32.vlgmr.msrb.gmra.mxu1 %vm84_vm0, %v2337_v24 }
 0x4c5   :  { %v2302_v15 = vpop.permute.xlu0 %2301 }
 0x4c6   :  { %v2340_v63 = vsel %vm2336_vm2, %v2331_v49, %v2302_v15 }
 0x4c7   :  { %2553 = vmatmul.msk.f32.vlgmr.msrb.gmra.mxu2 %vm84_vm0, %v2340_v63 }
 0x4cd   :  { %v2298_v22 = vpop.permute.xlu0 %2297 }
 0x4ce   :  { %v2338_v18 = vsel %vm2336_vm2, %v2329_v21, %v2298_v22 }
 0x4cf   :  { %2551 = vmatmul.msk.f32.gmra.mxu1 %vm84_vm0, %v2338_v18 }
 0x4d5   :  { %v2304_v53 = vpop.permute.xlu0 %2303 }
 0x4d6   :  { %v2341_v39 = vsel %vm2336_vm2, %v2332_v33, %v2304_v53 }
 0x4d7   :  { %2554 = vmatmul.msk.f32.gmra.mxu2 %vm84_vm0, %v2341_v39 }
 0x4da   :  { %v2308_v60 = vpop.permute.xlu1 %2307 }
 0x4db   :  { %v2343_v9 = vsel %vm2336_vm2, %v2334_v13, %v2308_v60 }
 0x4dc   :  { %2556 = vmatmul.msk.f32.vlgmr.msra.gmra.mxu3 %vm84_vm0, %v2343_v9 }
 0x4e2   :  { %v2306_v32 = vpop.permute.xlu0 %2305 }
 0x4e3   :  { %v2342_v27 = vsel %vm2336_vm2, %v2333_v41, %v2306_v32 }
 0x4e4   :  { %2555 = vmatmul.msk.f32.gmra.mxu2 %vm84_vm0, %v2342_v27  ;;  %v2310_v38 = vpop.permute.xlu1 %2309 }
 0x4e5   :  { %v2344_v52 = vsel %vm2336_vm2, %v2335_v8, %v2310_v38 }
 0x4e6   :  { %2557 = vmatmul.msk.f32.gmra.mxu3 %vm84_vm0, %v2344_v52 }
 0x4ea   :  { %v2268_v62 = vpop.permute.xlu0 %2267 }
 0x4eb   :  { %v2330_v17 = vsel %vm2327_vm3, %v2321_v55, %v2268_v62 }
 0x4ec   :  { %v2300_v58 = vpop.permute.xlu1 %2299 }
 0x4ed   :  { %v2339_v35 = vsel %vm2336_vm2, %v2330_v17, %v2300_v58 }
 0x4ee   :  { %2552 = vmatmul.msk.f32.gmra.mxu1 %vm84_vm0, %v2339_v35 }
 0x53c   :  { %v2394_v50 = vpop.f32.mrf.mxu1 }
 0x53d   :  { %v2395_v48 = vadd.f32 %v2655_v42, %v2394_v50 }
 0x53f   :  { %2418 = vst.msk [vmem:[#allocation8] sm:$0xff] %vm84_vm0, %v2395_v48 }
 0x54a   :  { %v2403_v57 = vpop.f32.mrf.mxu2 }
 0x54b   :  { %v2404_v2 = vadd.f32 %v2655_v42, %v2403_v57 }
 0x54c   :  { %v2397_v59 = vpop.f32.mrf.mxu1 }
 0x54d   :  { %2421 = vst.msk [vmem:[#allocation8 + $0x18] sm:$0xff] %vm84_vm0, %v2404_v2  ;;  %v2398_v54 = vadd.f32 %v2655_v42, %v2397_v59 }
 0x54f   :  { %2419 = vst.msk [vmem:[#allocation8 + $0x8] sm:$0xff] %vm84_vm0, %v2398_v54 }
 0x55a   :  { %v2406_v46 = vpop.f32.mrf.mxu2 }
 0x55b   :  { %v2407_v28 = vadd.f32 %v2655_v42, %v2406_v46 }
 0x55d   :  { %2422 = vst.msk [vmem:[#allocation8 + $0x20] sm:$0xff] %vm84_vm0, %v2407_v28 }
 0x55f   :  { %v2412_v14 = vpop.f32.mrf.mxu3 }
 0x560   :  { %v2413_v47 = vadd.f32 %v2655_v42, %v2412_v14 }
 0x562   :  { %2424 = vst.msk [vmem:[#allocation8 + $0x30] sm:$0xff] %vm84_vm0, %v2413_v47 }
 0x567   :  { %v2409_v3 = vpop.f32.mrf.mxu2 }
 0x568   :  { %v2410_v56 = vadd.f32 %v2655_v42, %v2409_v3 }
 0x569   :  { %v2415_v36 = vpop.f32.mrf.mxu3 }
 0x56a   :  { %2423 = vst.msk [vmem:[#allocation8 + $0x28] sm:$0xff] %vm84_vm0, %v2410_v56  ;;  %v2416_v23 = vadd.f32 %v2655_v42, %v2415_v36 }
 0x56b   :  { %v2400_v16 = vpop.f32.mrf.mxu1 }
 0x56c   :  { %2425 = vst.msk [vmem:[#allocation8 + $0x38] sm:$0xff] %vm84_vm0, %v2416_v23  ;;  %v2401_v25 = vadd.f32 %v2655_v42, %v2400_v16 }
 0x56e   :  { %2420 = vst.msk [vmem:[#allocation8 + $0x10] sm:$0xff] %vm84_vm0, %v2401_v25 }
 0x56f   :  { %2438 = dma.vmem_to_hbm [thread:$0]  %s2431_s17, 1024, %s2433_s20, [#allocation4], %s2887_s26, %s2887_s26, %s2888_s27  }
 0x570   :  { %2884 = dma.done.wait [#allocation4], 1024  }
 0x571   :  { %2885 = vsyncadd [#allocation4], 4294966272 }
 0x572   :  { %2443 = vsyncpa [#allocation3], 1 }
 0x573   :  { %2444 = vsyncpa [#allocation6], 1 }
 0x574   :  { %2445 = vsyncpa [#allocation4], 1 }

</bundles_post_ra>
